<compile_context>
chip_gen: v6e
topology: v6e:2x2x1
jax: 0.10.0
libtpu: 0.0.40
codegen_flags: <defaults>
</compile_context>

<pallas_src>
import functools

import jax
import jax.numpy as jnp
from jax.experimental import pallas as pl
from jax.experimental.pallas import tpu as pltpu


# ---------------------------------------------------------------------------
# Fused HGBlock kernel (one grid step == `images_per_step` images)
# ---------------------------------------------------------------------------
def _hgblock_kernel(x_ref, wm0_ref, wmr_ref, bm_ref, wsc_ref, bsc_ref,
                    wec_ref, bec_ref, tmask_ref, o_ref, cat_ref,
                    *, k, n, c1, cm, W, add):
    L = x_ref.shape[-1]          # packed lane axis: images_per_step * H*W
    p = k // 2                   # autopad for odd k, stride 1

    x = x_ref[0]                                     # (c1, L) f32
    cat_ref[0:c1, :] = x.astype(jnp.bfloat16)        # concat slot 0 (bf16)

    def conv_kxk(act, w_flat, bias):
        # act: (cin, L) f32, register resident.  Build im2col as a value:
        # per tap, roll along the flattened-spatial lane axis (XLU), zero out
        # invalid border / cross-image lanes, then one bf16 cast for the lot.
        taps = []
        for kh in range(k):
            for kw in range(k):
                t = kh * k + kw
                s = (kh - p) * W + (kw - p)          # flattened spatial shift
                if s == 0:                           # center tap: no roll/mask
                    tap = act
                else:
                    tap = pltpu.roll(act, shift=(-s) % L, axis=1)
                    tap = tap * tmask_ref[t:t + 1, :]
                taps.append(tap)
        col = jnp.concatenate(taps, axis=0).astype(jnp.bfloat16)  # (kk*cin, L)
        # One MXU matmul per conv: bf16 operands, f32 accumulation.
        acc = jnp.dot(w_flat, col, preferred_element_type=jnp.float32)
        return jnp.maximum(acc + bias, 0.0)          # folded-BN bias + ReLU

    act = conv_kxk(x, wm0_ref[...], bm_ref[0])       # first middle conv (cin=c1)
    cat_ref[c1:c1 + cm, :] = act.astype(jnp.bfloat16)
    for i in range(1, n):                            # remaining middle convs
        act = conv_kxk(act, wmr_ref[i - 1], bm_ref[i])
        cat_ref[c1 + i * cm:c1 + (i + 1) * cm, :] = act.astype(jnp.bfloat16)

    # squeeze (1x1) + excite (1x1), all VMEM/vreg resident
    sc = jnp.dot(wsc_ref[...], cat_ref[...], preferred_element_type=jnp.float32)
    sc = jnp.maximum(sc + bsc_ref[...], 0.0)
    ec = jnp.dot(wec_ref[...], sc.astype(jnp.bfloat16),
                 preferred_element_type=jnp.float32)
    ec = jnp.maximum(ec + bec_ref[...], 0.0)
    if add:                                          # shortcut (requires c1 == c2)
        ec = ec + x
    o_ref[0] = ec                                    # (c2, L) lane-dense store


# ---------------------------------------------------------------------------
# Wrapper
# ---------------------------------------------------------------------------
def _auto_images_per_step(N):
    """One image per TensorCore on 2-TC chips (v7x); whole batch otherwise."""
    try:
        kind = jax.devices()[0].device_kind.lower()
    except Exception:
        kind = ""
    if "7" in kind:                       # v7x: 2 TensorCores per chip
        return N // 2 if (N % 2 == 0 and N >= 2) else 1
    return N                              # v5e / v6e / older: single TC


def hgblock_forward(x_nchw, params, *, k=3, add=False, images_per_step=None):
    N, c1, H, Wd = x_nchw.shape
    M = H * Wd
    n = len(params["m"])
    cm = params["m"][0][0].shape[0]
    c2h = params["sc"][0].shape[0]
    c2 = params["ec"][0].shape[0]
    ccat = c1 + n * cm
    kk = k * k
    p = k // 2
    if add:
        assert c1 == c2, "shortcut add requires c1 == c2"

    ips = images_per_step or _auto_images_per_step(N)
    if N % ips != 0:
        ips = 1
    G = N // ips
    L = ips * M                                       # packed lane axis length

    def pack_kxk(w_fold):
        # (cout, cin, kh, kw) -> (cout, kh, kw, cin) -> (cout, kk*cin)
        cout, cin = w_fold.shape[:2]
        return jnp.transpose(w_fold, (0, 2, 3, 1)).reshape(cout, kk * cin)

    wm0 = pack_kxk(params["m"][0][0]).astype(jnp.bfloat16)        # (cm, kk*c1)
    if n > 1:
        wmr = jnp.stack([pack_kxk(w) for w, _ in params["m"][1:]]
                        ).astype(jnp.bfloat16)                    # (n-1, cm, kk*cm)
    else:
        wmr = jnp.zeros((1, cm, kk * cm), jnp.bfloat16)           # never read
    bm = jnp.stack([b.reshape(cm, 1) for _, b in params["m"]]).astype(jnp.float32)
    wsc = params["sc"][0].reshape(c2h, ccat).astype(jnp.bfloat16)
    bsc = params["sc"][1].reshape(c2h, 1).astype(jnp.float32)
    wec = params["ec"][0].reshape(c2, c2h).astype(jnp.bfloat16)
    bec = params["ec"][1].reshape(c2, 1).astype(jnp.float32)

    # Per-tap H+W validity masks over the packed lane axis (also stops rolls
    # wrapping between images packed onto the same lane axis).
    l_idx = jnp.arange(L, dtype=jnp.int32)
    m_idx = l_idx % M
    h_idx = m_idx // Wd
    w_idx = m_idx % Wd
    rows = []
    for kh in range(k):
        for kw in range(k):
            hh = h_idx + (kh - p)
            ww = w_idx + (kw - p)
            rows.append(((hh >= 0) & (hh < H) & (ww >= 0) & (ww < Wd)
                         ).astype(jnp.float32))
    tmask = jnp.stack(rows)                                        # (kk, L)

    # "CM" layout: (channels, packed spatial) per grid step, lane-dense.
    x = x_nchw.reshape(N, c1, M).astype(jnp.float32)
    xg = x.reshape(G, ips, c1, M).transpose(0, 2, 1, 3).reshape(G, c1, L)

    kernel = functools.partial(_hgblock_kernel, k=k, n=n, c1=c1, cm=cm,
                               W=Wd, add=add)

    out = pl.pallas_call(
        kernel,
        out_shape=jax.ShapeDtypeStruct((G, c2, L), jnp.float32),
        grid_spec=pltpu.PrefetchScalarGridSpec(
            num_scalar_prefetch=0,
            grid=(G,),
            in_specs=[
                pl.BlockSpec((1, c1, L), lambda b: (b, 0, 0)),
                pl.BlockSpec(wm0.shape, lambda b: (0, 0)),        # resident weights
                pl.BlockSpec(wmr.shape, lambda b: (0, 0, 0)),
                pl.BlockSpec(bm.shape, lambda b: (0, 0, 0)),
                pl.BlockSpec(wsc.shape, lambda b: (0, 0)),
                pl.BlockSpec(bsc.shape, lambda b: (0, 0)),
                pl.BlockSpec(wec.shape, lambda b: (0, 0)),
                pl.BlockSpec(bec.shape, lambda b: (0, 0)),
                pl.BlockSpec(tmask.shape, lambda b: (0, 0)),
            ],
            out_specs=pl.BlockSpec((1, c2, L), lambda b: (b, 0, 0)),
            scratch_shapes=[
                pltpu.VMEM((ccat, L), jnp.bfloat16),              # bf16 concat buf
            ],
        ),
        compiler_params=pltpu.CompilerParams(
            dimension_semantics=("parallel",)),       # 2 TCs on v7x
    )(xg, wm0, wmr, bm, wsc, bsc, wec, bec, tmask)

    out = out.reshape(G, c2, ips, M).transpose(0, 2, 1, 3)
    return out.reshape(N, c2, H, Wd)


# ---------------------------------------------------------------------------
# Parameter construction (deterministic synthetic init, BN folded)
# ---------------------------------------------------------------------------
def make_conv_params(key, cin, cout, k, eps=1e-3):
    kw_, kg, kb, km, kv = jax.random.split(key, 5)
    w = jax.random.normal(kw_, (cout, cin, k, k), jnp.float32) * 0.1
    gamma = jax.random.uniform(kg, (cout,), jnp.float32, 0.5, 1.5)
    beta = jax.random.normal(kb, (cout,), jnp.float32) * 0.1
    mean = jax.random.normal(km, (cout,), jnp.float32) * 0.1
    var = jax.random.uniform(kv, (cout,), jnp.float32, 0.5, 1.5)

    scale = gamma / jnp.sqrt(var + eps)              # fold BN into conv
    w_fold = w * scale[:, None, None, None]          # (cout, cin, k, k)
    b_fold = beta - mean * scale                     # (cout,)
    return w_fold, b_fold


def init_hgblock_params(key, c1, cm, c2, k, n):
    keys = jax.random.split(key, n + 2)
    m_params = [make_conv_params(keys[i], c1 if i == 0 else cm, cm, k)
                for i in range(n)]
    sc_params = make_conv_params(keys[n], c1 + n * cm, c2 // 2, 1)
    ec_params = make_conv_params(keys[n + 1], c2 // 2, c2, 1)
    return {"m": m_params, "sc": sc_params, "ec": ec_params}


# ---------------------------------------------------------------------------
# Pure-JAX reference (mirrors bf16 MXU operands / f32 accumulation)
# ---------------------------------------------------------------------------
def _ref_conv(x_nhwc, w_fold, bias, k):
    w_hwio = jnp.transpose(w_fold, (2, 3, 1, 0)).astype(jnp.bfloat16)
    out = jax.lax.conv_general_dilated(
        x_nhwc.astype(jnp.bfloat16), w_hwio, (1, 1), "SAME",
        dimension_numbers=("NHWC", "HWIO", "NHWC"),
        preferred_element_type=jnp.float32)
    return jnp.maximum(out + bias, 0.0)


def _ref_hgblock(x_nchw, params, k=3, add=False):
    x = jnp.transpose(x_nchw, (0, 2, 3, 1))
    y = [x]
    for w_fold, b in params["m"]:
        y.append(_ref_conv(y[-1], w_fold, b, k))
    cat = jnp.concatenate(y, axis=-1)
    out = _ref_conv(cat, *params["sc"], 1)
    out = _ref_conv(out, *params["ec"], 1)
    if add:
        out = out + x
    return jnp.transpose(out, (0, 3, 1, 2))


if __name__ == "__main__":
    # HGBlock(c1=8, cm=8, c2=16, k=3, n=6, lightconv=False, shortcut=False)
    c1, cm, c2, k, n = 8, 8, 16, 3, 6
    N, H, W = 2, 16, 16

    key = jax.random.PRNGKey(0)
    kx, kp = jax.random.split(key)
    x = jax.random.normal(kx, (N, c1, H, W), jnp.float32)   # NCHW like PyTorch
    params = init_hgblock_params(kp, c1, cm, c2, k, n)

    fwd = jax.jit(functools.partial(hgblock_forward, k=k, add=False))
    out = jax.block_until_ready(fwd(x, params))
    assert out.shape == (N, c2, H, W), out.shape

    ref = _ref_hgblock(x, params, k=k, add=False)
    max_err = float(jnp.max(jnp.abs(out - ref)))
    assert jnp.allclose(out, ref, atol=1e-2, rtol=1e-2), max_err

    print("KERNEL_OK")
</pallas_src>

<mosaic_0001>
module attributes {stable_mosaic.version = 11 : i64} {
  func.func @_hgblock_kernel(%arg0: i32, %arg1: memref<1x8x512xf32, #tpu.memory_space<vmem>>, %arg2: memref<8x72xbf16, #tpu.memory_space<vmem>>, %arg3: memref<5x8x72xbf16, #tpu.memory_space<vmem>>, %arg4: memref<6x8x1xf32, #tpu.memory_space<vmem>>, %arg5: memref<8x56xbf16, #tpu.memory_space<vmem>>, %arg6: memref<8x1xf32, #tpu.memory_space<vmem>>, %arg7: memref<16x8xbf16, #tpu.memory_space<vmem>>, %arg8: memref<16x1xf32, #tpu.memory_space<vmem>>, %arg9: memref<9x512xf32, #tpu.memory_space<vmem>>, %arg10: memref<1x16x512xf32, #tpu.memory_space<vmem>>, %arg11: memref<56x512xbf16, #tpu.memory_space<vmem>>) attributes {dimension_semantics = [#tpu.dimension_semantics<parallel>], iteration_bounds = array<i64: 1>, scalar_prefetch = 0 : i64, scratch_operands = 1 : i64, tpu.core_type = #tpu.core_type<tc>, window_params = [{transform_indices = @transform_0, window_bounds = array<i64: 1, 8, 512>}, {pipeline_mode = #tpu.pipeline_mode<synchronous>, transform_indices = @transform_1, window_bounds = array<i64: 8, 72>}, {pipeline_mode = #tpu.pipeline_mode<synchronous>, transform_indices = @transform_2, window_bounds = array<i64: 5, 8, 72>}, {pipeline_mode = #tpu.pipeline_mode<synchronous>, transform_indices = @transform_3, window_bounds = array<i64: 6, 8, 1>}, {pipeline_mode = #tpu.pipeline_mode<synchronous>, transform_indices = @transform_4, window_bounds = array<i64: 8, 56>}, {pipeline_mode = #tpu.pipeline_mode<synchronous>, transform_indices = @transform_5, window_bounds = array<i64: 8, 1>}, {pipeline_mode = #tpu.pipeline_mode<synchronous>, transform_indices = @transform_6, window_bounds = array<i64: 16, 8>}, {pipeline_mode = #tpu.pipeline_mode<synchronous>, transform_indices = @transform_7, window_bounds = array<i64: 16, 1>}, {pipeline_mode = #tpu.pipeline_mode<synchronous>, transform_indices = @transform_8, window_bounds = array<i64: 9, 512>}, {transform_indices = @transform_9, window_bounds = array<i64: 1, 16, 512>}]} {
    %c0 = arith.constant 0 : index
    %c0_0 = arith.constant 0 : index
    %c0_1 = arith.constant 0 : index
    %0 = vector.load %arg1[%c0, %c0_0, %c0_1] : memref<1x8x512xf32, #tpu.memory_space<vmem>>, vector<1x8x512xf32>
    %1 = vector.shape_cast %0 : vector<1x8x512xf32> to vector<8x512xf32>
    %2 = arith.truncf %1 : vector<8x512xf32> to vector<8x512xbf16>
    %c0_2 = arith.constant 0 : index
    %c0_3 = arith.constant 0 : index
    %3 = vector.load %arg11[%c0_2, %c0_3] : memref<56x512xbf16, #tpu.memory_space<vmem>>, vector<8x512xbf16>
    tpu.vector_store %arg11[%c0_2, %c0_3], %2 {strides = array<i32>} : memref<56x512xbf16, #tpu.memory_space<vmem>>, vector<8x512xbf16>,
    %c0_4 = arith.constant 0 : index
    %c0_5 = arith.constant 0 : index
    %4 = vector.load %arg2[%c0_4, %c0_5] : memref<8x72xbf16, #tpu.memory_space<vmem>>, vector<8x72xbf16>
    %c0_6 = arith.constant 0 : index
    %c0_7 = arith.constant 0 : index
    %c0_8 = arith.constant 0 : index
    %5 = vector.load %arg4[%c0_6, %c0_7, %c0_8] : memref<6x8x1xf32, #tpu.memory_space<vmem>>, vector<1x8x1xf32>
    %6 = vector.shape_cast %5 : vector<1x8x1xf32> to vector<8x1xf32>
    %c17_i32 = arith.constant 17 : i32
    %7 = tpu.dynamic_rotate %1 by %c17_i32 dim 1 : vector<8x512xf32>, i32 -> vector<8x512xf32>
    %c0_9 = arith.constant 0 : index
    %c0_10 = arith.constant 0 : index
    %8 = vector.load %arg9[%c0_9, %c0_10] : memref<9x512xf32, #tpu.memory_space<vmem>>, vector<1x512xf32>
    %9 = vector.broadcast %8 : vector<1x512xf32> to vector<8x512xf32>
    %10 = arith.mulf %7, %9 : vector<8x512xf32>
    %c16_i32 = arith.constant 16 : i32
    %11 = tpu.dynamic_rotate %1 by %c16_i32 dim 1 : vector<8x512xf32>, i32 -> vector<8x512xf32>
    %c1 = arith.constant 1 : index
    %c0_11 = arith.constant 0 : index
    %12 = vector.load %arg9[%c1, %c0_11] : memref<9x512xf32, #tpu.memory_space<vmem>>, vector<1x512xf32>
    %13 = vector.broadcast %12 : vector<1x512xf32> to vector<8x512xf32>
    %14 = arith.mulf %11, %13 : vector<8x512xf32>
    %c15_i32 = arith.constant 15 : i32
    %15 = tpu.dynamic_rotate %1 by %c15_i32 dim 1 : vector<8x512xf32>, i32 -> vector<8x512xf32>
    %c2 = arith.constant 2 : index
    %c0_12 = arith.constant 0 : index
    %16 = vector.load %arg9[%c2, %c0_12] : memref<9x512xf32, #tpu.memory_space<vmem>>, vector<1x512xf32>
    %17 = vector.broadcast %16 : vector<1x512xf32> to vector<8x512xf32>
    %18 = arith.mulf %15, %17 : vector<8x512xf32>
    %c1_i32 = arith.constant 1 : i32
    %19 = tpu.dynamic_rotate %1 by %c1_i32 dim 1 : vector<8x512xf32>, i32 -> vector<8x512xf32>
    %c3 = arith.constant 3 : index
    %c0_13 = arith.constant 0 : index
    %20 = vector.load %arg9[%c3, %c0_13] : memref<9x512xf32, #tpu.memory_space<vmem>>, vector<1x512xf32>
    %21 = vector.broadcast %20 : vector<1x512xf32> to vector<8x512xf32>
    %22 = arith.mulf %19, %21 : vector<8x512xf32>
    %c511_i32 = arith.constant 511 : i32
    %23 = tpu.dynamic_rotate %1 by %c511_i32 dim 1 : vector<8x512xf32>, i32 -> vector<8x512xf32>
    %c5 = arith.constant 5 : index
    %c0_14 = arith.constant 0 : index
    %24 = vector.load %arg9[%c5, %c0_14] : memref<9x512xf32, #tpu.memory_space<vmem>>, vector<1x512xf32>
    %25 = vector.broadcast %24 : vector<1x512xf32> to vector<8x512xf32>
    %26 = arith.mulf %23, %25 : vector<8x512xf32>
    %c497_i32 = arith.constant 497 : i32
    %27 = tpu.dynamic_rotate %1 by %c497_i32 dim 1 : vector<8x512xf32>, i32 -> vector<8x512xf32>
    %c6 = arith.constant 6 : index
    %c0_15 = arith.constant 0 : index
    %28 = vector.load %arg9[%c6, %c0_15] : memref<9x512xf32, #tpu.memory_space<vmem>>, vector<1x512xf32>
    %29 = vector.broadcast %28 : vector<1x512xf32> to vector<8x512xf32>
    %30 = arith.mulf %27, %29 : vector<8x512xf32>
    %c496_i32 = arith.constant 496 : i32
    %31 = tpu.dynamic_rotate %1 by %c496_i32 dim 1 : vector<8x512xf32>, i32 -> vector<8x512xf32>
    %c7 = arith.constant 7 : index
    %c0_16 = arith.constant 0 : index
    %32 = vector.load %arg9[%c7, %c0_16] : memref<9x512xf32, #tpu.memory_space<vmem>>, vector<1x512xf32>
    %33 = vector.broadcast %32 : vector<1x512xf32> to vector<8x512xf32>
    %34 = arith.mulf %31, %33 : vector<8x512xf32>
    %c495_i32 = arith.constant 495 : i32
    %35 = tpu.dynamic_rotate %1 by %c495_i32 dim 1 : vector<8x512xf32>, i32 -> vector<8x512xf32>
    %c8 = arith.constant 8 : index
    %c0_17 = arith.constant 0 : index
    %36 = vector.load %arg9[%c8, %c0_17] : memref<9x512xf32, #tpu.memory_space<vmem>>, vector<1x512xf32>
    %37 = vector.broadcast %36 : vector<1x512xf32> to vector<8x512xf32>
    %38 = arith.mulf %35, %37 : vector<8x512xf32>
    %39 = tpu.concatenate %10, %14, %18, %22, %1, %26, %30, %34, %38 in 0 : vector<8x512xf32>, vector<8x512xf32>, vector<8x512xf32>, vector<8x512xf32>, vector<8x512xf32>, vector<8x512xf32>, vector<8x512xf32>, vector<8x512xf32>, vector<8x512xf32> -> vector<72x512xf32>
    %40 = arith.truncf %39 : vector<72x512xf32> to vector<72x512xbf16>
    %cst = arith.constant dense<0.000000e+00> : vector<8x512xf32>
    %41 = tpu.matmul %4, %40, %cst {dimension_numbers = #tpu.dot_dimension_numbers<[1], [0], [0], [1], [0, 0, 1, 1], [], []>} : vector<8x72xbf16>, vector<72x512xbf16>, vector<8x512xf32> -> vector<8x512xf32>
    %42 = vector.broadcast %6 : vector<8x1xf32> to vector<8x512xf32>
    %43 = arith.addf %41, %42 : vector<8x512xf32>
    %cst_18 = arith.constant 0.000000e+00 : f32
    %44 = vector.broadcast %cst_18 : f32 to vector<8x512xf32>
    %45 = arith.maximumf %43, %44 : vector<8x512xf32>
    %46 = arith.truncf %45 : vector<8x512xf32> to vector<8x512xbf16>
    %c8_19 = arith.constant 8 : index
    %c0_20 = arith.constant 0 : index
    %47 = vector.load %arg11[%c8_19, %c0_20] : memref<56x512xbf16, #tpu.memory_space<vmem>>, vector<8x512xbf16>
    tpu.vector_store %arg11[%c8_19, %c0_20], %46 {strides = array<i32>} : memref<56x512xbf16, #tpu.memory_space<vmem>>, vector<8x512xbf16>,
    %c0_21 = arith.constant 0 : index
    %c0_22 = arith.constant 0 : index
    %c0_23 = arith.constant 0 : index
    %48 = vector.load %arg3[%c0_21, %c0_22, %c0_23] : memref<5x8x72xbf16, #tpu.memory_space<vmem>>, vector<1x8x72xbf16>
    %49 = vector.shape_cast %48 : vector<1x8x72xbf16> to vector<8x72xbf16>
    %c1_24 = arith.constant 1 : index
    %c0_25 = arith.constant 0 : index
    %c0_26 = arith.constant 0 : index
    %50 = vector.load %arg4[%c1_24, %c0_25, %c0_26] : memref<6x8x1xf32, #tpu.memory_space<vmem>>, vector<1x8x1xf32>
    %51 = vector.shape_cast %50 : vector<1x8x1xf32> to vector<8x1xf32>
    %c17_i32_27 = arith.constant 17 : i32
    %52 = tpu.dynamic_rotate %45 by %c17_i32_27 dim 1 : vector<8x512xf32>, i32 -> vector<8x512xf32>
    %c0_28 = arith.constant 0 : index
    %c0_29 = arith.constant 0 : index
    %53 = vector.load %arg9[%c0_28, %c0_29] : memref<9x512xf32, #tpu.memory_space<vmem>>, vector<1x512xf32>
    %54 = vector.broadcast %53 : vector<1x512xf32> to vector<8x512xf32>
    %55 = arith.mulf %52, %54 : vector<8x512xf32>
    %c16_i32_30 = arith.constant 16 : i32
    %56 = tpu.dynamic_rotate %45 by %c16_i32_30 dim 1 : vector<8x512xf32>, i32 -> vector<8x512xf32>
    %c1_31 = arith.constant 1 : index
    %c0_32 = arith.constant 0 : index
    %57 = vector.load %arg9[%c1_31, %c0_32] : memref<9x512xf32, #tpu.memory_space<vmem>>, vector<1x512xf32>
    %58 = vector.broadcast %57 : vector<1x512xf32> to vector<8x512xf32>
    %59 = arith.mulf %56, %58 : vector<8x512xf32>
    %c15_i32_33 = arith.constant 15 : i32
    %60 = tpu.dynamic_rotate %45 by %c15_i32_33 dim 1 : vector<8x512xf32>, i32 -> vector<8x512xf32>
    %c2_34 = arith.constant 2 : index
    %c0_35 = arith.constant 0 : index
    %61 = vector.load %arg9[%c2_34, %c0_35] : memref<9x512xf32, #tpu.memory_space<vmem>>, vector<1x512xf32>
    %62 = vector.broadcast %61 : vector<1x512xf32> to vector<8x512xf32>
    %63 = arith.mulf %60, %62 : vector<8x512xf32>
    %c1_i32_36 = arith.constant 1 : i32
    %64 = tpu.dynamic_rotate %45 by %c1_i32_36 dim 1 : vector<8x512xf32>, i32 -> vector<8x512xf32>
    %c3_37 = arith.constant 3 : index
    %c0_38 = arith.constant 0 : index
    %65 = vector.load %arg9[%c3_37, %c0_38] : memref<9x512xf32, #tpu.memory_space<vmem>>, vector<1x512xf32>
    %66 = vector.broadcast %65 : vector<1x512xf32> to vector<8x512xf32>
    %67 = arith.mulf %64, %66 : vector<8x512xf32>
    %c511_i32_39 = arith.constant 511 : i32
    %68 = tpu.dynamic_rotate %45 by %c511_i32_39 dim 1 : vector<8x512xf32>, i32 -> vector<8x512xf32>
    %c5_40 = arith.constant 5 : index
    %c0_41 = arith.constant 0 : index
    %69 = vector.load %arg9[%c5_40, %c0_41] : memref<9x512xf32, #tpu.memory_space<vmem>>, vector<1x512xf32>
    %70 = vector.broadcast %69 : vector<1x512xf32> to vector<8x512xf32>
    %71 = arith.mulf %68, %70 : vector<8x512xf32>
    %c497_i32_42 = arith.constant 497 : i32
    %72 = tpu.dynamic_rotate %45 by %c497_i32_42 dim 1 : vector<8x512xf32>, i32 -> vector<8x512xf32>
    %c6_43 = arith.constant 6 : index
    %c0_44 = arith.constant 0 : index
    %73 = vector.load %arg9[%c6_43, %c0_44] : memref<9x512xf32, #tpu.memory_space<vmem>>, vector<1x512xf32>
    %74 = vector.broadcast %73 : vector<1x512xf32> to vector<8x512xf32>
    %75 = arith.mulf %72, %74 : vector<8x512xf32>
    %c496_i32_45 = arith.constant 496 : i32
    %76 = tpu.dynamic_rotate %45 by %c496_i32_45 dim 1 : vector<8x512xf32>, i32 -> vector<8x512xf32>
    %c7_46 = arith.constant 7 : index
    %c0_47 = arith.constant 0 : index
    %77 = vector.load %arg9[%c7_46, %c0_47] : memref<9x512xf32, #tpu.memory_space<vmem>>, vector<1x512xf32>
    %78 = vector.broadcast %77 : vector<1x512xf32> to vector<8x512xf32>
    %79 = arith.mulf %76, %78 : vector<8x512xf32>
    %c495_i32_48 = arith.constant 495 : i32
    %80 = tpu.dynamic_rotate %45 by %c495_i32_48 dim 1 : vector<8x512xf32>, i32 -> vector<8x512xf32>
    %c8_49 = arith.constant 8 : index
    %c0_50 = arith.constant 0 : index
    %81 = vector.load %arg9[%c8_49, %c0_50] : memref<9x512xf32, #tpu.memory_space<vmem>>, vector<1x512xf32>
    %82 = vector.broadcast %81 : vector<1x512xf32> to vector<8x512xf32>
    %83 = arith.mulf %80, %82 : vector<8x512xf32>
    %84 = tpu.concatenate %55, %59, %63, %67, %45, %71, %75, %79, %83 in 0 : vector<8x512xf32>, vector<8x512xf32>, vector<8x512xf32>, vector<8x512xf32>, vector<8x512xf32>, vector<8x512xf32>, vector<8x512xf32>, vector<8x512xf32>, vector<8x512xf32> -> vector<72x512xf32>
    %85 = arith.truncf %84 : vector<72x512xf32> to vector<72x512xbf16>
    %cst_51 = arith.constant dense<0.000000e+00> : vector<8x512xf32>
    %86 = tpu.matmul %49, %85, %cst_51 {dimension_numbers = #tpu.dot_dimension_numbers<[1], [0], [0], [1], [0, 0, 1, 1], [], []>} : vector<8x72xbf16>, vector<72x512xbf16>, vector<8x512xf32> -> vector<8x512xf32>
    %87 = vector.broadcast %51 : vector<8x1xf32> to vector<8x512xf32>
    %88 = arith.addf %86, %87 : vector<8x512xf32>
    %cst_52 = arith.constant 0.000000e+00 : f32
    %89 = vector.broadcast %cst_52 : f32 to vector<8x512xf32>
    %90 = arith.maximumf %88, %89 : vector<8x512xf32>
    %91 = arith.truncf %90 : vector<8x512xf32> to vector<8x512xbf16>
    %c16 = arith.constant 16 : index
    %c0_53 = arith.constant 0 : index
    %92 = vector.load %arg11[%c16, %c0_53] : memref<56x512xbf16, #tpu.memory_space<vmem>>, vector<8x512xbf16>
    tpu.vector_store %arg11[%c16, %c0_53], %91 {strides = array<i32>} : memref<56x512xbf16, #tpu.memory_space<vmem>>, vector<8x512xbf16>,
    %c1_54 = arith.constant 1 : index
    %c0_55 = arith.constant 0 : index
    %c0_56 = arith.constant 0 : index
    %93 = vector.load %arg3[%c1_54, %c0_55, %c0_56] : memref<5x8x72xbf16, #tpu.memory_space<vmem>>, vector<1x8x72xbf16>
    %94 = vector.shape_cast %93 : vector<1x8x72xbf16> to vector<8x72xbf16>
    %c2_57 = arith.constant 2 : index
    %c0_58 = arith.constant 0 : index
    %c0_59 = arith.constant 0 : index
    %95 = vector.load %arg4[%c2_57, %c0_58, %c0_59] : memref<6x8x1xf32, #tpu.memory_space<vmem>>, vector<1x8x1xf32>
    %96 = vector.shape_cast %95 : vector<1x8x1xf32> to vector<8x1xf32>
    %c17_i32_60 = arith.constant 17 : i32
    %97 = tpu.dynamic_rotate %90 by %c17_i32_60 dim 1 : vector<8x512xf32>, i32 -> vector<8x512xf32>
    %c0_61 = arith.constant 0 : index
    %c0_62 = arith.constant 0 : index
    %98 = vector.load %arg9[%c0_61, %c0_62] : memref<9x512xf32, #tpu.memory_space<vmem>>, vector<1x512xf32>
    %99 = vector.broadcast %98 : vector<1x512xf32> to vector<8x512xf32>
    %100 = arith.mulf %97, %99 : vector<8x512xf32>
    %c16_i32_63 = arith.constant 16 : i32
    %101 = tpu.dynamic_rotate %90 by %c16_i32_63 dim 1 : vector<8x512xf32>, i32 -> vector<8x512xf32>
    %c1_64 = arith.constant 1 : index
    %c0_65 = arith.constant 0 : index
    %102 = vector.load %arg9[%c1_64, %c0_65] : memref<9x512xf32, #tpu.memory_space<vmem>>, vector<1x512xf32>
    %103 = vector.broadcast %102 : vector<1x512xf32> to vector<8x512xf32>
    %104 = arith.mulf %101, %103 : vector<8x512xf32>
    %c15_i32_66 = arith.constant 15 : i32
    %105 = tpu.dynamic_rotate %90 by %c15_i32_66 dim 1 : vector<8x512xf32>, i32 -> vector<8x512xf32>
    %c2_67 = arith.constant 2 : index
    %c0_68 = arith.constant 0 : index
    %106 = vector.load %arg9[%c2_67, %c0_68] : memref<9x512xf32, #tpu.memory_space<vmem>>, vector<1x512xf32>
    %107 = vector.broadcast %106 : vector<1x512xf32> to vector<8x512xf32>
    %108 = arith.mulf %105, %107 : vector<8x512xf32>
    %c1_i32_69 = arith.constant 1 : i32
    %109 = tpu.dynamic_rotate %90 by %c1_i32_69 dim 1 : vector<8x512xf32>, i32 -> vector<8x512xf32>
    %c3_70 = arith.constant 3 : index
    %c0_71 = arith.constant 0 : index
    %110 = vector.load %arg9[%c3_70, %c0_71] : memref<9x512xf32, #tpu.memory_space<vmem>>, vector<1x512xf32>
    %111 = vector.broadcast %110 : vector<1x512xf32> to vector<8x512xf32>
    %112 = arith.mulf %109, %111 : vector<8x512xf32>
    %c511_i32_72 = arith.constant 511 : i32
    %113 = tpu.dynamic_rotate %90 by %c511_i32_72 dim 1 : vector<8x512xf32>, i32 -> vector<8x512xf32>
    %c5_73 = arith.constant 5 : index
    %c0_74 = arith.constant 0 : index
    %114 = vector.load %arg9[%c5_73, %c0_74] : memref<9x512xf32, #tpu.memory_space<vmem>>, vector<1x512xf32>
    %115 = vector.broadcast %114 : vector<1x512xf32> to vector<8x512xf32>
    %116 = arith.mulf %113, %115 : vector<8x512xf32>
    %c497_i32_75 = arith.constant 497 : i32
    %117 = tpu.dynamic_rotate %90 by %c497_i32_75 dim 1 : vector<8x512xf32>, i32 -> vector<8x512xf32>
    %c6_76 = arith.constant 6 : index
    %c0_77 = arith.constant 0 : index
    %118 = vector.load %arg9[%c6_76, %c0_77] : memref<9x512xf32, #tpu.memory_space<vmem>>, vector<1x512xf32>
    %119 = vector.broadcast %118 : vector<1x512xf32> to vector<8x512xf32>
    %120 = arith.mulf %117, %119 : vector<8x512xf32>
    %c496_i32_78 = arith.constant 496 : i32
    %121 = tpu.dynamic_rotate %90 by %c496_i32_78 dim 1 : vector<8x512xf32>, i32 -> vector<8x512xf32>
    %c7_79 = arith.constant 7 : index
    %c0_80 = arith.constant 0 : index
    %122 = vector.load %arg9[%c7_79, %c0_80] : memref<9x512xf32, #tpu.memory_space<vmem>>, vector<1x512xf32>
    %123 = vector.broadcast %122 : vector<1x512xf32> to vector<8x512xf32>
    %124 = arith.mulf %121, %123 : vector<8x512xf32>
    %c495_i32_81 = arith.constant 495 : i32
    %125 = tpu.dynamic_rotate %90 by %c495_i32_81 dim 1 : vector<8x512xf32>, i32 -> vector<8x512xf32>
    %c8_82 = arith.constant 8 : index
    %c0_83 = arith.constant 0 : index
    %126 = vector.load %arg9[%c8_82, %c0_83] : memref<9x512xf32, #tpu.memory_space<vmem>>, vector<1x512xf32>
    %127 = vector.broadcast %126 : vector<1x512xf32> to vector<8x512xf32>
    %128 = arith.mulf %125, %127 : vector<8x512xf32>
    %129 = tpu.concatenate %100, %104, %108, %112, %90, %116, %120, %124, %128 in 0 : vector<8x512xf32>, vector<8x512xf32>, vector<8x512xf32>, vector<8x512xf32>, vector<8x512xf32>, vector<8x512xf32>, vector<8x512xf32>, vector<8x512xf32>, vector<8x512xf32> -> vector<72x512xf32>
    %130 = arith.truncf %129 : vector<72x512xf32> to vector<72x512xbf16>
    %cst_84 = arith.constant dense<0.000000e+00> : vector<8x512xf32>
    %131 = tpu.matmul %94, %130, %cst_84 {dimension_numbers = #tpu.dot_dimension_numbers<[1], [0], [0], [1], [0, 0, 1, 1], [], []>} : vector<8x72xbf16>, vector<72x512xbf16>, vector<8x512xf32> -> vector<8x512xf32>
    %132 = vector.broadcast %96 : vector<8x1xf32> to vector<8x512xf32>
    %133 = arith.addf %131, %132 : vector<8x512xf32>
    %cst_85 = arith.constant 0.000000e+00 : f32
    %134 = vector.broadcast %cst_85 : f32 to vector<8x512xf32>
    %135 = arith.maximumf %133, %134 : vector<8x512xf32>
    %136 = arith.truncf %135 : vector<8x512xf32> to vector<8x512xbf16>
    %c24 = arith.constant 24 : index
    %c0_86 = arith.constant 0 : index
    %137 = vector.load %arg11[%c24, %c0_86] : memref<56x512xbf16, #tpu.memory_space<vmem>>, vector<8x512xbf16>
    tpu.vector_store %arg11[%c24, %c0_86], %136 {strides = array<i32>} : memref<56x512xbf16, #tpu.memory_space<vmem>>, vector<8x512xbf16>,
    %c2_87 = arith.constant 2 : index
    %c0_88 = arith.constant 0 : index
    %c0_89 = arith.constant 0 : index
    %138 = vector.load %arg3[%c2_87, %c0_88, %c0_89] : memref<5x8x72xbf16, #tpu.memory_space<vmem>>, vector<1x8x72xbf16>
    %139 = vector.shape_cast %138 : vector<1x8x72xbf16> to vector<8x72xbf16>
    %c3_90 = arith.constant 3 : index
    %c0_91 = arith.constant 0 : index
    %c0_92 = arith.constant 0 : index
    %140 = vector.load %arg4[%c3_90, %c0_91, %c0_92] : memref<6x8x1xf32, #tpu.memory_space<vmem>>, vector<1x8x1xf32>
    %141 = vector.shape_cast %140 : vector<1x8x1xf32> to vector<8x1xf32>
    %c17_i32_93 = arith.constant 17 : i32
    %142 = tpu.dynamic_rotate %135 by %c17_i32_93 dim 1 : vector<8x512xf32>, i32 -> vector<8x512xf32>
    %c0_94 = arith.constant 0 : index
    %c0_95 = arith.constant 0 : index
    %143 = vector.load %arg9[%c0_94, %c0_95] : memref<9x512xf32, #tpu.memory_space<vmem>>, vector<1x512xf32>
    %144 = vector.broadcast %143 : vector<1x512xf32> to vector<8x512xf32>
    %145 = arith.mulf %142, %144 : vector<8x512xf32>
    %c16_i32_96 = arith.constant 16 : i32
    %146 = tpu.dynamic_rotate %135 by %c16_i32_96 dim 1 : vector<8x512xf32>, i32 -> vector<8x512xf32>
    %c1_97 = arith.constant 1 : index
    %c0_98 = arith.constant 0 : index
    %147 = vector.load %arg9[%c1_97, %c0_98] : memref<9x512xf32, #tpu.memory_space<vmem>>, vector<1x512xf32>
    %148 = vector.broadcast %147 : vector<1x512xf32> to vector<8x512xf32>
    %149 = arith.mulf %146, %148 : vector<8x512xf32>
    %c15_i32_99 = arith.constant 15 : i32
    %150 = tpu.dynamic_rotate %135 by %c15_i32_99 dim 1 : vector<8x512xf32>, i32 -> vector<8x512xf32>
    %c2_100 = arith.constant 2 : index
    %c0_101 = arith.constant 0 : index
    %151 = vector.load %arg9[%c2_100, %c0_101] : memref<9x512xf32, #tpu.memory_space<vmem>>, vector<1x512xf32>
    %152 = vector.broadcast %151 : vector<1x512xf32> to vector<8x512xf32>
    %153 = arith.mulf %150, %152 : vector<8x512xf32>
    %c1_i32_102 = arith.constant 1 : i32
    %154 = tpu.dynamic_rotate %135 by %c1_i32_102 dim 1 : vector<8x512xf32>, i32 -> vector<8x512xf32>
    %c3_103 = arith.constant 3 : index
    %c0_104 = arith.constant 0 : index
    %155 = vector.load %arg9[%c3_103, %c0_104] : memref<9x512xf32, #tpu.memory_space<vmem>>, vector<1x512xf32>
    %156 = vector.broadcast %155 : vector<1x512xf32> to vector<8x512xf32>
    %157 = arith.mulf %154, %156 : vector<8x512xf32>
    %c511_i32_105 = arith.constant 511 : i32
    %158 = tpu.dynamic_rotate %135 by %c511_i32_105 dim 1 : vector<8x512xf32>, i32 -> vector<8x512xf32>
    %c5_106 = arith.constant 5 : index
    %c0_107 = arith.constant 0 : index
    %159 = vector.load %arg9[%c5_106, %c0_107] : memref<9x512xf32, #tpu.memory_space<vmem>>, vector<1x512xf32>
    %160 = vector.broadcast %159 : vector<1x512xf32> to vector<8x512xf32>
    %161 = arith.mulf %158, %160 : vector<8x512xf32>
    %c497_i32_108 = arith.constant 497 : i32
    %162 = tpu.dynamic_rotate %135 by %c497_i32_108 dim 1 : vector<8x512xf32>, i32 -> vector<8x512xf32>
    %c6_109 = arith.constant 6 : index
    %c0_110 = arith.constant 0 : index
    %163 = vector.load %arg9[%c6_109, %c0_110] : memref<9x512xf32, #tpu.memory_space<vmem>>, vector<1x512xf32>
    %164 = vector.broadcast %163 : vector<1x512xf32> to vector<8x512xf32>
    %165 = arith.mulf %162, %164 : vector<8x512xf32>
    %c496_i32_111 = arith.constant 496 : i32
    %166 = tpu.dynamic_rotate %135 by %c496_i32_111 dim 1 : vector<8x512xf32>, i32 -> vector<8x512xf32>
    %c7_112 = arith.constant 7 : index
    %c0_113 = arith.constant 0 : index
    %167 = vector.load %arg9[%c7_112, %c0_113] : memref<9x512xf32, #tpu.memory_space<vmem>>, vector<1x512xf32>
    %168 = vector.broadcast %167 : vector<1x512xf32> to vector<8x512xf32>
    %169 = arith.mulf %166, %168 : vector<8x512xf32>
    %c495_i32_114 = arith.constant 495 : i32
    %170 = tpu.dynamic_rotate %135 by %c495_i32_114 dim 1 : vector<8x512xf32>, i32 -> vector<8x512xf32>
    %c8_115 = arith.constant 8 : index
    %c0_116 = arith.constant 0 : index
    %171 = vector.load %arg9[%c8_115, %c0_116] : memref<9x512xf32, #tpu.memory_space<vmem>>, vector<1x512xf32>
    %172 = vector.broadcast %171 : vector<1x512xf32> to vector<8x512xf32>
    %173 = arith.mulf %170, %172 : vector<8x512xf32>
    %174 = tpu.concatenate %145, %149, %153, %157, %135, %161, %165, %169, %173 in 0 : vector<8x512xf32>, vector<8x512xf32>, vector<8x512xf32>, vector<8x512xf32>, vector<8x512xf32>, vector<8x512xf32>, vector<8x512xf32>, vector<8x512xf32>, vector<8x512xf32> -> vector<72x512xf32>
    %175 = arith.truncf %174 : vector<72x512xf32> to vector<72x512xbf16>
    %cst_117 = arith.constant dense<0.000000e+00> : vector<8x512xf32>
    %176 = tpu.matmul %139, %175, %cst_117 {dimension_numbers = #tpu.dot_dimension_numbers<[1], [0], [0], [1], [0, 0, 1, 1], [], []>} : vector<8x72xbf16>, vector<72x512xbf16>, vector<8x512xf32> -> vector<8x512xf32>
    %177 = vector.broadcast %141 : vector<8x1xf32> to vector<8x512xf32>
    %178 = arith.addf %176, %177 : vector<8x512xf32>
    %cst_118 = arith.constant 0.000000e+00 : f32
    %179 = vector.broadcast %cst_118 : f32 to vector<8x512xf32>
    %180 = arith.maximumf %178, %179 : vector<8x512xf32>
    %181 = arith.truncf %180 : vector<8x512xf32> to vector<8x512xbf16>
    %c32 = arith.constant 32 : index
    %c0_119 = arith.constant 0 : index
    %182 = vector.load %arg11[%c32, %c0_119] : memref<56x512xbf16, #tpu.memory_space<vmem>>, vector<8x512xbf16>
    tpu.vector_store %arg11[%c32, %c0_119], %181 {strides = array<i32>} : memref<56x512xbf16, #tpu.memory_space<vmem>>, vector<8x512xbf16>,
    %c3_120 = arith.constant 3 : index
    %c0_121 = arith.constant 0 : index
    %c0_122 = arith.constant 0 : index
    %183 = vector.load %arg3[%c3_120, %c0_121, %c0_122] : memref<5x8x72xbf16, #tpu.memory_space<vmem>>, vector<1x8x72xbf16>
    %184 = vector.shape_cast %183 : vector<1x8x72xbf16> to vector<8x72xbf16>
    %c4 = arith.constant 4 : index
    %c0_123 = arith.constant 0 : index
    %c0_124 = arith.constant 0 : index
    %185 = vector.load %arg4[%c4, %c0_123, %c0_124] : memref<6x8x1xf32, #tpu.memory_space<vmem>>, vector<1x8x1xf32>
    %186 = vector.shape_cast %185 : vector<1x8x1xf32> to vector<8x1xf32>
    %c17_i32_125 = arith.constant 17 : i32
    %187 = tpu.dynamic_rotate %180 by %c17_i32_125 dim 1 : vector<8x512xf32>, i32 -> vector<8x512xf32>
    %c0_126 = arith.constant 0 : index
    %c0_127 = arith.constant 0 : index
    %188 = vector.load %arg9[%c0_126, %c0_127] : memref<9x512xf32, #tpu.memory_space<vmem>>, vector<1x512xf32>
    %189 = vector.broadcast %188 : vector<1x512xf32> to vector<8x512xf32>
    %190 = arith.mulf %187, %189 : vector<8x512xf32>
    %c16_i32_128 = arith.constant 16 : i32
    %191 = tpu.dynamic_rotate %180 by %c16_i32_128 dim 1 : vector<8x512xf32>, i32 -> vector<8x512xf32>
    %c1_129 = arith.constant 1 : index
    %c0_130 = arith.constant 0 : index
    %192 = vector.load %arg9[%c1_129, %c0_130] : memref<9x512xf32, #tpu.memory_space<vmem>>, vector<1x512xf32>
    %193 = vector.broadcast %192 : vector<1x512xf32> to vector<8x512xf32>
    %194 = arith.mulf %191, %193 : vector<8x512xf32>
    %c15_i32_131 = arith.constant 15 : i32
    %195 = tpu.dynamic_rotate %180 by %c15_i32_131 dim 1 : vector<8x512xf32>, i32 -> vector<8x512xf32>
    %c2_132 = arith.constant 2 : index
    %c0_133 = arith.constant 0 : index
    %196 = vector.load %arg9[%c2_132, %c0_133] : memref<9x512xf32, #tpu.memory_space<vmem>>, vector<1x512xf32>
    %197 = vector.broadcast %196 : vector<1x512xf32> to vector<8x512xf32>
    %198 = arith.mulf %195, %197 : vector<8x512xf32>
    %c1_i32_134 = arith.constant 1 : i32
    %199 = tpu.dynamic_rotate %180 by %c1_i32_134 dim 1 : vector<8x512xf32>, i32 -> vector<8x512xf32>
    %c3_135 = arith.constant 3 : index
    %c0_136 = arith.constant 0 : index
    %200 = vector.load %arg9[%c3_135, %c0_136] : memref<9x512xf32, #tpu.memory_space<vmem>>, vector<1x512xf32>
    %201 = vector.broadcast %200 : vector<1x512xf32> to vector<8x512xf32>
    %202 = arith.mulf %199, %201 : vector<8x512xf32>
    %c511_i32_137 = arith.constant 511 : i32
    %203 = tpu.dynamic_rotate %180 by %c511_i32_137 dim 1 : vector<8x512xf32>, i32 -> vector<8x512xf32>
    %c5_138 = arith.constant 5 : index
    %c0_139 = arith.constant 0 : index
    %204 = vector.load %arg9[%c5_138, %c0_139] : memref<9x512xf32, #tpu.memory_space<vmem>>, vector<1x512xf32>
    %205 = vector.broadcast %204 : vector<1x512xf32> to vector<8x512xf32>
    %206 = arith.mulf %203, %205 : vector<8x512xf32>
    %c497_i32_140 = arith.constant 497 : i32
    %207 = tpu.dynamic_rotate %180 by %c497_i32_140 dim 1 : vector<8x512xf32>, i32 -> vector<8x512xf32>
    %c6_141 = arith.constant 6 : index
    %c0_142 = arith.constant 0 : index
    %208 = vector.load %arg9[%c6_141, %c0_142] : memref<9x512xf32, #tpu.memory_space<vmem>>, vector<1x512xf32>
    %209 = vector.broadcast %208 : vector<1x512xf32> to vector<8x512xf32>
    %210 = arith.mulf %207, %209 : vector<8x512xf32>
    %c496_i32_143 = arith.constant 496 : i32
    %211 = tpu.dynamic_rotate %180 by %c496_i32_143 dim 1 : vector<8x512xf32>, i32 -> vector<8x512xf32>
    %c7_144 = arith.constant 7 : index
    %c0_145 = arith.constant 0 : index
    %212 = vector.load %arg9[%c7_144, %c0_145] : memref<9x512xf32, #tpu.memory_space<vmem>>, vector<1x512xf32>
    %213 = vector.broadcast %212 : vector<1x512xf32> to vector<8x512xf32>
    %214 = arith.mulf %211, %213 : vector<8x512xf32>
    %c495_i32_146 = arith.constant 495 : i32
    %215 = tpu.dynamic_rotate %180 by %c495_i32_146 dim 1 : vector<8x512xf32>, i32 -> vector<8x512xf32>
    %c8_147 = arith.constant 8 : index
    %c0_148 = arith.constant 0 : index
    %216 = vector.load %arg9[%c8_147, %c0_148] : memref<9x512xf32, #tpu.memory_space<vmem>>, vector<1x512xf32>
    %217 = vector.broadcast %216 : vector<1x512xf32> to vector<8x512xf32>
    %218 = arith.mulf %215, %217 : vector<8x512xf32>
    %219 = tpu.concatenate %190, %194, %198, %202, %180, %206, %210, %214, %218 in 0 : vector<8x512xf32>, vector<8x512xf32>, vector<8x512xf32>, vector<8x512xf32>, vector<8x512xf32>, vector<8x512xf32>, vector<8x512xf32>, vector<8x512xf32>, vector<8x512xf32> -> vector<72x512xf32>
    %220 = arith.truncf %219 : vector<72x512xf32> to vector<72x512xbf16>
    %cst_149 = arith.constant dense<0.000000e+00> : vector<8x512xf32>
    %221 = tpu.matmul %184, %220, %cst_149 {dimension_numbers = #tpu.dot_dimension_numbers<[1], [0], [0], [1], [0, 0, 1, 1], [], []>} : vector<8x72xbf16>, vector<72x512xbf16>, vector<8x512xf32> -> vector<8x512xf32>
    %222 = vector.broadcast %186 : vector<8x1xf32> to vector<8x512xf32>
    %223 = arith.addf %221, %222 : vector<8x512xf32>
    %cst_150 = arith.constant 0.000000e+00 : f32
    %224 = vector.broadcast %cst_150 : f32 to vector<8x512xf32>
    %225 = arith.maximumf %223, %224 : vector<8x512xf32>
    %226 = arith.truncf %225 : vector<8x512xf32> to vector<8x512xbf16>
    %c40 = arith.constant 40 : index
    %c0_151 = arith.constant 0 : index
    %227 = vector.load %arg11[%c40, %c0_151] : memref<56x512xbf16, #tpu.memory_space<vmem>>, vector<8x512xbf16>
    tpu.vector_store %arg11[%c40, %c0_151], %226 {strides = array<i32>} : memref<56x512xbf16, #tpu.memory_space<vmem>>, vector<8x512xbf16>,
    %c4_152 = arith.constant 4 : index
    %c0_153 = arith.constant 0 : index
    %c0_154 = arith.constant 0 : index
    %228 = vector.load %arg3[%c4_152, %c0_153, %c0_154] : memref<5x8x72xbf16, #tpu.memory_space<vmem>>, vector<1x8x72xbf16>
    %229 = vector.shape_cast %228 : vector<1x8x72xbf16> to vector<8x72xbf16>
    %c5_155 = arith.constant 5 : index
    %c0_156 = arith.constant 0 : index
    %c0_157 = arith.constant 0 : index
    %230 = vector.load %arg4[%c5_155, %c0_156, %c0_157] : memref<6x8x1xf32, #tpu.memory_space<vmem>>, vector<1x8x1xf32>
    %231 = vector.shape_cast %230 : vector<1x8x1xf32> to vector<8x1xf32>
    %c17_i32_158 = arith.constant 17 : i32
    %232 = tpu.dynamic_rotate %225 by %c17_i32_158 dim 1 : vector<8x512xf32>, i32 -> vector<8x512xf32>
    %c0_159 = arith.constant 0 : index
    %c0_160 = arith.constant 0 : index
    %233 = vector.load %arg9[%c0_159, %c0_160] : memref<9x512xf32, #tpu.memory_space<vmem>>, vector<1x512xf32>
    %234 = vector.broadcast %233 : vector<1x512xf32> to vector<8x512xf32>
    %235 = arith.mulf %232, %234 : vector<8x512xf32>
    %c16_i32_161 = arith.constant 16 : i32
    %236 = tpu.dynamic_rotate %225 by %c16_i32_161 dim 1 : vector<8x512xf32>, i32 -> vector<8x512xf32>
    %c1_162 = arith.constant 1 : index
    %c0_163 = arith.constant 0 : index
    %237 = vector.load %arg9[%c1_162, %c0_163] : memref<9x512xf32, #tpu.memory_space<vmem>>, vector<1x512xf32>
    %238 = vector.broadcast %237 : vector<1x512xf32> to vector<8x512xf32>
    %239 = arith.mulf %236, %238 : vector<8x512xf32>
    %c15_i32_164 = arith.constant 15 : i32
    %240 = tpu.dynamic_rotate %225 by %c15_i32_164 dim 1 : vector<8x512xf32>, i32 -> vector<8x512xf32>
    %c2_165 = arith.constant 2 : index
    %c0_166 = arith.constant 0 : index
    %241 = vector.load %arg9[%c2_165, %c0_166] : memref<9x512xf32, #tpu.memory_space<vmem>>, vector<1x512xf32>
    %242 = vector.broadcast %241 : vector<1x512xf32> to vector<8x512xf32>
    %243 = arith.mulf %240, %242 : vector<8x512xf32>
    %c1_i32_167 = arith.constant 1 : i32
    %244 = tpu.dynamic_rotate %225 by %c1_i32_167 dim 1 : vector<8x512xf32>, i32 -> vector<8x512xf32>
    %c3_168 = arith.constant 3 : index
    %c0_169 = arith.constant 0 : index
    %245 = vector.load %arg9[%c3_168, %c0_169] : memref<9x512xf32, #tpu.memory_space<vmem>>, vector<1x512xf32>
    %246 = vector.broadcast %245 : vector<1x512xf32> to vector<8x512xf32>
    %247 = arith.mulf %244, %246 : vector<8x512xf32>
    %c511_i32_170 = arith.constant 511 : i32
    %248 = tpu.dynamic_rotate %225 by %c511_i32_170 dim 1 : vector<8x512xf32>, i32 -> vector<8x512xf32>
    %c5_171 = arith.constant 5 : index
    %c0_172 = arith.constant 0 : index
    %249 = vector.load %arg9[%c5_171, %c0_172] : memref<9x512xf32, #tpu.memory_space<vmem>>, vector<1x512xf32>
    %250 = vector.broadcast %249 : vector<1x512xf32> to vector<8x512xf32>
    %251 = arith.mulf %248, %250 : vector<8x512xf32>
    %c497_i32_173 = arith.constant 497 : i32
    %252 = tpu.dynamic_rotate %225 by %c497_i32_173 dim 1 : vector<8x512xf32>, i32 -> vector<8x512xf32>
    %c6_174 = arith.constant 6 : index
    %c0_175 = arith.constant 0 : index
    %253 = vector.load %arg9[%c6_174, %c0_175] : memref<9x512xf32, #tpu.memory_space<vmem>>, vector<1x512xf32>
    %254 = vector.broadcast %253 : vector<1x512xf32> to vector<8x512xf32>
    %255 = arith.mulf %252, %254 : vector<8x512xf32>
    %c496_i32_176 = arith.constant 496 : i32
    %256 = tpu.dynamic_rotate %225 by %c496_i32_176 dim 1 : vector<8x512xf32>, i32 -> vector<8x512xf32>
    %c7_177 = arith.constant 7 : index
    %c0_178 = arith.constant 0 : index
    %257 = vector.load %arg9[%c7_177, %c0_178] : memref<9x512xf32, #tpu.memory_space<vmem>>, vector<1x512xf32>
    %258 = vector.broadcast %257 : vector<1x512xf32> to vector<8x512xf32>
    %259 = arith.mulf %256, %258 : vector<8x512xf32>
    %c495_i32_179 = arith.constant 495 : i32
    %260 = tpu.dynamic_rotate %225 by %c495_i32_179 dim 1 : vector<8x512xf32>, i32 -> vector<8x512xf32>
    %c8_180 = arith.constant 8 : index
    %c0_181 = arith.constant 0 : index
    %261 = vector.load %arg9[%c8_180, %c0_181] : memref<9x512xf32, #tpu.memory_space<vmem>>, vector<1x512xf32>
    %262 = vector.broadcast %261 : vector<1x512xf32> to vector<8x512xf32>
    %263 = arith.mulf %260, %262 : vector<8x512xf32>
    %264 = tpu.concatenate %235, %239, %243, %247, %225, %251, %255, %259, %263 in 0 : vector<8x512xf32>, vector<8x512xf32>, vector<8x512xf32>, vector<8x512xf32>, vector<8x512xf32>, vector<8x512xf32>, vector<8x512xf32>, vector<8x512xf32>, vector<8x512xf32> -> vector<72x512xf32>
    %265 = arith.truncf %264 : vector<72x512xf32> to vector<72x512xbf16>
    %cst_182 = arith.constant dense<0.000000e+00> : vector<8x512xf32>
    %266 = tpu.matmul %229, %265, %cst_182 {dimension_numbers = #tpu.dot_dimension_numbers<[1], [0], [0], [1], [0, 0, 1, 1], [], []>} : vector<8x72xbf16>, vector<72x512xbf16>, vector<8x512xf32> -> vector<8x512xf32>
    %267 = vector.broadcast %231 : vector<8x1xf32> to vector<8x512xf32>
    %268 = arith.addf %266, %267 : vector<8x512xf32>
    %cst_183 = arith.constant 0.000000e+00 : f32
    %269 = vector.broadcast %cst_183 : f32 to vector<8x512xf32>
    %270 = arith.maximumf %268, %269 : vector<8x512xf32>
    %271 = arith.truncf %270 : vector<8x512xf32> to vector<8x512xbf16>
    %c48 = arith.constant 48 : index
    %c0_184 = arith.constant 0 : index
    %272 = vector.load %arg11[%c48, %c0_184] : memref<56x512xbf16, #tpu.memory_space<vmem>>, vector<8x512xbf16>
    tpu.vector_store %arg11[%c48, %c0_184], %271 {strides = array<i32>} : memref<56x512xbf16, #tpu.memory_space<vmem>>, vector<8x512xbf16>,
    %c0_185 = arith.constant 0 : index
    %c0_186 = arith.constant 0 : index
    %273 = vector.load %arg5[%c0_185, %c0_186] : memref<8x56xbf16, #tpu.memory_space<vmem>>, vector<8x56xbf16>
    %c0_187 = arith.constant 0 : index
    %c0_188 = arith.constant 0 : index
    %274 = vector.load %arg11[%c0_187, %c0_188] : memref<56x512xbf16, #tpu.memory_space<vmem>>, vector<56x512xbf16>
    %cst_189 = arith.constant dense<0.000000e+00> : vector<8x512xf32>
    %275 = tpu.matmul %273, %274, %cst_189 {dimension_numbers = #tpu.dot_dimension_numbers<[1], [0], [0], [1], [0, 0, 1, 1], [], []>} : vector<8x56xbf16>, vector<56x512xbf16>, vector<8x512xf32> -> vector<8x512xf32>
    %c0_190 = arith.constant 0 : index
    %c0_191 = arith.constant 0 : index
    %276 = vector.load %arg6[%c0_190, %c0_191] : memref<8x1xf32, #tpu.memory_space<vmem>>, vector<8x1xf32>
    %277 = vector.broadcast %276 : vector<8x1xf32> to vector<8x512xf32>
    %278 = arith.addf %275, %277 : vector<8x512xf32>
    %cst_192 = arith.constant 0.000000e+00 : f32
    %279 = vector.broadcast %cst_192 : f32 to vector<8x512xf32>
    %280 = arith.maximumf %278, %279 : vector<8x512xf32>
    %c0_193 = arith.constant 0 : index
    %c0_194 = arith.constant 0 : index
    %281 = vector.load %arg7[%c0_193, %c0_194] : memref<16x8xbf16, #tpu.memory_space<vmem>>, vector<16x8xbf16>
    %282 = arith.truncf %280 : vector<8x512xf32> to vector<8x512xbf16>
    %cst_195 = arith.constant dense<0.000000e+00> : vector<16x512xf32>
    %283 = tpu.matmul %281, %282, %cst_195 {dimension_numbers = #tpu.dot_dimension_numbers<[1], [0], [0], [1], [0, 0, 1, 1], [], []>} : vector<16x8xbf16>, vector<8x512xbf16>, vector<16x512xf32> -> vector<16x512xf32>
    %c0_196 = arith.constant 0 : index
    %c0_197 = arith.constant 0 : index
    %284 = vector.load %arg8[%c0_196, %c0_197] : memref<16x1xf32, #tpu.memory_space<vmem>>, vector<16x1xf32>
    %285 = vector.broadcast %284 : vector<16x1xf32> to vector<16x512xf32>
    %286 = arith.addf %283, %285 : vector<16x512xf32>
    %cst_198 = arith.constant 0.000000e+00 : f32
    %287 = vector.broadcast %cst_198 : f32 to vector<16x512xf32>
    %288 = arith.maximumf %286, %287 : vector<16x512xf32>
    %c0_199 = arith.constant 0 : index
    %c0_200 = arith.constant 0 : index
    %c0_201 = arith.constant 0 : index
    %289 = vector.load %arg10[%c0_199, %c0_200, %c0_201] : memref<1x16x512xf32, #tpu.memory_space<vmem>>, vector<1x16x512xf32>
    %290 = vector.shape_cast %289 : vector<1x16x512xf32> to vector<16x512xf32>
    %291 = vector.shape_cast %288 : vector<16x512xf32> to vector<1x16x512xf32>
    tpu.vector_store %arg10[%c0_199, %c0_200, %c0_201], %291 {strides = array<i32>} : memref<1x16x512xf32, #tpu.memory_space<vmem>>, vector<1x16x512xf32>,
    return
  }
  func.func @transform_0(%arg0: i32) -> (i32, i32, i32) {
    %c0_i32 = arith.constant 0 : i32
    %c0_i32_0 = arith.constant 0 : i32
    %c0_i32_1 = arith.constant 0 : i32
    return %arg0, %c0_i32, %c0_i32_0 : i32, i32, i32
  }
  func.func @transform_1(%arg0: i32) -> (i32, i32) {
    %c0_i32 = arith.constant 0 : i32
    %c0_i32_0 = arith.constant 0 : i32
    %c0_i32_1 = arith.constant 0 : i32
    return %c0_i32, %c0_i32_0 : i32, i32
  }
  func.func @transform_2(%arg0: i32) -> (i32, i32, i32) {
    %c0_i32 = arith.constant 0 : i32
    %c0_i32_0 = arith.constant 0 : i32
    %c0_i32_1 = arith.constant 0 : i32
    %c0_i32_2 = arith.constant 0 : i32
    return %c0_i32, %c0_i32_0, %c0_i32_1 : i32, i32, i32
  }
  func.func @transform_3(%arg0: i32) -> (i32, i32, i32) {
    %c0_i32 = arith.constant 0 : i32
    %c0_i32_0 = arith.constant 0 : i32
    %c0_i32_1 = arith.constant 0 : i32
    %c0_i32_2 = arith.constant 0 : i32
    return %c0_i32, %c0_i32_0, %c0_i32_1 : i32, i32, i32
  }
  func.func @transform_4(%arg0: i32) -> (i32, i32) {
    %c0_i32 = arith.constant 0 : i32
    %c0_i32_0 = arith.constant 0 : i32
    %c0_i32_1 = arith.constant 0 : i32
    return %c0_i32, %c0_i32_0 : i32, i32
  }
  func.func @transform_5(%arg0: i32) -> (i32, i32) {
    %c0_i32 = arith.constant 0 : i32
    %c0_i32_0 = arith.constant 0 : i32
    %c0_i32_1 = arith.constant 0 : i32
    return %c0_i32, %c0_i32_0 : i32, i32
  }
  func.func @transform_6(%arg0: i32) -> (i32, i32) {
    %c0_i32 = arith.constant 0 : i32
    %c0_i32_0 = arith.constant 0 : i32
    %c0_i32_1 = arith.constant 0 : i32
    return %c0_i32, %c0_i32_0 : i32, i32
  }
  func.func @transform_7(%arg0: i32) -> (i32, i32) {
    %c0_i32 = arith.constant 0 : i32
    %c0_i32_0 = arith.constant 0 : i32
    %c0_i32_1 = arith.constant 0 : i32
    return %c0_i32, %c0_i32_0 : i32, i32
  }
  func.func @transform_8(%arg0: i32) -> (i32, i32) {
    %c0_i32 = arith.constant 0 : i32
    %c0_i32_0 = arith.constant 0 : i32
    %c0_i32_1 = arith.constant 0 : i32
    return %c0_i32, %c0_i32_0 : i32, i32
  }
  func.func @transform_9(%arg0: i32) -> (i32, i32, i32) {
    %c0_i32 = arith.constant 0 : i32
    %c0_i32_0 = arith.constant 0 : i32
    %c0_i32_1 = arith.constant 0 : i32
    return %arg0, %c0_i32, %c0_i32_0 : i32, i32, i32
  }
}

</mosaic_0001>

<bundles_post_ra>
// kernel: hgblock_forward.1
= control target key start
LH: loop header
LB: loop body
LE: loop exit
PB: predicated region body
PF: predicated region fallthrough
CT: control target
= control target key end

     0   :  { %s3281_s13 = smov 111   ;;  %s3282_s18 = smov 113   ;;  %v3288_v4 = vmov 0   ;;  %v65_v6 = vlaneseq  ;;  %vm407_vm1 = vcmask 1043456   ;;  %vm403_vm9 = vcmask 588800   ;;  %s4715_s0 = inlined_call_operand.vmem [shape: f32[1,8,512], index: 0, kind: input, shape index: {}]   ;;  %s4716_s3 = inlined_call_operand.vmem [shape: f32[6,8,1], index: 3, kind: input, shape index: {}]   ;;  %s4717_s8 = inlined_call_operand.vmem [shape: f32[9,512], index: 8, kind: input, shape index: {}]   ;;  %s4718_s1 = inlined_call_operand.vmem [shape: bf16[8,72], index: 1, kind: input, shape index: {}]   ;;  %s4719_s2 = inlined_call_operand.vmem [shape: bf16[5,8,72], index: 2, kind: input, shape index: {}]   ;;  %s4720_s5 = inlined_call_operand.vmem [shape: f32[8,1], index: 5, kind: input, shape index: {}]   ;;  %s4721_s7 = inlined_call_operand.vmem [shape: f32[16,1], index: 7, kind: input, shape index: {}]   ;;  %s4722_s4 = inlined_call_operand.vmem [shape: bf16[8,56], index: 4, kind: input, shape index: {}]   ;;  %s4723_s6 = inlined_call_operand.vmem [shape: bf16[16,8], index: 6, kind: input, shape index: {}]   ;;  %s4724_s9 = inlined_call_operand.vmem [shape: f32[1,16,512], index: 9, kind: output, shape index: {}]  }
   0x1   :  { %v3343_v0 = vld [vmem:[%s4715_s0 + $0x10] sm:$0xff]  ;;  %v3348_v1 = vld [vmem:[%s4715_s0] sm:$0xff]  ;;  %v3357_v2 = vld [vmem:[%s4715_s0 + $0x18] sm:$0xff]  ;;  %s3283_s19 = smov 112   ;;  %s3284_s20 = smov 127   ;;  %452 = vmatprep.mubr.bf16.mxu0 %v3288_v4  ;;  %493 = vmatprep.mubr.bf16.mxu1 %v3288_v4  ;;  %vm2874_vm10 = vcmask 457728  }
   0x2   :  { %342 = vrot.lane.b32.xlu1 %v3343_v0, %s3281_s13  ;;  %338 = vrot.lane.b32.xlu0 %v3348_v1, %s3281_s13  ;;  %v3362_v3 = vld [vmem:[%s4715_s0 + $0x8] sm:$0xff]  ;;  %s3285_s21 = smov 15   ;;  %s3286_s22 = smov 1   ;;  %v56_v5 = vld [vmem:[%s4716_s3] sm:$0xff]  ;;  %v75_v7 = vshrl.u32 %v65_v6, 7  ;;  %v3431_v8 = vand.u32 127, %v65_v6 }
   0x3   :  { %s3287_s23 = smov 17   ;;  %3274 = vset.pattern.permute.xlu0 %v3288_v4  ;;  %3275 = vset.pattern.permute.xlu1 %v3288_v4  ;;  %s3289_s24 = smov 16   ;;  %v3129_v13 = vld [vmem:[%s4717_s8 + $0x20] ss:$8 sm:$0xf]  ;;  %vm2999_vm11 = vcmask 64512  }
   0x4   :  { %v3433_v9 = vsub.s32 0, %v75_v7  ;;  %v3435_v10 = vsub.s32 1, %v75_v7  ;;  %v3437_v11 = vsub.s32 2, %v75_v7  ;;  %v3439_v12 = vsub.s32 3, %v75_v7 }
   0x5   :  { %vm346_vm0 = vcmp.lt.s32.totalorder %v3431_v8, 111  ;;  %v3128_v40 = vld [vmem:[%s4717_s8 + $0x7] ss:$8 sm:$0xf]  ;;  %vm306_vm2 = vcmp.lt.s32.totalorder %v3431_v8, 112  ;;  %vm266_vm3 = vcmp.lt.s32.totalorder %v3431_v8, 113 }
   0x6   :  { %344 = vrot.lane.b32.xlu1 %v3357_v2, %s3281_s13  ;;  %340 = vrot.lane.b32.xlu0 %v3362_v3, %s3281_s13  ;;  %v361_v16 = vrot.slane %v3129_v13, %v3435_v10  ;;  %v369_v17 = vrot.slane %v3129_v13, %v3439_v12  ;;  %v357_v18 = vrot.slane %v3129_v13, %v3433_v9  ;;  %v3127_v41 = vld [vmem:[%s4717_s8 + $0x6] ss:$8 sm:$0xf]  ;;  %vm226_vm4 = vcmp.lt.s32.totalorder %v3431_v8, 127 }
   0x7   :  { %v365_v19 = vrot.slane %v3129_v13, %v3437_v11  ;;  %v289_v42 = vrot.slane %v3127_v41, %v3439_v12  ;;  %v281_v43 = vrot.slane %v3127_v41, %v3435_v10  ;;  %v285_v47 = vrot.slane %v3127_v41, %v3437_v11 }
   0x8   :  { %v317_v49 = vrot.slane %v3128_v40, %v3433_v9  ;;  %v329_v51 = vrot.slane %v3128_v40, %v3439_v12  ;;  %v321_v52 = vrot.slane %v3128_v40, %v3435_v10  ;;  %v325_v53 = vrot.slane %v3128_v40, %v3437_v11 }
   0x9   :  { %v277_v54 = vrot.slane %v3127_v41, %v3433_v9  ;;  %vm146_vm5 = vcmp.lt.s32.totalorder %v3431_v8, 15  ;;  %vm186_vm6 = vcmp.lt.s32.totalorder %v3431_v8, 1  ;;  %vm67_vm7 = vcmp.lt.s32.totalorder %v3431_v8, 17 }
   0xa   :  { %260 = vrot.lane.b32.xlu1 %v3362_v3, %s3282_s18  ;;  %258 = vrot.lane.b32.xlu0 %v3348_v1, %s3282_s18  ;;  %vm106_vm8 = vcmp.lt.s32.totalorder %v3431_v8, 16 }
   0xe   :  { %264 = vrot.lane.b32.xlu1 %v3357_v2, %s3282_s18  ;;  %262 = vrot.lane.b32.xlu0 %v3343_v0, %s3282_s18 }
  0x12   :  { %300 = vrot.lane.b32.xlu1 %v3362_v3, %s3283_s19  ;;  %298 = vrot.lane.b32.xlu0 %v3348_v1, %s3283_s19 }
  0x16   :  { %304 = vrot.lane.b32.xlu1 %v3357_v2, %s3283_s19  ;;  %302 = vrot.lane.b32.xlu0 %v3343_v0, %s3283_s19 }
  0x1a   :  { %220 = vrot.lane.b32.xlu1 %v3362_v3, %s3284_s20  ;;  %218 = vrot.lane.b32.xlu0 %v3348_v1, %s3284_s20 }
  0x1e   :  { %224 = vrot.lane.b32.xlu1 %v3357_v2, %s3284_s20  ;;  %222 = vrot.lane.b32.xlu0 %v3343_v0, %s3284_s20 }
  0x22   :  { %140 = vrot.lane.b32.xlu1 %v3362_v3, %s3285_s21  ;;  %138 = vrot.lane.b32.xlu0 %v3348_v1, %s3285_s21 }
  0x26   :  { %144 = vrot.lane.b32.xlu1 %v3357_v2, %s3285_s21  ;;  %142 = vrot.lane.b32.xlu0 %v3343_v0, %s3285_s21 }
  0x2a   :  { %180 = vrot.lane.b32.xlu1 %v3362_v3, %s3286_s22  ;;  %178 = vrot.lane.b32.xlu0 %v3348_v1, %s3286_s22 }
  0x2e   :  { %184 = vrot.lane.b32.xlu1 %v3357_v2, %s3286_s22  ;;  %182 = vrot.lane.b32.xlu0 %v3343_v0, %s3286_s22 }
  0x32   :  { %59 = vrot.lane.b32.xlu1 %v3362_v3, %s3287_s23  ;;  %57 = vrot.lane.b32.xlu0 %v3348_v1, %s3287_s23 }
  0x36   :  { %63 = vrot.lane.b32.xlu1 %v3357_v2, %s3287_s23  ;;  %61 = vrot.lane.b32.xlu0 %v3343_v0, %s3287_s23 }
  0x3a   :  { %100 = vrot.lane.b32.xlu1 %v3362_v3, %s3289_s24  ;;  %98 = vrot.lane.b32.xlu0 %v3348_v1, %s3289_s24 }
  0x3e   :  { %104 = vrot.lane.b32.xlu1 %v3357_v2, %s3289_s24  ;;  %102 = vrot.lane.b32.xlu0 %v3343_v0, %s3289_s24 }
  0x42   :  { %400 = vperm.xlu0 %3274, %v56_v5  }
  0x74   :  { %v343_v14 = vpop.permute.xlu1 %342  ;;  %v339_v15 = vpop.permute.xlu0 %338 }
  0x78   :  { %v345_v20 = vpop.permute.xlu1 %344  ;;  %v341_v21 = vpop.permute.xlu0 %340 }
  0x79   :  { %v347_v22 = vsel %vm346_vm0, %v343_v14, %v345_v20  ;;  %v349_v23 = vsel %vm346_vm0, %v339_v15, %v341_v21  ;;  %v348_v24 = vsel %vm346_vm0, %v341_v21, %v343_v14  ;;  %v350_v25 = vsel %vm346_vm0, %v345_v20, %v339_v15  ;;  %v3126_v15 = vld [vmem:[%s4717_s8 + $0x5] ss:$8 sm:$0xf] }
  0x7a   :  { %v375_v26 = vmul.f32 %v361_v16, %v348_v24  ;;  %v377_v27 = vmul.f32 %v369_v17, %v350_v25  ;;  %v374_v28 = vmul.f32 %v357_v18, %v349_v23  ;;  %v376_v29 = vmul.f32 %v365_v19, %v347_v22 }
  0x7b   :  { %v237_v22 = vrot.slane %v3126_v15, %v3433_v9  ;;  %v249_v24 = vrot.slane %v3126_v15, %v3439_v12 }
  0x7c   :  { %v261_v30 = vpop.permute.xlu1 %260  ;;  %v259_v31 = vpop.permute.xlu0 %258  ;;  %v395_v32 = vpack.c.bf16 %v375_v26, %v375_v26  ;;  %v397_v33 = vpack.c.bf16 %v377_v27, %v377_v27  ;;  %v394_v34 = vpack.c.bf16 %v374_v28, %v374_v28  ;;  %v396_v35 = vpack.c.bf16 %v376_v29, %v376_v29 }
  0x7d   :  { %v269_v56 = vsel %vm266_vm3, %v259_v31, %v261_v30  ;;  %v241_v26 = vrot.slane %v3126_v15, %v3435_v10  ;;  %v245_v27 = vrot.slane %v3126_v15, %v3437_v11 }
  0x7e   :  { %3130 = vmatprep.subr.msk.bf16.mxu0 %vm407_vm1, %v395_v32  ;;  %3132 = vmatprep.subr.msk.bf16.mxu1 %vm407_vm1, %v397_v33  ;;  %v409_v36 = vsel %vm407_vm1, %v394_v34, 0  ;;  %v415_v37 = vsel %vm407_vm1, %v396_v35, 0  ;;  %v294_v16 = vmul.f32 %v277_v54, %v269_v56 }
  0x7f   :  { %427 = vmatpush1.bf16.msra.mxu0 %v409_v36  ;;  %468 = vmatpush1.bf16.msra.mxu1 %v415_v37 }
  0x80   :  { %v265_v38 = vpop.permute.xlu1 %264  ;;  %v263_v39 = vpop.permute.xlu0 %262 }
  0x81   :  { %v270_v46 = vsel %vm266_vm3, %v265_v38, %v259_v31  ;;  %v268_v48 = vsel %vm266_vm3, %v261_v30, %v263_v39  ;;  %v267_v55 = vsel %vm266_vm3, %v263_v39, %v265_v38 }
  0x82   :  { %v297_v57 = vmul.f32 %v289_v42, %v270_v46  ;;  %v295_v58 = vmul.f32 %v281_v43, %v268_v48  ;;  %v296_v6 = vmul.f32 %v285_v47, %v267_v55  ;;  %v3124_v43 = vld [vmem:[%s4717_s8 + $0x2] ss:$8 sm:$0xf] }
  0x83   :  { %v157_v46 = vrot.slane %v3124_v43, %v3433_v9  ;;  %v165_v47 = vrot.slane %v3124_v43, %v3437_v11  ;;  %v169_v48 = vrot.slane %v3124_v43, %v3439_v12 }
  0x84   :  { %v301_v44 = vpop.permute.xlu1 %300  ;;  %v299_v45 = vpop.permute.xlu0 %298 }
  0x85   :  { %v309_v50 = vsel %vm306_vm2, %v299_v45, %v301_v44 }
  0x86   :  { %v334_v61 = vmul.f32 %v317_v49, %v309_v50 }
  0x88   :  { %v305_v59 = vpop.permute.xlu1 %304  ;;  %v303_v60 = vpop.permute.xlu0 %302  ;;  %v390_v23 = vpack.c.bf16 %v334_v61, %v294_v16 }
  0x89   :  { %v310_v62 = vsel %vm306_vm2, %v305_v59, %v299_v45  ;;  %v307_v63 = vsel %vm306_vm2, %v303_v60, %v305_v59  ;;  %v308_v5 = vsel %vm306_vm2, %v301_v44, %v303_v60  ;;  %v3125_v44 = vld [vmem:[%s4717_s8 + $0x3] ss:$8 sm:$0xf] }
  0x8a   :  { %v337_v7 = vmul.f32 %v329_v51, %v310_v62  ;;  %v335_v13 = vmul.f32 %v321_v52, %v308_v5  ;;  %v336_v14 = vmul.f32 %v325_v53, %v307_v63  ;;  %v197_v53 = vrot.slane %v3125_v44, %v3433_v9 }
  0x8b   :  { %v205_v54 = vrot.slane %v3125_v44, %v3437_v11 }
  0x8c   :  { %v221_v17 = vpop.permute.xlu1 %220  ;;  %v219_v18 = vpop.permute.xlu0 %218  ;;  %v391_v19 = vpack.c.bf16 %v335_v13, %v295_v58  ;;  %v393_v20 = vpack.c.bf16 %v337_v7, %v297_v57  ;;  %v392_v21 = vpack.c.bf16 %v336_v14, %v296_v6  ;;  %v209_v58 = vrot.slane %v3125_v44, %v3439_v12 }
  0x8d   :  { %v229_v25 = vsel %vm226_vm4, %v219_v18, %v221_v17 }
  0x8e   :  { %428 = vmatprep.subr.bf16.mxu0 %v391_v19  ;;  %469 = vmatprep.subr.bf16.mxu1 %v393_v20  ;;  %v254_v30 = vmul.f32 %v237_v22, %v229_v25 }
  0x8f   :  { %429 = vmatpush1.bf16.msra.mxu0 %v390_v23  ;;  %470 = vmatpush1.bf16.msra.mxu1 %v392_v21  ;;  %v72_v23 = vld [vmem:[%s4717_s8] ss:$8 sm:$0xf] }
  0x90   :  { %v225_v28 = vpop.permute.xlu1 %224  ;;  %v223_v29 = vpop.permute.xlu0 %222  ;;  %v386_v42 = vpack.c.bf16 %v254_v30, %v3348_v1  ;;  %v201_v1 = vrot.slane %v3125_v44, %v3435_v10  ;;  %v77_v30 = vrot.slane %v72_v23, %v3433_v9 }
  0x91   :  { %v230_v31 = vsel %vm226_vm4, %v225_v28, %v219_v18  ;;  %v227_v32 = vsel %vm226_vm4, %v223_v29, %v225_v28  ;;  %v228_v33 = vsel %vm226_vm4, %v221_v17, %v223_v29 }
  0x92   :  { %v257_v34 = vmul.f32 %v249_v24, %v230_v31  ;;  %v255_v35 = vmul.f32 %v241_v26, %v228_v33  ;;  %v256_v36 = vmul.f32 %v245_v27, %v227_v32  ;;  %v3123_v24 = vld [vmem:[%s4717_s8 + $0x1] ss:$8 sm:$0xf]  ;;  %v81_v27 = vrot.slane %v72_v23, %v3435_v10 }
  0x93   :  { %v121_v28 = vrot.slane %v3123_v24, %v3435_v10  ;;  %v85_v31 = vrot.slane %v72_v23, %v3437_v11  ;;  %v89_v32 = vrot.slane %v72_v23, %v3439_v12 }
  0x94   :  { %v141_v37 = vpop.permute.xlu1 %140  ;;  %v139_v38 = vpop.permute.xlu0 %138  ;;  %v387_v39 = vpack.c.bf16 %v255_v35, %v3362_v3  ;;  %v389_v40 = vpack.c.bf16 %v257_v34, %v3357_v2  ;;  %v388_v41 = vpack.c.bf16 %v256_v36, %v3343_v0  ;;  %v161_v0 = vrot.slane %v3124_v43, %v3435_v10 }
  0x95   :  { %v149_v45 = vsel %vm146_vm5, %v139_v38, %v141_v37 }
  0x96   :  { %430 = vmatprep.subr.bf16.mxu0 %v387_v39  ;;  %471 = vmatprep.subr.bf16.mxu1 %v389_v40  ;;  %v175_v55 = vmul.f32 %v161_v0, %v149_v45 }
  0x97   :  { %431 = vmatpush1.bf16.msra.mxu0 %v386_v42  ;;  %472 = vmatpush1.bf16.msra.mxu1 %v388_v41  ;;  %v129_v42 = vrot.slane %v3123_v24, %v3439_v12 }
  0x98   :  { %v145_v3 = vpop.permute.xlu1 %144  ;;  %v143_v2 = vpop.permute.xlu0 %142 }
  0x99   :  { %v150_v51 = vsel %vm146_vm5, %v145_v3, %v139_v38  ;;  %v148_v56 = vsel %vm146_vm5, %v141_v37, %v143_v2  ;;  %v147_v59 = vsel %vm146_vm5, %v143_v2, %v145_v3  ;;  %v117_v37 = vrot.slane %v3123_v24, %v3433_v9 }
  0x9a   :  { %v174_v60 = vmul.f32 %v157_v46, %v150_v51  ;;  %v176_v5 = vmul.f32 %v165_v47, %v148_v56  ;;  %v177_v14 = vmul.f32 %v169_v48, %v147_v59  ;;  %v125_v38 = vrot.slane %v3123_v24, %v3437_v11 }
  0x9c   :  { %v181_v49 = vpop.permute.xlu1 %180  ;;  %v179_v50 = vpop.permute.xlu0 %178 }
  0x9d   :  { %v189_v52 = vsel %vm186_vm6, %v179_v50, %v181_v49 }
  0x9e   :  { %v215_v57 = vmul.f32 %v201_v1, %v189_v52 }
  0xa0   :  { %v185_v61 = vpop.permute.xlu1 %184  ;;  %v183_v62 = vpop.permute.xlu0 %182  ;;  %v383_v63 = vpack.c.bf16 %v215_v57, %v175_v55  ;;  %v55_v55 = vld [vmem:[%s4718_s1] sm:$0xf] }
  0xa1   :  { %v190_v6 = vsel %vm186_vm6, %v185_v61, %v179_v50  ;;  %v187_v7 = vsel %vm186_vm6, %v183_v62, %v185_v61  ;;  %v188_v13 = vsel %vm186_vm6, %v181_v49, %v183_v62 }
  0xa2   :  { %v214_v15 = vmul.f32 %v197_v53, %v190_v6  ;;  %v216_v16 = vmul.f32 %v205_v54, %v188_v13  ;;  %v217_v17 = vmul.f32 %v209_v58, %v187_v7  ;;  %432 = vmatprep.subr.bf16.mxu0 %v383_v63 }
  0xa4   :  { %v60_v18 = vpop.permute.xlu1 %59  ;;  %v58_v19 = vpop.permute.xlu0 %57  ;;  %v382_v20 = vpack.c.bf16 %v214_v15, %v174_v60  ;;  %v385_v21 = vpack.c.bf16 %v217_v17, %v177_v14  ;;  %v384_v22 = vpack.c.bf16 %v216_v16, %v176_v5 }
  0xa5   :  { %v70_v29 = vsel %vm67_vm7, %v58_v19, %v60_v18 }
  0xa6   :  { %433 = vmatpush1.bf16.msra.mxu0 %v382_v20  ;;  %473 = vmatprep.subr.bf16.mxu1 %v385_v21  ;;  %v95_v39 = vmul.f32 %v81_v27, %v70_v29  ;;  %v3143_v20 = vld [vmem:[%s4717_s8 + $0x20] ss:$8 sm:$0xf] }
  0xa7   :  { %474 = vmatpush1.bf16.msra.mxu1 %v384_v22  ;;  %v810_v23 = vrot.slane %v3143_v20, %v3433_v9  ;;  %v814_v24 = vrot.slane %v3143_v20, %v3435_v10 }
  0xa8   :  { %v64_v25 = vpop.permute.xlu1 %63  ;;  %v62_v26 = vpop.permute.xlu0 %61 }
  0xa9   :  { %v71_v35 = vsel %vm67_vm7, %v64_v25, %v58_v19  ;;  %v69_v40 = vsel %vm67_vm7, %v60_v18, %v62_v26  ;;  %v68_v43 = vsel %vm67_vm7, %v62_v26, %v64_v25  ;;  %v3136_v19 = vld [vmem:[%s4716_s3 + $0x8] sm:$0xff] }
  0xaa   :  { %v94_v44 = vmul.f32 %v77_v30, %v71_v35  ;;  %v96_v1 = vmul.f32 %v85_v31, %v69_v40  ;;  %v97_v48 = vmul.f32 %v89_v32, %v68_v43  ;;  %v818_v31 = vrot.slane %v3143_v20, %v3437_v11 }
  0xab   :  { %v822_v32 = vrot.slane %v3143_v20, %v3439_v12 }
  0xac   :  { %v101_v33 = vpop.permute.xlu1 %100  ;;  %v99_v34 = vpop.permute.xlu0 %98 }
  0xad   :  { %v109_v36 = vsel %vm106_vm8, %v99_v34, %v101_v33 }
  0xae   :  { %v135_v41 = vmul.f32 %v121_v28, %v109_v36 }
  0xb0   :  { %v105_v3 = vpop.permute.xlu1 %104  ;;  %v103_v2 = vpop.permute.xlu0 %102  ;;  %v379_v0 = vpack.c.bf16 %v135_v41, %v95_v39 }
  0xb1   :  { %v110_v45 = vsel %vm106_vm8, %v105_v3, %v99_v34  ;;  %v107_v46 = vsel %vm106_vm8, %v103_v2, %v105_v3  ;;  %v108_v47 = vsel %vm106_vm8, %v101_v33, %v103_v2 }
  0xb2   :  { %v134_v49 = vmul.f32 %v117_v37, %v110_v45  ;;  %v136_v50 = vmul.f32 %v125_v38, %v108_v47  ;;  %v137_v51 = vmul.f32 %v129_v42, %v107_v46  ;;  %434 = vmatprep.subr.bf16.mxu0 %v379_v0  ;;  %v3141_v0 = vld [vmem:[%s4717_s8 + $0x6] ss:$8 sm:$0xf] }
  0xb3   :  { %v734_v47 = vrot.slane %v3141_v0, %v3433_v9 }
  0xb4   :  { %v378_v52 = vpack.c.bf16 %v134_v49, %v94_v44  ;;  %v381_v53 = vpack.c.bf16 %v137_v51, %v97_v48  ;;  %v380_v54 = vpack.c.bf16 %v136_v50, %v96_v1  ;;  %v3142_v1 = vld [vmem:[%s4717_s8 + $0x7] ss:$8 sm:$0xf]  ;;  %v738_v48 = vrot.slane %v3141_v0, %v3435_v10 }
  0xb5   :  { %v772_v49 = vrot.slane %v3142_v1, %v3433_v9  ;;  %v776_v50 = vrot.slane %v3142_v1, %v3435_v10 }
  0xb6   :  { %435 = vmatpush1.bf16.msra.mxu0 %v378_v52  ;;  %475 = vmatprep.subr.bf16.mxu1 %v381_v53  ;;  %v742_v53 = vrot.slane %v3141_v0, %v3437_v11 }
  0xb7   :  { %476 = vmatpush1.bf16.msra.mxu1 %v380_v54  ;;  %v746_v54 = vrot.slane %v3141_v0, %v3439_v12 }
  0xb9   :  { %3131 = vmatmul.mubr.msk.bf16.vlgmr.msra.gmra.mxu0 %vm403_vm9, %v55_v55 }
  0xba   :  { %3133 = vmatmul.mubr.msk.bf16.vlgmr.msra.gmra.mxu1 %vm403_vm9, %v55_v55  ;;  %903 = vmatprep.mubr.bf16.mxu0 %v3288_v4 }
  0xbb   :  { %944 = vmatprep.mubr.bf16.mxu1 %v3288_v4 }
  0xbd   :  { %v401_v56 = vpop.permute.xlu0 %400 }
 0x179   :  { %v454_v57 = vpop.f32.mrf.mxu0 }
 0x17a   :  { %v455_v58 = vadd.f32 %v454_v57, %v401_v56  ;;  %v495_v59 = vpop.f32.mrf.mxu1 }
 0x17b   :  { %v496_v60 = vadd.f32 %v495_v59, %v401_v56  ;;  %v456_v61 = vpop.f32.mrf.mxu0  ;;  %v780_v59 = vrot.slane %v3142_v1, %v3437_v11 }
 0x17c   :  { %v3584_v62 = vmax.f32 %v455_v58, 0.0  ;;  %v457_v63 = vadd.f32 %v456_v61, %v401_v56  ;;  %v497_v5 = vpop.f32.mrf.mxu1 }
 0x17d   :  { %v3586_v6 = vmax.f32 %v496_v60, 0.0  ;;  %v458_v7 = vpop.f32.mrf.mxu0  ;;  %v498_v16 = vadd.f32 %v497_v5, %v401_v56  ;;  %v784_v60 = vrot.slane %v3142_v1, %v3439_v12 }
 0x17e   :  { %v499_v13 = vpop.f32.mrf.mxu1  ;;  %793 = vrot.lane.b32.xlu1 %v3584_v62, %s3281_s13  ;;  %v3592_v15 = vmax.f32 %v457_v63, 0.0 }
 0x17f   :  { %v459_v14 = vpop.f32.mrf.mxu0  ;;  %797 = vrot.lane.b32.xlu0 %v3586_v6, %s3281_s13  ;;  %v3598_v18 = vmax.f32 %v498_v16, 0.0  ;;  %v3140_v13 = vld [vmem:[%s4717_s8 + $0x5] ss:$8 sm:$0xf] }
 0x180   :  { %v500_v17 = vpop.f32.mrf.mxu1 }
 0x182   :  { %795 = vrot.lane.b32.xlu1 %v3592_v15, %s3281_s13 }
 0x183   :  { %717 = vrot.lane.b32.xlu0 %v3584_v62, %s3282_s18 }
 0x186   :  { %799 = vrot.lane.b32.xlu1 %v3598_v18, %s3281_s13 }
 0x187   :  { %721 = vrot.lane.b32.xlu0 %v3586_v6, %s3282_s18 }
 0x18a   :  { %719 = vrot.lane.b32.xlu1 %v3592_v15, %s3282_s18 }
 0x18b   :  { %755 = vrot.lane.b32.xlu0 %v3584_v62, %s3283_s19 }
 0x18e   :  { %723 = vrot.lane.b32.xlu1 %v3598_v18, %s3282_s18 }
 0x18f   :  { %759 = vrot.lane.b32.xlu0 %v3586_v6, %s3283_s19 }
 0x192   :  { %757 = vrot.lane.b32.xlu1 %v3592_v15, %s3283_s19 }
 0x193   :  { %679 = vrot.lane.b32.xlu0 %v3584_v62, %s3284_s20 }
 0x196   :  { %761 = vrot.lane.b32.xlu1 %v3598_v18, %s3283_s19 }
 0x197   :  { %683 = vrot.lane.b32.xlu0 %v3586_v6, %s3284_s20 }
 0x19a   :  { %681 = vrot.lane.b32.xlu1 %v3592_v15, %s3284_s20 }
 0x19b   :  { %603 = vrot.lane.b32.xlu0 %v3584_v62, %s3285_s21 }
 0x19e   :  { %685 = vrot.lane.b32.xlu1 %v3598_v18, %s3284_s20 }
 0x19f   :  { %607 = vrot.lane.b32.xlu0 %v3586_v6, %s3285_s21 }
 0x1a2   :  { %605 = vrot.lane.b32.xlu1 %v3592_v15, %s3285_s21 }
 0x1a3   :  { %641 = vrot.lane.b32.xlu0 %v3584_v62, %s3286_s22 }
 0x1a6   :  { %609 = vrot.lane.b32.xlu1 %v3598_v18, %s3285_s21 }
 0x1a7   :  { %645 = vrot.lane.b32.xlu0 %v3586_v6, %s3286_s22 }
 0x1aa   :  { %643 = vrot.lane.b32.xlu1 %v3592_v15, %s3286_s22 }
 0x1ab   :  { %527 = vrot.lane.b32.xlu0 %v3584_v62, %s3287_s23 }
 0x1ae   :  { %647 = vrot.lane.b32.xlu1 %v3598_v18, %s3286_s22 }
 0x1af   :  { %531 = vrot.lane.b32.xlu0 %v3586_v6, %s3287_s23 }
 0x1b2   :  { %529 = vrot.lane.b32.xlu1 %v3592_v15, %s3287_s23 }
 0x1b3   :  { %565 = vrot.lane.b32.xlu0 %v3584_v62, %s3289_s24 }
 0x1b6   :  { %533 = vrot.lane.b32.xlu1 %v3598_v18, %s3287_s23 }
 0x1b7   :  { %569 = vrot.lane.b32.xlu0 %v3586_v6, %s3289_s24 }
 0x1ba   :  { %567 = vrot.lane.b32.xlu1 %v3592_v15, %s3289_s24 }
 0x1bb   :  { %853 = vperm.xlu0 %3274, %v3136_v19  }
 0x1be   :  { %571 = vrot.lane.b32.xlu1 %v3598_v18, %s3289_s24 }
 0x1f0   :  { %v794_v21 = vpop.permute.xlu1 %793 }
 0x1f1   :  { %v798_v22 = vpop.permute.xlu0 %797 }
 0x1f4   :  { %v796_v25 = vpop.permute.xlu1 %795 }
 0x1f5   :  { %v802_v26 = vsel %vm346_vm0, %v796_v25, %v798_v22  ;;  %v803_v27 = vsel %vm346_vm0, %v794_v21, %v796_v25  ;;  %v718_v28 = vpop.permute.xlu0 %717  ;;  %v700_v25 = vrot.slane %v3140_v13, %v3435_v10 }
 0x1f6   :  { %v827_v29 = vmul.f32 %v810_v23, %v803_v27  ;;  %v828_v30 = vmul.f32 %v814_v24, %v802_v26  ;;  %v696_v24 = vrot.slane %v3140_v13, %v3433_v9 }
 0x1f8   :  { %v847_v33 = vpack.c.bf16 %v827_v29, %v827_v29  ;;  %v848_v34 = vpack.c.bf16 %v828_v30, %v828_v30  ;;  %v800_v35 = vpop.permute.xlu1 %799 }
 0x1f9   :  { %v801_v36 = vsel %vm346_vm0, %v798_v22, %v800_v35  ;;  %v804_v37 = vsel %vm346_vm0, %v800_v35, %v794_v21  ;;  %v722_v38 = vpop.permute.xlu0 %721 }
 0x1fa   :  { %v829_v39 = vmul.f32 %v818_v31, %v801_v36  ;;  %v830_v40 = vmul.f32 %v822_v32, %v804_v37  ;;  %3144 = vmatprep.subr.msk.bf16.mxu0 %vm407_vm1, %v848_v34  ;;  %v860_v41 = vsel %vm407_vm1, %v847_v33, 0 }
 0x1fb   :  { %878 = vmatpush1.bf16.msra.mxu0 %v860_v41 }
 0x1fc   :  { %v849_v42 = vpack.c.bf16 %v829_v39, %v829_v39  ;;  %v850_v43 = vpack.c.bf16 %v830_v40, %v830_v40  ;;  %v720_v44 = vpop.permute.xlu1 %719  ;;  %v708_v39 = vrot.slane %v3140_v13, %v3439_v12 }
 0x1fd   :  { %v756_v3 = vpop.permute.xlu0 %755  ;;  %v726_v51 = vsel %vm266_vm3, %v720_v44, %v722_v38  ;;  %v727_v52 = vsel %vm266_vm3, %v718_v28, %v720_v44 }
 0x1fe   :  { %3146 = vmatprep.subr.msk.bf16.mxu1 %vm407_vm1, %v850_v43  ;;  %v866_v2 = vsel %vm407_vm1, %v849_v42, 0  ;;  %v751_v61 = vmul.f32 %v734_v47, %v727_v52  ;;  %v752_v63 = vmul.f32 %v738_v48, %v726_v51  ;;  %v3138_v48 = vld [vmem:[%s4717_s8 + $0x2] ss:$8 sm:$0xf] }
 0x1ff   :  { %919 = vmatpush1.bf16.msra.mxu1 %v866_v2  ;;  %v624_v52 = vrot.slane %v3138_v48, %v3435_v10 }
 0x200   :  { %v724_v45 = vpop.permute.xlu1 %723 }
 0x201   :  { %v760_v46 = vpop.permute.xlu0 %759  ;;  %v725_v14 = vsel %vm266_vm3, %v722_v38, %v724_v45  ;;  %v728_v16 = vsel %vm266_vm3, %v724_v45, %v718_v28  ;;  %v704_v38 = vrot.slane %v3140_v13, %v3437_v11 }
 0x202   :  { %v753_v26 = vmul.f32 %v742_v53, %v725_v14  ;;  %v754_v27 = vmul.f32 %v746_v54, %v728_v16  ;;  %v628_v14 = vrot.slane %v3138_v48, %v3437_v11 }
 0x204   :  { %v758_v55 = vpop.permute.xlu1 %757 }
 0x205   :  { %v764_v56 = vsel %vm306_vm2, %v758_v55, %v760_v46  ;;  %v765_v57 = vsel %vm306_vm2, %v756_v3, %v758_v55  ;;  %v680_v58 = vpop.permute.xlu0 %679  ;;  %v620_v55 = vrot.slane %v3138_v48, %v3433_v9 }
 0x206   :  { %v789_v5 = vmul.f32 %v772_v49, %v765_v57  ;;  %v790_v7 = vmul.f32 %v776_v50, %v764_v56  ;;  %v3139_v49 = vld [vmem:[%s4717_s8 + $0x3] ss:$8 sm:$0xf]  ;;  %v632_v57 = vrot.slane %v3138_v48, %v3439_v12 }
 0x207   :  { %v662_v53 = vrot.slane %v3139_v49, %v3435_v10  ;;  %v670_v13 = vrot.slane %v3139_v49, %v3439_v12 }
 0x208   :  { %v843_v17 = vpack.c.bf16 %v789_v5, %v751_v61  ;;  %v762_v19 = vpop.permute.xlu1 %761  ;;  %v844_v20 = vpack.c.bf16 %v790_v7, %v752_v63  ;;  %v658_v61 = vrot.slane %v3139_v49, %v3433_v9 }
 0x209   :  { %v763_v21 = vsel %vm306_vm2, %v760_v46, %v762_v19  ;;  %v766_v22 = vsel %vm306_vm2, %v762_v19, %v756_v3  ;;  %v684_v23 = vpop.permute.xlu0 %683 }
 0x20a   :  { %v791_v29 = vmul.f32 %v780_v59, %v763_v21  ;;  %v792_v30 = vmul.f32 %v784_v60, %v766_v22  ;;  %879 = vmatprep.subr.bf16.mxu0 %v844_v20 }
 0x20b   :  { %880 = vmatpush1.bf16.msra.mxu0 %v843_v17 }
 0x20c   :  { %v845_v28 = vpack.c.bf16 %v791_v29, %v753_v26  ;;  %v682_v31 = vpop.permute.xlu1 %681  ;;  %v846_v32 = vpack.c.bf16 %v792_v30, %v754_v27 }
 0x20d   :  { %v688_v33 = vsel %vm226_vm4, %v682_v31, %v684_v23  ;;  %v689_v34 = vsel %vm226_vm4, %v680_v58, %v682_v31  ;;  %v604_v35 = vpop.permute.xlu0 %603 }
 0x20e   :  { %v713_v36 = vmul.f32 %v696_v24, %v689_v34  ;;  %v714_v37 = vmul.f32 %v700_v25, %v688_v33  ;;  %920 = vmatprep.subr.bf16.mxu1 %v846_v32 }
 0x20f   :  { %921 = vmatpush1.bf16.msra.mxu1 %v845_v28 }
 0x210   :  { %v839_v40 = vpack.c.bf16 %v713_v36, %v3584_v62  ;;  %v686_v41 = vpop.permute.xlu1 %685  ;;  %v840_v42 = vpack.c.bf16 %v714_v37, %v3592_v15  ;;  %v3137_v37 = vld [vmem:[%s4717_s8 + $0x1] ss:$8 sm:$0xf] }
 0x211   :  { %v687_v43 = vsel %vm226_vm4, %v684_v23, %v686_v41  ;;  %v690_v44 = vsel %vm226_vm4, %v686_v41, %v680_v58  ;;  %v608_v3 = vpop.permute.xlu0 %607  ;;  %v666_v58 = vrot.slane %v3139_v49, %v3437_v11  ;;  %v594_v48 = vrot.slane %v3137_v37, %v3439_v12 }
 0x212   :  { %v715_v2 = vmul.f32 %v704_v38, %v687_v43  ;;  %v716_v0 = vmul.f32 %v708_v39, %v690_v44  ;;  %881 = vmatprep.subr.bf16.mxu0 %v840_v42 }
 0x213   :  { %882 = vmatpush1.bf16.msra.mxu0 %v839_v40  ;;  %v586_v40 = vrot.slane %v3137_v37, %v3435_v10 }
 0x214   :  { %v841_v1 = vpack.c.bf16 %v715_v2, %v3586_v6  ;;  %v606_v45 = vpop.permute.xlu1 %605  ;;  %v842_v46 = vpack.c.bf16 %v716_v0, %v3598_v18  ;;  %v590_v2 = vrot.slane %v3137_v37, %v3437_v11 }
 0x215   :  { %v642_v47 = vpop.permute.xlu0 %641  ;;  %v613_v54 = vsel %vm146_vm5, %v604_v35, %v606_v45  ;;  %v612_v19 = vsel %vm146_vm5, %v606_v45, %v608_v3 }
 0x216   :  { %922 = vmatprep.subr.bf16.mxu1 %v842_v46  ;;  %v638_v63 = vmul.f32 %v624_v52, %v613_v54  ;;  %v639_v28 = vmul.f32 %v628_v14, %v612_v19  ;;  %v524_v14 = vld [vmem:[%s4719_s2] sm:$0xf] }
 0x217   :  { %923 = vmatpush1.bf16.msra.mxu1 %v841_v1  ;;  %v582_v1 = vrot.slane %v3137_v37, %v3433_v9 }
 0x218   :  { %v610_v50 = vpop.permute.xlu1 %609 }
 0x219   :  { %v646_v51 = vpop.permute.xlu0 %645  ;;  %v611_v16 = vsel %vm146_vm5, %v608_v3, %v610_v50  ;;  %v614_v17 = vsel %vm146_vm5, %v610_v50, %v604_v35  ;;  %v539_v35 = vld [vmem:[%s4717_s8] ss:$8 sm:$0xf] }
 0x21a   :  { %v637_v26 = vmul.f32 %v620_v55, %v614_v17  ;;  %v640_v27 = vmul.f32 %v632_v57, %v611_v16  ;;  %v548_v39 = vrot.slane %v539_v35, %v3435_v10  ;;  %v544_v42 = vrot.slane %v539_v35, %v3433_v9 }
 0x21b   :  { %v556_v44 = vrot.slane %v539_v35, %v3439_v12  ;;  %v552_v49 = vrot.slane %v539_v35, %v3437_v11  ;;  %v3158_v35 = vld [vmem:[%s4717_s8 + $0x20] ss:$8 sm:$0xf] }
 0x21c   :  { %v644_v56 = vpop.permute.xlu1 %643  ;;  %v1262_v37 = vrot.slane %v3158_v35, %v3433_v9 }
 0x21d   :  { %v651_v59 = vsel %vm186_vm6, %v642_v47, %v644_v56  ;;  %v528_v60 = vpop.permute.xlu0 %527  ;;  %v650_v5 = vsel %vm186_vm6, %v644_v56, %v646_v51 }
 0x21e   :  { %v676_v7 = vmul.f32 %v662_v53, %v651_v59  ;;  %v677_v22 = vmul.f32 %v666_v58, %v650_v5 }
 0x220   :  { %v648_v20 = vpop.permute.xlu1 %647  ;;  %v836_v21 = vpack.c.bf16 %v676_v7, %v638_v63  ;;  %v837_v34 = vpack.c.bf16 %v677_v22, %v639_v28 }
 0x221   :  { %v649_v23 = vsel %vm186_vm6, %v646_v51, %v648_v20  ;;  %v652_v24 = vsel %vm186_vm6, %v648_v20, %v642_v47  ;;  %v532_v25 = vpop.permute.xlu0 %531 }
 0x222   :  { %v675_v29 = vmul.f32 %v658_v61, %v652_v24  ;;  %v678_v30 = vmul.f32 %v670_v13, %v649_v23  ;;  %883 = vmatprep.subr.bf16.mxu0 %v836_v21 }
 0x224   :  { %v835_v31 = vpack.c.bf16 %v675_v29, %v637_v26  ;;  %v530_v32 = vpop.permute.xlu1 %529  ;;  %v838_v33 = vpack.c.bf16 %v678_v30, %v640_v27 }
 0x225   :  { %v566_v36 = vpop.permute.xlu0 %565  ;;  %v537_v41 = vsel %vm67_vm7, %v528_v60, %v530_v32  ;;  %v536_v52 = vsel %vm67_vm7, %v530_v32, %v532_v25 }
 0x226   :  { %884 = vmatpush1.bf16.msra.mxu0 %v835_v31  ;;  %924 = vmatprep.subr.bf16.mxu1 %v838_v33  ;;  %v562_v45 = vmul.f32 %v548_v39, %v537_v41  ;;  %v563_v5 = vmul.f32 %v552_v49, %v536_v52  ;;  %v1266_v39 = vrot.slane %v3158_v35, %v3435_v10 }
 0x227   :  { %925 = vmatpush1.bf16.msra.mxu1 %v837_v34  ;;  %v3151_v34 = vld [vmem:[%s4716_s3 + $0x10] sm:$0xff] }
 0x228   :  { %v534_v38 = vpop.permute.xlu1 %533 }
 0x229   :  { %v570_v3 = vpop.permute.xlu0 %569  ;;  %v535_v50 = vsel %vm67_vm7, %v532_v25, %v534_v38  ;;  %v538_v51 = vsel %vm67_vm7, %v534_v38, %v528_v60 }
 0x22a   :  { %v561_v58 = vmul.f32 %v544_v42, %v538_v51  ;;  %v564_v59 = vmul.f32 %v556_v44, %v535_v50  ;;  %v1274_v44 = vrot.slane %v3158_v35, %v3439_v12 }
 0x22c   :  { %v568_v43 = vpop.permute.xlu1 %567 }
 0x22d   :  { %v575_v0 = vsel %vm106_vm8, %v566_v36, %v568_v43  ;;  %v574_v46 = vsel %vm106_vm8, %v568_v43, %v570_v3  ;;  %v1270_v43 = vrot.slane %v3158_v35, %v3437_v11  ;;  %v3155_v35 = vld [vmem:[%s4717_s8 + $0x5] ss:$8 sm:$0xf] }
 0x22e   :  { %v600_v47 = vmul.f32 %v586_v40, %v575_v0  ;;  %v601_v55 = vmul.f32 %v590_v2, %v574_v46 }
 0x230   :  { %v572_v53 = vpop.permute.xlu1 %571  ;;  %v832_v54 = vpack.c.bf16 %v600_v47, %v562_v45  ;;  %v833_v13 = vpack.c.bf16 %v601_v55, %v563_v5 }
 0x231   :  { %v573_v56 = vsel %vm106_vm8, %v570_v3, %v572_v53  ;;  %v576_v57 = vsel %vm106_vm8, %v572_v53, %v566_v36 }
 0x232   :  { %v599_v61 = vmul.f32 %v582_v1, %v576_v57  ;;  %v602_v63 = vmul.f32 %v594_v48, %v573_v56  ;;  %885 = vmatprep.subr.bf16.mxu0 %v832_v54 }
 0x234   :  { %v831_v7 = vpack.c.bf16 %v599_v61, %v561_v58  ;;  %v834_v60 = vpack.c.bf16 %v602_v63, %v564_v59  ;;  %v3157_v58 = vld [vmem:[%s4717_s8 + $0x7] ss:$8 sm:$0xf]  ;;  %v3156_v59 = vld [vmem:[%s4717_s8 + $0x6] ss:$8 sm:$0xf] }
 0x235   :  { %v1224_v63 = vrot.slane %v3157_v58, %v3433_v9  ;;  %v1186_v5 = vrot.slane %v3156_v59, %v3433_v9 }
 0x236   :  { %886 = vmatpush1.bf16.msra.mxu0 %v831_v7  ;;  %926 = vmatprep.subr.bf16.mxu1 %v834_v60  ;;  %v854_v16 = vpop.permute.xlu0 %853  ;;  %v1190_v7 = vrot.slane %v3156_v59, %v3435_v10 }
 0x237   :  { %927 = vmatpush1.bf16.msra.mxu1 %v833_v13  ;;  %v1228_v13 = vrot.slane %v3157_v58, %v3435_v10 }
 0x239   :  { %3145 = vmatmul.mubr.msk.bf16.vlgmr.msra.gmra.mxu0 %vm403_vm9, %v524_v14 }
 0x23a   :  { %3147 = vmatmul.mubr.msk.bf16.vlgmr.msra.gmra.mxu1 %vm403_vm9, %v524_v14  ;;  %1355 = vmatprep.mubr.bf16.mxu0 %v3288_v4 }
 0x23b   :  { %1396 = vmatprep.mubr.bf16.mxu1 %v3288_v4 }
 0x2f9   :  { %v905_v17 = vpop.f32.mrf.mxu0 }
 0x2fa   :  { %v906_v19 = vadd.f32 %v905_v17, %v854_v16  ;;  %v946_v20 = vpop.f32.mrf.mxu1  ;;  %v1198_v17 = vrot.slane %v3156_v59, %v3439_v12 }
 0x2fb   :  { %v907_v21 = vpop.f32.mrf.mxu0  ;;  %v947_v23 = vadd.f32 %v946_v20, %v854_v16 }
 0x2fc   :  { %v3794_v22 = vmax.f32 %v906_v19, 0.0  ;;  %v908_v24 = vadd.f32 %v907_v21, %v854_v16  ;;  %v948_v25 = vpop.f32.mrf.mxu1 }
 0x2fd   :  { %v909_v26 = vpop.f32.mrf.mxu0  ;;  %v949_v29 = vadd.f32 %v948_v25, %v854_v16  ;;  %v3800_v31 = vmax.f32 %v947_v23, 0.0  ;;  %v1194_v16 = vrot.slane %v3156_v59, %v3437_v11  ;;  %v1236_v25 = vrot.slane %v3157_v58, %v3439_v12 }
 0x2fe   :  { %v3796_v27 = vmax.f32 %v908_v24, 0.0  ;;  %1245 = vrot.lane.b32.xlu1 %v3794_v22, %s3281_s13  ;;  %v950_v30 = vpop.f32.mrf.mxu1  ;;  %v1232_v24 = vrot.slane %v3157_v58, %v3437_v11 }
 0x2ff   :  { %v910_v28 = vpop.f32.mrf.mxu0  ;;  %v3804_v33 = vmax.f32 %v949_v29, 0.0 }
 0x300   :  { %1247 = vrot.lane.b32.xlu0 %v3796_v27, %s3281_s13  ;;  %v951_v32 = vpop.f32.mrf.mxu1 }
 0x302   :  { %1249 = vrot.lane.b32.xlu1 %v3800_v31, %s3281_s13 }
 0x304   :  { %1251 = vrot.lane.b32.xlu0 %v3804_v33, %s3281_s13 }
 0x306   :  { %1169 = vrot.lane.b32.xlu1 %v3794_v22, %s3282_s18 }
 0x308   :  { %1171 = vrot.lane.b32.xlu0 %v3796_v27, %s3282_s18 }
 0x30a   :  { %1173 = vrot.lane.b32.xlu1 %v3800_v31, %s3282_s18 }
 0x30c   :  { %1175 = vrot.lane.b32.xlu0 %v3804_v33, %s3282_s18 }
 0x30e   :  { %1207 = vrot.lane.b32.xlu1 %v3794_v22, %s3283_s19 }
 0x310   :  { %1209 = vrot.lane.b32.xlu0 %v3796_v27, %s3283_s19 }
 0x312   :  { %1211 = vrot.lane.b32.xlu1 %v3800_v31, %s3283_s19 }
 0x314   :  { %1213 = vrot.lane.b32.xlu0 %v3804_v33, %s3283_s19 }
 0x316   :  { %1131 = vrot.lane.b32.xlu1 %v3794_v22, %s3284_s20 }
 0x318   :  { %1133 = vrot.lane.b32.xlu0 %v3796_v27, %s3284_s20 }
 0x31a   :  { %1135 = vrot.lane.b32.xlu1 %v3800_v31, %s3284_s20 }
 0x31c   :  { %1137 = vrot.lane.b32.xlu0 %v3804_v33, %s3284_s20 }
 0x31e   :  { %1055 = vrot.lane.b32.xlu1 %v3794_v22, %s3285_s21 }
 0x320   :  { %1057 = vrot.lane.b32.xlu0 %v3796_v27, %s3285_s21 }
 0x322   :  { %1059 = vrot.lane.b32.xlu1 %v3800_v31, %s3285_s21 }
 0x324   :  { %1061 = vrot.lane.b32.xlu0 %v3804_v33, %s3285_s21 }
 0x326   :  { %1093 = vrot.lane.b32.xlu1 %v3794_v22, %s3286_s22 }
 0x328   :  { %1095 = vrot.lane.b32.xlu0 %v3796_v27, %s3286_s22 }
 0x32a   :  { %1097 = vrot.lane.b32.xlu1 %v3800_v31, %s3286_s22 }
 0x32c   :  { %1099 = vrot.lane.b32.xlu0 %v3804_v33, %s3286_s22 }
 0x32e   :  { %979 = vrot.lane.b32.xlu1 %v3794_v22, %s3287_s23 }
 0x330   :  { %981 = vrot.lane.b32.xlu0 %v3796_v27, %s3287_s23 }
 0x332   :  { %983 = vrot.lane.b32.xlu1 %v3800_v31, %s3287_s23 }
 0x334   :  { %985 = vrot.lane.b32.xlu0 %v3804_v33, %s3287_s23 }
 0x336   :  { %1017 = vrot.lane.b32.xlu1 %v3794_v22, %s3289_s24 }
 0x338   :  { %1019 = vrot.lane.b32.xlu0 %v3796_v27, %s3289_s24 }
 0x33a   :  { %1021 = vrot.lane.b32.xlu1 %v3800_v31, %s3289_s24 }
 0x33c   :  { %1023 = vrot.lane.b32.xlu0 %v3804_v33, %s3289_s24 }
 0x33e   :  { %1305 = vperm.xlu1 %3275, %v3151_v34  }
 0x370   :  { %v1246_v36 = vpop.permute.xlu1 %1245 }
 0x372   :  { %v1248_v38 = vpop.permute.xlu0 %1247 }
 0x373   :  { %v1255_v40 = vsel %vm346_vm0, %v1246_v36, %v1248_v38 }
 0x374   :  { %v1279_v41 = vmul.f32 %v1262_v37, %v1255_v40  ;;  %v1250_v42 = vpop.permute.xlu1 %1249 }
 0x375   :  { %v1254_v3 = vsel %vm346_vm0, %v1248_v38, %v1250_v42 }
 0x376   :  { %v1299_v2 = vpack.c.bf16 %v1279_v41, %v1279_v41  ;;  %v1280_v0 = vmul.f32 %v1266_v39, %v1254_v3  ;;  %v1252_v1 = vpop.permute.xlu0 %1251 }
 0x377   :  { %v1253_v45 = vsel %vm346_vm0, %v1250_v42, %v1252_v1  ;;  %v1256_v46 = vsel %vm346_vm0, %v1252_v1, %v1246_v36 }
 0x378   :  { %v1300_v47 = vpack.c.bf16 %v1280_v0, %v1280_v0  ;;  %v1281_v48 = vmul.f32 %v1270_v43, %v1253_v45  ;;  %v1282_v49 = vmul.f32 %v1274_v44, %v1256_v46  ;;  %v1170_v50 = vpop.permute.xlu1 %1169  ;;  %v1312_v54 = vsel %vm407_vm1, %v1299_v2, 0 }
 0x379   :  { %v1148_v2 = vrot.slane %v3155_v35, %v3433_v9  ;;  %v1152_v46 = vrot.slane %v3155_v35, %v3435_v10 }
 0x37a   :  { %v1301_v51 = vpack.c.bf16 %v1281_v48, %v1281_v48  ;;  %v1302_v52 = vpack.c.bf16 %v1282_v49, %v1282_v49  ;;  %v1172_v53 = vpop.permute.xlu0 %1171  ;;  %3159 = vmatprep.subr.msk.bf16.mxu0 %vm407_vm1, %v1300_v47  ;;  %v1156_v49 = vrot.slane %v3155_v35, %v3437_v11 }
 0x37b   :  { %1330 = vmatpush1.bf16.msra.mxu0 %v1312_v54  ;;  %v1179_v20 = vsel %vm266_vm3, %v1170_v50, %v1172_v53 }
 0x37c   :  { %3161 = vmatprep.subr.msk.bf16.mxu1 %vm407_vm1, %v1302_v52  ;;  %v1174_v55 = vpop.permute.xlu1 %1173  ;;  %v1318_v56 = vsel %vm407_vm1, %v1301_v51, 0  ;;  %v1203_v36 = vmul.f32 %v1186_v5, %v1179_v20 }
 0x37d   :  { %1371 = vmatpush1.bf16.msra.mxu1 %v1318_v56  ;;  %v1178_v14 = vsel %vm266_vm3, %v1172_v53, %v1174_v55 }
 0x37e   :  { %v1176_v57 = vpop.permute.xlu0 %1175  ;;  %v1204_v28 = vmul.f32 %v1190_v7, %v1178_v14  ;;  %v3153_v14 = vld [vmem:[%s4717_s8 + $0x2] ss:$8 sm:$0xf] }
 0x37f   :  { %v1177_v21 = vsel %vm266_vm3, %v1174_v55, %v1176_v57  ;;  %v1180_v26 = vsel %vm266_vm3, %v1176_v57, %v1170_v50  ;;  %v1160_v50 = vrot.slane %v3155_v35, %v3439_v12 }
 0x380   :  { %v1208_v61 = vpop.permute.xlu1 %1207  ;;  %v1205_v37 = vmul.f32 %v1194_v16, %v1177_v21  ;;  %v1206_v40 = vmul.f32 %v1198_v17, %v1180_v26  ;;  %v3154_v16 = vld [vmem:[%s4717_s8 + $0x3] ss:$8 sm:$0xf]  ;;  %v1084_v26 = vrot.slane %v3153_v14, %v3439_v12 }
 0x381   :  { %v1114_v21 = vrot.slane %v3154_v16, %v3435_v10  ;;  %v1110_v35 = vrot.slane %v3154_v16, %v3433_v9 }
 0x382   :  { %v1210_v60 = vpop.permute.xlu0 %1209 }
 0x383   :  { %v1217_v19 = vsel %vm306_vm2, %v1208_v61, %v1210_v60 }
 0x384   :  { %v1212_v23 = vpop.permute.xlu1 %1211  ;;  %v1241_v29 = vmul.f32 %v1224_v63, %v1217_v19  ;;  %v1076_v19 = vrot.slane %v3153_v14, %v3435_v10 }
 0x385   :  { %v1216_v30 = vsel %vm306_vm2, %v1210_v60, %v1212_v23 }
 0x386   :  { %v1242_v32 = vmul.f32 %v1228_v13, %v1216_v30  ;;  %v1214_v34 = vpop.permute.xlu0 %1213  ;;  %v1295_v3 = vpack.c.bf16 %v1241_v29, %v1203_v36  ;;  %v1118_v30 = vrot.slane %v3154_v16, %v3437_v11  ;;  %v1122_v36 = vrot.slane %v3154_v16, %v3439_v12 }
 0x387   :  { %v1215_v38 = vsel %vm306_vm2, %v1212_v23, %v1214_v34  ;;  %v1218_v39 = vsel %vm306_vm2, %v1214_v34, %v1208_v61 }
 0x388   :  { %v1243_v41 = vmul.f32 %v1232_v24, %v1215_v38  ;;  %v1244_v42 = vmul.f32 %v1236_v25, %v1218_v39  ;;  %v1132_v43 = vpop.permute.xlu1 %1131  ;;  %v1296_v44 = vpack.c.bf16 %v1242_v32, %v1204_v28  ;;  %v1072_v25 = vrot.slane %v3153_v14, %v3433_v9 }
 0x38a   :  { %v1297_v0 = vpack.c.bf16 %v1243_v41, %v1205_v37  ;;  %v1134_v1 = vpop.permute.xlu0 %1133  ;;  %1331 = vmatprep.subr.bf16.mxu0 %v1296_v44  ;;  %v1298_v45 = vpack.c.bf16 %v1244_v42, %v1206_v40  ;;  %v1080_v37 = vrot.slane %v3153_v14, %v3437_v11 }
 0x38b   :  { %v1141_v47 = vsel %vm226_vm4, %v1132_v43, %v1134_v1  ;;  %1332 = vmatpush1.bf16.msra.mxu0 %v1295_v3 }
 0x38c   :  { %1372 = vmatprep.subr.bf16.mxu1 %v1298_v45  ;;  %v1136_v48 = vpop.permute.xlu1 %1135  ;;  %v1165_v51 = vmul.f32 %v1148_v2, %v1141_v47 }
 0x38d   :  { %v1140_v52 = vsel %vm226_vm4, %v1134_v1, %v1136_v48  ;;  %1373 = vmatpush1.bf16.msra.mxu1 %v1297_v0 }
 0x38e   :  { %v1166_v53 = vmul.f32 %v1152_v46, %v1140_v52  ;;  %v1138_v54 = vpop.permute.xlu0 %1137  ;;  %v1291_v63 = vpack.c.bf16 %v1165_v51, %v3794_v22 }
 0x38f   :  { %v1139_v55 = vsel %vm226_vm4, %v1136_v48, %v1138_v54  ;;  %v1142_v56 = vsel %vm226_vm4, %v1138_v54, %v1132_v43  ;;  %v991_v54 = vld [vmem:[%s4717_s8] ss:$8 sm:$0xf] }
 0x390   :  { %v1167_v57 = vmul.f32 %v1156_v49, %v1139_v55  ;;  %v1168_v58 = vmul.f32 %v1160_v50, %v1142_v56  ;;  %v1056_v59 = vpop.permute.xlu1 %1055  ;;  %v1292_v61 = vpack.c.bf16 %v1166_v53, %v3796_v27  ;;  %v3152_v55 = vld [vmem:[%s4717_s8 + $0x1] ss:$8 sm:$0xf] }
 0x392   :  { %v1293_v5 = vpack.c.bf16 %v1167_v57, %v3800_v31  ;;  %v1058_v7 = vpop.permute.xlu0 %1057  ;;  %1333 = vmatprep.subr.bf16.mxu0 %v1292_v61  ;;  %v1294_v60 = vpack.c.bf16 %v1168_v58, %v3804_v33  ;;  %v1000_v57 = vrot.slane %v991_v54, %v3435_v10 }
 0x393   :  { %1334 = vmatpush1.bf16.msra.mxu0 %v1291_v63  ;;  %v1065_v23 = vsel %vm146_vm5, %v1056_v59, %v1058_v7 }
 0x394   :  { %1374 = vmatprep.subr.bf16.mxu1 %v1294_v60  ;;  %v1060_v13 = vpop.permute.xlu1 %1059  ;;  %v1090_v28 = vmul.f32 %v1076_v19, %v1065_v23  ;;  %v1034_v19 = vrot.slane %v3152_v55, %v3433_v9 }
 0x395   :  { %1375 = vmatpush1.bf16.msra.mxu1 %v1293_v5  ;;  %v1064_v41 = vsel %vm146_vm5, %v1058_v7, %v1060_v13  ;;  %v996_v5 = vrot.slane %v991_v54, %v3433_v9  ;;  %v1008_v7 = vrot.slane %v991_v54, %v3439_v12 }
 0x396   :  { %v1062_v17 = vpop.permute.xlu0 %1061  ;;  %v1091_v48 = vmul.f32 %v1080_v37, %v1064_v41 }
 0x397   :  { %v1063_v38 = vsel %vm146_vm5, %v1060_v13, %v1062_v17  ;;  %v1066_v39 = vsel %vm146_vm5, %v1062_v17, %v1056_v59  ;;  %v1038_v59 = vrot.slane %v3152_v55, %v3435_v10  ;;  %v1042_v13 = vrot.slane %v3152_v55, %v3437_v11 }
 0x398   :  { %v1094_v20 = vpop.permute.xlu1 %1093  ;;  %v1089_v0 = vmul.f32 %v1072_v25, %v1066_v39  ;;  %v1092_v1 = vmul.f32 %v1084_v26, %v1063_v38 }
 0x39a   :  { %v1096_v24 = vpop.permute.xlu0 %1095 }
 0x39b   :  { %v1103_v29 = vsel %vm186_vm6, %v1094_v20, %v1096_v24 }
 0x39c   :  { %v1128_v32 = vmul.f32 %v1114_v21, %v1103_v29  ;;  %v1098_v34 = vpop.permute.xlu1 %1097  ;;  %v1004_v21 = vrot.slane %v991_v54, %v3437_v11 }
 0x39d   :  { %v1102_v40 = vsel %vm186_vm6, %v1096_v24, %v1098_v34 }
 0x39e   :  { %v1100_v42 = vpop.permute.xlu0 %1099  ;;  %v1288_v43 = vpack.c.bf16 %v1128_v32, %v1090_v28  ;;  %v1129_v44 = vmul.f32 %v1118_v30, %v1102_v40 }
 0x39f   :  { %v1101_v3 = vsel %vm186_vm6, %v1098_v34, %v1100_v42  ;;  %v1104_v2 = vsel %vm186_vm6, %v1100_v42, %v1094_v20  ;;  %v1046_v20 = vrot.slane %v3152_v55, %v3439_v12 }
 0x3a0   :  { %v1127_v45 = vmul.f32 %v1110_v35, %v1104_v2  ;;  %v1130_v46 = vmul.f32 %v1122_v36, %v1101_v3  ;;  %1335 = vmatprep.subr.bf16.mxu0 %v1288_v43  ;;  %v980_v47 = vpop.permute.xlu1 %979  ;;  %v1289_v52 = vpack.c.bf16 %v1129_v44, %v1091_v48  ;;  %v3150_v43 = vld [vmem:[%s4719_s2 + $0x4] sm:$0xf] }
 0x3a2   :  { %v1287_v49 = vpack.c.bf16 %v1127_v45, %v1089_v0  ;;  %v982_v50 = vpop.permute.xlu0 %981  ;;  %v1290_v51 = vpack.c.bf16 %v1130_v46, %v1092_v1 }
 0x3a3   :  { %v989_v61 = vsel %vm67_vm7, %v980_v47, %v982_v50 }
 0x3a4   :  { %1336 = vmatpush1.bf16.msra.mxu0 %v1287_v49  ;;  %1376 = vmatprep.subr.bf16.mxu1 %v1290_v51  ;;  %v984_v53 = vpop.permute.xlu1 %983  ;;  %v1014_v14 = vmul.f32 %v1000_v57, %v989_v61  ;;  %v3166_v57 = vld [vmem:[%s4716_s3 + $0x18] sm:$0xff] }
 0x3a5   :  { %1377 = vmatpush1.bf16.msra.mxu1 %v1289_v52  ;;  %v988_v26 = vsel %vm67_vm7, %v982_v50, %v984_v53 }
 0x3a6   :  { %v986_v56 = vpop.permute.xlu0 %985  ;;  %v1015_v39 = vmul.f32 %v1004_v21, %v988_v26 }
 0x3a7   :  { %v987_v23 = vsel %vm67_vm7, %v984_v53, %v986_v56  ;;  %v990_v24 = vsel %vm67_vm7, %v986_v56, %v980_v47 }
 0x3a8   :  { %v1018_v58 = vpop.permute.xlu1 %1017  ;;  %v1013_v35 = vmul.f32 %v996_v5, %v990_v24  ;;  %v1016_v36 = vmul.f32 %v1008_v7, %v987_v23 }
 0x3aa   :  { %v1020_v63 = vpop.permute.xlu0 %1019 }
 0x3ab   :  { %v1027_v60 = vsel %vm106_vm8, %v1018_v58, %v1020_v63 }
 0x3ac   :  { %v1052_v16 = vmul.f32 %v1038_v59, %v1027_v60  ;;  %v1022_v17 = vpop.permute.xlu1 %1021 }
 0x3ad   :  { %v1026_v25 = vsel %vm106_vm8, %v1020_v63, %v1022_v17 }
 0x3ae   :  { %v1024_v29 = vpop.permute.xlu0 %1023  ;;  %v1284_v30 = vpack.c.bf16 %v1052_v16, %v1014_v14  ;;  %v1053_v28 = vmul.f32 %v1042_v13, %v1026_v25 }
 0x3af   :  { %v1025_v32 = vsel %vm106_vm8, %v1022_v17, %v1024_v29  ;;  %v1028_v34 = vsel %vm106_vm8, %v1024_v29, %v1018_v58  ;;  %v3173_v58 = vld [vmem:[%s4717_s8 + $0x20] ss:$8 sm:$0xf] }
 0x3b0   :  { %v1051_v37 = vmul.f32 %v1034_v19, %v1028_v34  ;;  %v1054_v38 = vmul.f32 %v1046_v20, %v1025_v32  ;;  %1337 = vmatprep.subr.bf16.mxu0 %v1284_v30  ;;  %v1285_v42 = vpack.c.bf16 %v1053_v28, %v1015_v39  ;;  %v1714_v61 = vrot.slane %v3173_v58, %v3433_v9  ;;  %v3172_v39 = vld [vmem:[%s4717_s8 + $0x7] ss:$8 sm:$0xf] }
 0x3b1   :  { %v1718_v5 = vrot.slane %v3173_v58, %v3435_v10  ;;  %v1722_v14 = vrot.slane %v3173_v58, %v3437_v11  ;;  %v1726_v16 = vrot.slane %v3173_v58, %v3439_v12 }
 0x3b2   :  { %v1283_v40 = vpack.c.bf16 %v1051_v37, %v1013_v35  ;;  %v1286_v41 = vpack.c.bf16 %v1054_v38, %v1016_v36 }
 0x3b4   :  { %1338 = vmatpush1.bf16.msra.mxu0 %v1283_v40  ;;  %1378 = vmatprep.subr.bf16.mxu1 %v1286_v41  ;;  %v3171_v40 = vld [vmem:[%s4717_s8 + $0x6] ss:$8 sm:$0xf] }
 0x3b5   :  { %1379 = vmatpush1.bf16.msra.mxu1 %v1285_v42  ;;  %v1676_v42 = vrot.slane %v3172_v39, %v3433_v9 }
 0x3b7   :  { %3160 = vmatmul.mubr.msk.bf16.vlgmr.msra.gmra.mxu0 %vm403_vm9, %v3150_v43 }
 0x3b8   :  { %3162 = vmatmul.mubr.msk.bf16.vlgmr.msra.gmra.mxu1 %vm403_vm9, %v3150_v43  ;;  %1807 = vmatprep.mubr.bf16.mxu0 %v3288_v4  ;;  %v1638_v43 = vrot.slane %v3171_v40, %v3433_v9 }
 0x3b9   :  { %1848 = vmatprep.mubr.bf16.mxu1 %v3288_v4  ;;  %v1306_v44 = vpop.permute.xlu1 %1305 }
 0x477   :  { %v1357_v3 = vpop.f32.mrf.mxu0 }
 0x478   :  { %v1358_v2 = vadd.f32 %v1357_v3, %v1306_v44  ;;  %v1398_v0 = vpop.f32.mrf.mxu1 }
 0x479   :  { %v1359_v1 = vpop.f32.mrf.mxu0  ;;  %v1399_v46 = vadd.f32 %v1398_v0, %v1306_v44 }
 0x47a   :  { %v4004_v45 = vmax.f32 %v1358_v2, 0.0  ;;  %v1360_v47 = vadd.f32 %v1359_v1, %v1306_v44  ;;  %v1400_v48 = vpop.f32.mrf.mxu1  ;;  %v1680_v2 = vrot.slane %v3172_v39, %v3435_v10  ;;  %v1646_v1 = vrot.slane %v3171_v40, %v3437_v11 }
 0x47b   :  { %v1361_v49 = vpop.f32.mrf.mxu0  ;;  %v1401_v51 = vadd.f32 %v1400_v48, %v1306_v44  ;;  %v4010_v54 = vmax.f32 %v1399_v46, 0.0  ;;  %v1642_v44 = vrot.slane %v3171_v40, %v3435_v10  ;;  %v1650_v46 = vrot.slane %v3171_v40, %v3439_v12 }
 0x47c   :  { %v4006_v50 = vmax.f32 %v1360_v47, 0.0  ;;  %v1402_v52 = vpop.f32.mrf.mxu1  ;;  %1697 = vrot.lane.b32.xlu0 %v4004_v45, %s3281_s13 }
 0x47d   :  { %v1362_v53 = vpop.f32.mrf.mxu0  ;;  %v4014_v56 = vmax.f32 %v1401_v51, 0.0  ;;  %v1684_v52 = vrot.slane %v3172_v39, %v3437_v11 }
 0x47e   :  { %v1403_v55 = vpop.f32.mrf.mxu1  ;;  %1699 = vrot.lane.b32.xlu1 %v4006_v50, %s3281_s13  ;;  %v1688_v53 = vrot.slane %v3172_v39, %v3439_v12 }
 0x480   :  { %1701 = vrot.lane.b32.xlu0 %v4010_v54, %s3281_s13 }
 0x482   :  { %1703 = vrot.lane.b32.xlu1 %v4014_v56, %s3281_s13 }
 0x484   :  { %1621 = vrot.lane.b32.xlu0 %v4004_v45, %s3282_s18 }
 0x486   :  { %1623 = vrot.lane.b32.xlu1 %v4006_v50, %s3282_s18 }
 0x488   :  { %1625 = vrot.lane.b32.xlu0 %v4010_v54, %s3282_s18 }
 0x48a   :  { %1627 = vrot.lane.b32.xlu1 %v4014_v56, %s3282_s18 }
 0x48c   :  { %1659 = vrot.lane.b32.xlu0 %v4004_v45, %s3283_s19 }
 0x48e   :  { %1661 = vrot.lane.b32.xlu1 %v4006_v50, %s3283_s19 }
 0x490   :  { %1663 = vrot.lane.b32.xlu0 %v4010_v54, %s3283_s19 }
 0x492   :  { %1665 = vrot.lane.b32.xlu1 %v4014_v56, %s3283_s19 }
 0x494   :  { %1583 = vrot.lane.b32.xlu0 %v4004_v45, %s3284_s20 }
 0x496   :  { %1585 = vrot.lane.b32.xlu1 %v4006_v50, %s3284_s20 }
 0x498   :  { %1587 = vrot.lane.b32.xlu0 %v4010_v54, %s3284_s20 }
 0x49a   :  { %1589 = vrot.lane.b32.xlu1 %v4014_v56, %s3284_s20 }
 0x49c   :  { %1507 = vrot.lane.b32.xlu0 %v4004_v45, %s3285_s21 }
 0x49e   :  { %1509 = vrot.lane.b32.xlu1 %v4006_v50, %s3285_s21 }
 0x4a0   :  { %1511 = vrot.lane.b32.xlu0 %v4010_v54, %s3285_s21 }
 0x4a2   :  { %1513 = vrot.lane.b32.xlu1 %v4014_v56, %s3285_s21 }
 0x4a4   :  { %1545 = vrot.lane.b32.xlu0 %v4004_v45, %s3286_s22 }
 0x4a6   :  { %1547 = vrot.lane.b32.xlu1 %v4006_v50, %s3286_s22 }
 0x4a8   :  { %1549 = vrot.lane.b32.xlu0 %v4010_v54, %s3286_s22 }
 0x4aa   :  { %1551 = vrot.lane.b32.xlu1 %v4014_v56, %s3286_s22 }
 0x4ac   :  { %1431 = vrot.lane.b32.xlu0 %v4004_v45, %s3287_s23 }
 0x4ae   :  { %1433 = vrot.lane.b32.xlu1 %v4006_v50, %s3287_s23 }
 0x4b0   :  { %1435 = vrot.lane.b32.xlu0 %v4010_v54, %s3287_s23 }
 0x4b2   :  { %1437 = vrot.lane.b32.xlu1 %v4014_v56, %s3287_s23 }
 0x4b4   :  { %1469 = vrot.lane.b32.xlu0 %v4004_v45, %s3289_s24 }
 0x4b6   :  { %1471 = vrot.lane.b32.xlu1 %v4006_v50, %s3289_s24 }
 0x4b8   :  { %1473 = vrot.lane.b32.xlu0 %v4010_v54, %s3289_s24 }
 0x4ba   :  { %1475 = vrot.lane.b32.xlu1 %v4014_v56, %s3289_s24 }
 0x4bc   :  { %1757 = vperm.xlu0 %3274, %v3166_v57  }
 0x4ee   :  { %v1698_v59 = vpop.permute.xlu0 %1697 }
 0x4f0   :  { %v1700_v63 = vpop.permute.xlu1 %1699 }
 0x4f1   :  { %v1707_v7 = vsel %vm346_vm0, %v1698_v59, %v1700_v63 }
 0x4f2   :  { %v1731_v60 = vmul.f32 %v1714_v61, %v1707_v7  ;;  %v1702_v13 = vpop.permute.xlu0 %1701 }
 0x4f3   :  { %v1706_v17 = vsel %vm346_vm0, %v1700_v63, %v1702_v13 }
 0x4f4   :  { %v1751_v19 = vpack.c.bf16 %v1731_v60, %v1731_v60  ;;  %v1732_v20 = vmul.f32 %v1718_v5, %v1706_v17  ;;  %v1704_v21 = vpop.permute.xlu1 %1703  ;;  %v3170_v5 = vld [vmem:[%s4717_s8 + $0x5] ss:$8 sm:$0xf] }
 0x4f5   :  { %v1705_v23 = vsel %vm346_vm0, %v1702_v13, %v1704_v21  ;;  %v1708_v24 = vsel %vm346_vm0, %v1704_v21, %v1698_v59 }
 0x4f6   :  { %v1752_v25 = vpack.c.bf16 %v1732_v20, %v1732_v20  ;;  %v1733_v26 = vmul.f32 %v1722_v14, %v1705_v23  ;;  %v1734_v29 = vmul.f32 %v1726_v16, %v1708_v24  ;;  %v1622_v30 = vpop.permute.xlu0 %1621  ;;  %v1764_v35 = vsel %vm407_vm1, %v1751_v19, 0 }
 0x4f7   :  { %v1600_v24 = vrot.slane %v3170_v5, %v3433_v9 }
 0x4f8   :  { %v1753_v28 = vpack.c.bf16 %v1733_v26, %v1733_v26  ;;  %v1754_v32 = vpack.c.bf16 %v1734_v29, %v1734_v29  ;;  %v1624_v34 = vpop.permute.xlu1 %1623  ;;  %3174 = vmatprep.subr.msk.bf16.mxu0 %vm407_vm1, %v1752_v25 }
 0x4f9   :  { %1782 = vmatpush1.bf16.msra.mxu0 %v1764_v35  ;;  %v1631_v48 = vsel %vm266_vm3, %v1622_v30, %v1624_v34  ;;  %v1612_v35 = vrot.slane %v3170_v5, %v3439_v12 }
 0x4fa   :  { %3176 = vmatprep.subr.msk.bf16.mxu1 %vm407_vm1, %v1754_v32  ;;  %v1626_v36 = vpop.permute.xlu0 %1625  ;;  %v1770_v37 = vsel %vm407_vm1, %v1753_v28, 0  ;;  %v1655_v7 = vmul.f32 %v1638_v43, %v1631_v48  ;;  %v3168_v48 = vld [vmem:[%s4717_s8 + $0x2] ss:$8 sm:$0xf] }
 0x4fb   :  { %1823 = vmatpush1.bf16.msra.mxu1 %v1770_v37  ;;  %v1630_v0 = vsel %vm266_vm3, %v1624_v34, %v1626_v36  ;;  %v1608_v34 = vrot.slane %v3170_v5, %v3437_v11 }
 0x4fc   :  { %v1628_v38 = vpop.permute.xlu1 %1627  ;;  %v1656_v59 = vmul.f32 %v1642_v44, %v1630_v0 }
 0x4fd   :  { %v1629_v49 = vsel %vm266_vm3, %v1626_v36, %v1628_v38  ;;  %v1632_v55 = vsel %vm266_vm3, %v1628_v38, %v1622_v30  ;;  %v1604_v30 = vrot.slane %v3170_v5, %v3435_v10 }
 0x4fe   :  { %v1660_v41 = vpop.permute.xlu0 %1659  ;;  %v1657_v60 = vmul.f32 %v1646_v1, %v1629_v49  ;;  %v1658_v16 = vmul.f32 %v1650_v46, %v1632_v55  ;;  %v3169_v49 = vld [vmem:[%s4717_s8 + $0x3] ss:$8 sm:$0xf] }
 0x4ff   :  { %v1566_v55 = vrot.slane %v3169_v49, %v3435_v10  ;;  %v1570_v5 = vrot.slane %v3169_v49, %v3437_v11 }
 0x500   :  { %v1662_v3 = vpop.permute.xlu1 %1661 }
 0x501   :  { %v1669_v47 = vsel %vm306_vm2, %v1660_v41, %v1662_v3 }
 0x502   :  { %v1664_v51 = vpop.permute.xlu0 %1663  ;;  %v1693_v57 = vmul.f32 %v1676_v42, %v1669_v47 }
 0x503   :  { %v1668_v58 = vsel %vm306_vm2, %v1662_v3, %v1664_v51 }
 0x504   :  { %v1694_v61 = vmul.f32 %v1680_v2, %v1668_v58  ;;  %v1666_v63 = vpop.permute.xlu1 %1665  ;;  %v1747_v23 = vpack.c.bf16 %v1693_v57, %v1655_v7 }
 0x505   :  { %v1667_v13 = vsel %vm306_vm2, %v1664_v51, %v1666_v63  ;;  %v1670_v14 = vsel %vm306_vm2, %v1666_v63, %v1660_v41 }
 0x506   :  { %v1695_v17 = vmul.f32 %v1684_v52, %v1667_v13  ;;  %v1696_v19 = vmul.f32 %v1688_v53, %v1670_v14  ;;  %v1584_v20 = vpop.permute.xlu0 %1583  ;;  %v1748_v21 = vpack.c.bf16 %v1694_v61, %v1656_v59  ;;  %v1528_v52 = vrot.slane %v3168_v48, %v3435_v10 }
 0x507   :  { %v1524_v59 = vrot.slane %v3168_v48, %v3433_v9  ;;  %v1536_v61 = vrot.slane %v3168_v48, %v3439_v12  ;;  %v1562_v14 = vrot.slane %v3169_v49, %v3433_v9 }
 0x508   :  { %v1749_v25 = vpack.c.bf16 %v1695_v17, %v1657_v60  ;;  %v1586_v26 = vpop.permute.xlu1 %1585  ;;  %1783 = vmatprep.subr.bf16.mxu0 %v1748_v21  ;;  %v1750_v29 = vpack.c.bf16 %v1696_v19, %v1658_v16  ;;  %v1574_v16 = vrot.slane %v3169_v49, %v3439_v12  ;;  %v1532_v17 = vrot.slane %v3168_v48, %v3437_v11 }
 0x509   :  { %v1593_v28 = vsel %vm226_vm4, %v1584_v20, %v1586_v26  ;;  %1784 = vmatpush1.bf16.msra.mxu0 %v1747_v23 }
 0x50a   :  { %1824 = vmatprep.subr.bf16.mxu1 %v1750_v29  ;;  %v1588_v32 = vpop.permute.xlu0 %1587  ;;  %v1617_v36 = vmul.f32 %v1600_v24, %v1593_v28 }
 0x50b   :  { %v1592_v37 = vsel %vm226_vm4, %v1586_v26, %v1588_v32  ;;  %1825 = vmatpush1.bf16.msra.mxu1 %v1749_v25 }
 0x50c   :  { %v1618_v38 = vmul.f32 %v1604_v30, %v1592_v37  ;;  %v1590_v39 = vpop.permute.xlu1 %1589  ;;  %v1743_v2 = vpack.c.bf16 %v1617_v36, %v4004_v45 }
 0x50d   :  { %v1591_v40 = vsel %vm226_vm4, %v1588_v32, %v1590_v39  ;;  %v1594_v41 = vsel %vm226_vm4, %v1590_v39, %v1584_v20 }
 0x50e   :  { %v1619_v42 = vmul.f32 %v1608_v34, %v1591_v40  ;;  %v1620_v43 = vmul.f32 %v1612_v35, %v1594_v41  ;;  %v1508_v44 = vpop.permute.xlu0 %1507  ;;  %v1744_v3 = vpack.c.bf16 %v1618_v38, %v4006_v50 }
 0x510   :  { %v1745_v0 = vpack.c.bf16 %v1619_v42, %v4010_v54  ;;  %v1510_v1 = vpop.permute.xlu1 %1509  ;;  %1785 = vmatprep.subr.bf16.mxu0 %v1744_v3  ;;  %v1746_v46 = vpack.c.bf16 %v1620_v43, %v4014_v56  ;;  %v1443_v43 = vld [vmem:[%s4717_s8] ss:$8 sm:$0xf] }
 0x511   :  { %1786 = vmatpush1.bf16.msra.mxu0 %v1743_v2  ;;  %v1517_v57 = vsel %vm146_vm5, %v1508_v44, %v1510_v1  ;;  %v1452_v2 = vrot.slane %v1443_v43, %v3435_v10  ;;  %v1448_v48 = vrot.slane %v1443_v43, %v3433_v9  ;;  %v1460_v49 = vrot.slane %v1443_v43, %v3439_v12 }
 0x512   :  { %1826 = vmatprep.subr.bf16.mxu1 %v1746_v46  ;;  %v1512_v47 = vpop.permute.xlu0 %1511  ;;  %v1542_v7 = vmul.f32 %v1528_v52, %v1517_v57 }
 0x513   :  { %1827 = vmatpush1.bf16.msra.mxu1 %v1745_v0  ;;  %v1516_v23 = vsel %vm146_vm5, %v1510_v1, %v1512_v47 }
 0x514   :  { %v1514_v51 = vpop.permute.xlu1 %1513  ;;  %v1543_v37 = vmul.f32 %v1532_v17, %v1516_v23 }
 0x515   :  { %v1515_v19 = vsel %vm146_vm5, %v1512_v47, %v1514_v51  ;;  %v1518_v20 = vsel %vm146_vm5, %v1514_v51, %v1508_v44  ;;  %v3167_v44 = vld [vmem:[%s4717_s8 + $0x1] ss:$8 sm:$0xf] }
 0x516   :  { %v1546_v53 = vpop.permute.xlu0 %1545  ;;  %v1541_v28 = vmul.f32 %v1524_v59, %v1518_v20  ;;  %v1544_v32 = vmul.f32 %v1536_v61, %v1515_v19  ;;  %v1490_v1 = vrot.slane %v3167_v44, %v3435_v10  ;;  %v1494_v52 = vrot.slane %v3167_v44, %v3437_v11 }
 0x517   :  { %v1498_v59 = vrot.slane %v3167_v44, %v3439_v12  ;;  %v1456_v61 = vrot.slane %v1443_v43, %v3437_v11 }
 0x518   :  { %v1548_v58 = vpop.permute.xlu1 %1547 }
 0x519   :  { %v1555_v63 = vsel %vm186_vm6, %v1546_v53, %v1548_v58 }
 0x51a   :  { %v1580_v60 = vmul.f32 %v1566_v55, %v1555_v63  ;;  %v1550_v13 = vpop.permute.xlu0 %1549 }
 0x51b   :  { %v1554_v21 = vsel %vm186_vm6, %v1548_v58, %v1550_v13  ;;  %v1486_v58 = vrot.slane %v3167_v44, %v3433_v9 }
 0x51c   :  { %v1552_v24 = vpop.permute.xlu1 %1551  ;;  %v1740_v25 = vpack.c.bf16 %v1580_v60, %v1542_v7  ;;  %v1581_v26 = vmul.f32 %v1570_v5, %v1554_v21 }
 0x51d   :  { %v1553_v29 = vsel %vm186_vm6, %v1550_v13, %v1552_v24  ;;  %v1556_v30 = vsel %vm186_vm6, %v1552_v24, %v1546_v53 }
 0x51e   :  { %v1579_v34 = vmul.f32 %v1562_v14, %v1556_v30  ;;  %v1582_v35 = vmul.f32 %v1574_v16, %v1553_v29  ;;  %1787 = vmatprep.subr.bf16.mxu0 %v1740_v25  ;;  %v1432_v36 = vpop.permute.xlu0 %1431  ;;  %v1741_v41 = vpack.c.bf16 %v1581_v26, %v1543_v37 }
 0x520   :  { %v1739_v38 = vpack.c.bf16 %v1579_v34, %v1541_v28  ;;  %v1434_v39 = vpop.permute.xlu1 %1433  ;;  %v1742_v40 = vpack.c.bf16 %v1582_v35, %v1544_v32  ;;  %v3165_v28 = vld [vmem:[%s4719_s2 + $0x8] sm:$0xf] }
 0x521   :  { %v1441_v46 = vsel %vm67_vm7, %v1432_v36, %v1434_v39 }
 0x522   :  { %1788 = vmatpush1.bf16.msra.mxu0 %v1739_v38  ;;  %1828 = vmatprep.subr.bf16.mxu1 %v1742_v40  ;;  %v1436_v42 = vpop.permute.xlu0 %1435  ;;  %v1466_v53 = vmul.f32 %v1452_v2, %v1441_v46 }
 0x523   :  { %1829 = vmatpush1.bf16.msra.mxu1 %v1741_v41  ;;  %v1440_v60 = vsel %vm67_vm7, %v1434_v39, %v1436_v42 }
 0x524   :  { %v1438_v3 = vpop.permute.xlu1 %1437  ;;  %v1467_v25 = vmul.f32 %v1456_v61, %v1440_v60 }
 0x525   :  { %v1439_v63 = vsel %vm67_vm7, %v1436_v42, %v1438_v3  ;;  %v1442_v5 = vsel %vm67_vm7, %v1438_v3, %v1432_v36 }
 0x526   :  { %v1470_v0 = vpop.permute.xlu0 %1469  ;;  %v1465_v20 = vmul.f32 %v1448_v48, %v1442_v5  ;;  %v1468_v21 = vmul.f32 %v1460_v49, %v1439_v63  ;;  %v3188_v48 = vld [vmem:[%s4717_s8 + $0x20] ss:$8 sm:$0xf] }
 0x527   :  { %v2178_v61 = vrot.slane %v3188_v48, %v3439_v12 }
 0x528   :  { %v1472_v47 = vpop.permute.xlu1 %1471 }
 0x529   :  { %v1479_v51 = vsel %vm106_vm8, %v1470_v0, %v1472_v47 }
 0x52a   :  { %v1504_v55 = vmul.f32 %v1490_v1, %v1479_v51  ;;  %v1474_v57 = vpop.permute.xlu0 %1473  ;;  %v2166_v51 = vrot.slane %v3188_v48, %v3433_v9 }
 0x52b   :  { %v1478_v7 = vsel %vm106_vm8, %v1472_v47, %v1474_v57  ;;  %v3181_v47 = vld [vmem:[%s4716_s3 + $0x20] sm:$0xff] }
 0x52c   :  { %v1476_v13 = vpop.permute.xlu1 %1475  ;;  %v1736_v14 = vpack.c.bf16 %v1504_v55, %v1466_v53  ;;  %v1505_v16 = vmul.f32 %v1494_v52, %v1478_v7  ;;  %v2170_v53 = vrot.slane %v3188_v48, %v3435_v10 }
 0x52d   :  { %v1477_v17 = vsel %vm106_vm8, %v1474_v57, %v1476_v13  ;;  %v1480_v19 = vsel %vm106_vm8, %v1476_v13, %v1470_v0 }
 0x52e   :  { %v1503_v23 = vmul.f32 %v1486_v58, %v1480_v19  ;;  %v1506_v24 = vmul.f32 %v1498_v59, %v1477_v17  ;;  %1789 = vmatprep.subr.bf16.mxu0 %v1736_v14  ;;  %v1737_v30 = vpack.c.bf16 %v1505_v16, %v1467_v25  ;;  %v2174_v59 = vrot.slane %v3188_v48, %v3437_v11 }
 0x530   :  { %v1735_v26 = vpack.c.bf16 %v1503_v23, %v1465_v20  ;;  %v1738_v29 = vpack.c.bf16 %v1506_v24, %v1468_v21 }
 0x532   :  { %1790 = vmatpush1.bf16.msra.mxu0 %v1735_v26  ;;  %1830 = vmatprep.subr.bf16.mxu1 %v1738_v29 }
 0x533   :  { %1831 = vmatpush1.bf16.msra.mxu1 %v1737_v30 }
 0x535   :  { %3175 = vmatmul.mubr.msk.bf16.vlgmr.msra.gmra.mxu0 %vm403_vm9, %v3165_v28 }
 0x536   :  { %3177 = vmatmul.mubr.msk.bf16.vlgmr.msra.gmra.mxu1 %vm403_vm9, %v3165_v28  ;;  %2259 = vmatprep.mubr.bf16.mxu0 %v3288_v4  ;;  %v3187_v28 = vld [vmem:[%s4717_s8 + $0x7] ss:$8 sm:$0xf] }
 0x537   :  { %2300 = vmatprep.mubr.bf16.mxu1 %v3288_v4  ;;  %v1758_v32 = vpop.permute.xlu0 %1757  ;;  %v2136_v48 = vrot.slane %v3187_v28, %v3437_v11 }
 0x5f5   :  { %v1809_v34 = vpop.f32.mrf.mxu0 }
 0x5f6   :  { %v1810_v35 = vadd.f32 %v1809_v34, %v1758_v32  ;;  %v1850_v36 = vpop.f32.mrf.mxu1 }
 0x5f7   :  { %v1811_v37 = vpop.f32.mrf.mxu0  ;;  %v1851_v39 = vadd.f32 %v1850_v36, %v1758_v32 }
 0x5f8   :  { %v4214_v38 = vmax.f32 %v1810_v35, 0.0  ;;  %v1812_v40 = vadd.f32 %v1811_v37, %v1758_v32  ;;  %v1852_v41 = vpop.f32.mrf.mxu1  ;;  %v2128_v35 = vrot.slane %v3187_v28, %v3433_v9 }
 0x5f9   :  { %v1813_v42 = vpop.f32.mrf.mxu0  ;;  %v1853_v44 = vadd.f32 %v1852_v41, %v1758_v32  ;;  %v4220_v0 = vmax.f32 %v1851_v39, 0.0  ;;  %v3186_v32 = vld [vmem:[%s4717_s8 + $0x6] ss:$8 sm:$0xf] }
 0x5fa   :  { %v4216_v43 = vmax.f32 %v1812_v40, 0.0  ;;  %v1854_v3 = vpop.f32.mrf.mxu1  ;;  %2149 = vrot.lane.b32.xlu1 %v4214_v38, %s3281_s13  ;;  %v2090_v36 = vrot.slane %v3186_v32, %v3433_v9  ;;  %v2094_v37 = vrot.slane %v3186_v32, %v3435_v10  ;;  %v2132_v40 = vrot.slane %v3187_v28, %v3435_v10 }
 0x5fb   :  { %v1814_v2 = vpop.f32.mrf.mxu0  ;;  %v4224_v46 = vmax.f32 %v1853_v44, 0.0  ;;  %v2098_v42 = vrot.slane %v3186_v32, %v3437_v11  ;;  %v2102_v44 = vrot.slane %v3186_v32, %v3439_v12 }
 0x5fc   :  { %v1855_v1 = vpop.f32.mrf.mxu1  ;;  %2151 = vrot.lane.b32.xlu0 %v4216_v43, %s3281_s13 }
 0x5fe   :  { %2153 = vrot.lane.b32.xlu1 %v4220_v0, %s3281_s13 }
 0x600   :  { %2155 = vrot.lane.b32.xlu0 %v4224_v46, %s3281_s13 }
 0x602   :  { %2073 = vrot.lane.b32.xlu1 %v4214_v38, %s3282_s18 }
 0x604   :  { %2075 = vrot.lane.b32.xlu0 %v4216_v43, %s3282_s18 }
 0x606   :  { %2077 = vrot.lane.b32.xlu1 %v4220_v0, %s3282_s18 }
 0x608   :  { %2079 = vrot.lane.b32.xlu0 %v4224_v46, %s3282_s18 }
 0x60a   :  { %2111 = vrot.lane.b32.xlu1 %v4214_v38, %s3283_s19 }
 0x60c   :  { %2113 = vrot.lane.b32.xlu0 %v4216_v43, %s3283_s19 }
 0x60e   :  { %2115 = vrot.lane.b32.xlu1 %v4220_v0, %s3283_s19 }
 0x610   :  { %2117 = vrot.lane.b32.xlu0 %v4224_v46, %s3283_s19 }
 0x612   :  { %2035 = vrot.lane.b32.xlu1 %v4214_v38, %s3284_s20 }
 0x614   :  { %2037 = vrot.lane.b32.xlu0 %v4216_v43, %s3284_s20 }
 0x616   :  { %2039 = vrot.lane.b32.xlu1 %v4220_v0, %s3284_s20 }
 0x618   :  { %2041 = vrot.lane.b32.xlu0 %v4224_v46, %s3284_s20 }
 0x61a   :  { %1959 = vrot.lane.b32.xlu1 %v4214_v38, %s3285_s21 }
 0x61c   :  { %1961 = vrot.lane.b32.xlu0 %v4216_v43, %s3285_s21 }
 0x61e   :  { %1963 = vrot.lane.b32.xlu1 %v4220_v0, %s3285_s21 }
 0x620   :  { %1965 = vrot.lane.b32.xlu0 %v4224_v46, %s3285_s21 }
 0x622   :  { %1997 = vrot.lane.b32.xlu1 %v4214_v38, %s3286_s22 }
 0x624   :  { %1999 = vrot.lane.b32.xlu0 %v4216_v43, %s3286_s22 }
 0x626   :  { %2001 = vrot.lane.b32.xlu1 %v4220_v0, %s3286_s22 }
 0x628   :  { %2003 = vrot.lane.b32.xlu0 %v4224_v46, %s3286_s22 }
 0x62a   :  { %1883 = vrot.lane.b32.xlu1 %v4214_v38, %s3287_s23 }
 0x62c   :  { %1885 = vrot.lane.b32.xlu0 %v4216_v43, %s3287_s23 }
 0x62e   :  { %1887 = vrot.lane.b32.xlu1 %v4220_v0, %s3287_s23 }
 0x630   :  { %1889 = vrot.lane.b32.xlu0 %v4224_v46, %s3287_s23 }
 0x632   :  { %1921 = vrot.lane.b32.xlu1 %v4214_v38, %s3289_s24 }
 0x634   :  { %1923 = vrot.lane.b32.xlu0 %v4216_v43, %s3289_s24 }
 0x636   :  { %1925 = vrot.lane.b32.xlu1 %v4220_v0, %s3289_s24 }
 0x638   :  { %1927 = vrot.lane.b32.xlu0 %v4224_v46, %s3289_s24 }
 0x63a   :  { %2209 = vperm.xlu1 %3275, %v3181_v47  }
 0x66c   :  { %v2150_v49 = vpop.permute.xlu1 %2149 }
 0x66e   :  { %v2152_v52 = vpop.permute.xlu0 %2151 }
 0x66f   :  { %v2159_v55 = vsel %vm346_vm0, %v2150_v49, %v2152_v52 }
 0x670   :  { %v2183_v57 = vmul.f32 %v2166_v51, %v2159_v55  ;;  %v2154_v58 = vpop.permute.xlu1 %2153 }
 0x671   :  { %v2158_v63 = vsel %vm346_vm0, %v2152_v52, %v2154_v58 }
 0x672   :  { %v2203_v5 = vpack.c.bf16 %v2183_v57, %v2183_v57  ;;  %v2184_v7 = vmul.f32 %v2170_v53, %v2158_v63  ;;  %v2156_v60 = vpop.permute.xlu0 %2155 }
 0x673   :  { %v2157_v13 = vsel %vm346_vm0, %v2154_v58, %v2156_v60  ;;  %v2160_v14 = vsel %vm346_vm0, %v2156_v60, %v2150_v49  ;;  %v2140_v49 = vrot.slane %v3187_v28, %v3439_v12 }
 0x674   :  { %v2204_v16 = vpack.c.bf16 %v2184_v7, %v2184_v7  ;;  %v2185_v17 = vmul.f32 %v2174_v59, %v2157_v13  ;;  %v2186_v19 = vmul.f32 %v2178_v61, %v2160_v14  ;;  %v2074_v20 = vpop.permute.xlu1 %2073  ;;  %v2216_v25 = vsel %vm407_vm1, %v2203_v5, 0  ;;  %v3185_v59 = vld [vmem:[%s4717_s8 + $0x5] ss:$8 sm:$0xf] }
 0x675   :  { %v2064_v28 = vrot.slane %v3185_v59, %v3439_v12 }
 0x676   :  { %v2205_v21 = vpack.c.bf16 %v2185_v17, %v2185_v17  ;;  %v2206_v23 = vpack.c.bf16 %v2186_v19, %v2186_v19  ;;  %v2076_v24 = vpop.permute.xlu0 %2075  ;;  %3189 = vmatprep.subr.msk.bf16.mxu0 %vm407_vm1, %v2204_v16 }
 0x677   :  { %2234 = vmatpush1.bf16.msra.mxu0 %v2216_v25  ;;  %v2083_v2 = vsel %vm266_vm3, %v2074_v20, %v2076_v24  ;;  %v2056_v25 = vrot.slane %v3185_v59, %v3435_v10 }
 0x678   :  { %3191 = vmatprep.subr.msk.bf16.mxu1 %vm407_vm1, %v2206_v23  ;;  %v2078_v26 = vpop.permute.xlu1 %2077  ;;  %v2222_v29 = vsel %vm407_vm1, %v2205_v21, 0  ;;  %v2107_v61 = vmul.f32 %v2090_v36, %v2083_v2 }
 0x679   :  { %2275 = vmatpush1.bf16.msra.mxu1 %v2222_v29  ;;  %v2082_v41 = vsel %vm266_vm3, %v2076_v24, %v2078_v26 }
 0x67a   :  { %v2080_v30 = vpop.permute.xlu0 %2079  ;;  %v2108_v55 = vmul.f32 %v2094_v37, %v2082_v41 }
 0x67b   :  { %v2081_v1 = vsel %vm266_vm3, %v2078_v26, %v2080_v30  ;;  %v2084_v51 = vsel %vm266_vm3, %v2080_v30, %v2074_v20  ;;  %v2052_v20 = vrot.slane %v3185_v59, %v3433_v9  ;;  %v2060_v30 = vrot.slane %v3185_v59, %v3437_v11 }
 0x67c   :  { %v2112_v34 = vpop.permute.xlu1 %2111  ;;  %v2109_v63 = vmul.f32 %v2098_v42, %v2081_v1  ;;  %v2110_v60 = vmul.f32 %v2102_v44, %v2084_v51  ;;  %v3184_v51 = vld [vmem:[%s4717_s8 + $0x3] ss:$8 sm:$0xf] }
 0x67e   :  { %v2114_v39 = vpop.permute.xlu0 %2113 }
 0x67f   :  { %v2121_v3 = vsel %vm306_vm2, %v2112_v34, %v2114_v39 }
 0x680   :  { %v2116_v47 = vpop.permute.xlu1 %2115  ;;  %v2145_v52 = vmul.f32 %v2128_v35, %v2121_v3 }
 0x681   :  { %v2120_v53 = vsel %vm306_vm2, %v2114_v39, %v2116_v47 }
 0x682   :  { %v2146_v57 = vmul.f32 %v2132_v40, %v2120_v53  ;;  %v2118_v58 = vpop.permute.xlu0 %2117  ;;  %v2199_v19 = vpack.c.bf16 %v2145_v52, %v2107_v61 }
 0x683   :  { %v2119_v5 = vsel %vm306_vm2, %v2116_v47, %v2118_v58  ;;  %v2122_v7 = vsel %vm306_vm2, %v2118_v58, %v2112_v34 }
 0x684   :  { %v2147_v13 = vmul.f32 %v2136_v48, %v2119_v5  ;;  %v2148_v14 = vmul.f32 %v2140_v49, %v2122_v7  ;;  %v2036_v16 = vpop.permute.xlu1 %2035  ;;  %v2200_v17 = vpack.c.bf16 %v2146_v57, %v2108_v55  ;;  %v3183_v49 = vld [vmem:[%s4717_s8 + $0x2] ss:$8 sm:$0xf]  ;;  %v2018_v57 = vrot.slane %v3184_v51, %v3435_v10 }
 0x685   :  { %v1980_v53 = vrot.slane %v3183_v49, %v3435_v10  ;;  %v1976_v61 = vrot.slane %v3183_v49, %v3433_v9  ;;  %v2022_v7 = vrot.slane %v3184_v51, %v3437_v11 }
 0x686   :  { %v2201_v21 = vpack.c.bf16 %v2147_v13, %v2109_v63  ;;  %v2038_v23 = vpop.permute.xlu0 %2037  ;;  %2235 = vmatprep.subr.bf16.mxu0 %v2200_v17  ;;  %v2202_v24 = vpack.c.bf16 %v2148_v14, %v2110_v60  ;;  %v1988_v63 = vrot.slane %v3183_v49, %v3439_v12  ;;  %v2026_v17 = vrot.slane %v3184_v51, %v3439_v12 }
 0x687   :  { %v2045_v26 = vsel %vm226_vm4, %v2036_v16, %v2038_v23  ;;  %2236 = vmatpush1.bf16.msra.mxu0 %v2199_v19  ;;  %v1984_v19 = vrot.slane %v3183_v49, %v3437_v11 }
 0x688   :  { %2276 = vmatprep.subr.bf16.mxu1 %v2202_v24  ;;  %v2040_v29 = vpop.permute.xlu1 %2039  ;;  %v2069_v32 = vmul.f32 %v2052_v20, %v2045_v26 }
 0x689   :  { %v2044_v34 = vsel %vm226_vm4, %v2038_v23, %v2040_v29  ;;  %2277 = vmatpush1.bf16.msra.mxu1 %v2201_v21 }
 0x68a   :  { %v2070_v35 = vmul.f32 %v2056_v25, %v2044_v34  ;;  %v2042_v36 = vpop.permute.xlu0 %2041  ;;  %v2195_v3 = vpack.c.bf16 %v2069_v32, %v4214_v38 }
 0x68b   :  { %v2043_v37 = vsel %vm226_vm4, %v2040_v29, %v2042_v36  ;;  %v2046_v39 = vsel %vm226_vm4, %v2042_v36, %v2036_v16  ;;  %v2014_v16 = vrot.slane %v3184_v51, %v3433_v9 }
 0x68c   :  { %v2071_v40 = vmul.f32 %v2060_v30, %v2043_v37  ;;  %v2072_v41 = vmul.f32 %v2064_v28, %v2046_v39  ;;  %v1960_v42 = vpop.permute.xlu1 %1959  ;;  %v2196_v44 = vpack.c.bf16 %v2070_v35, %v4216_v43 }
 0x68e   :  { %v2197_v2 = vpack.c.bf16 %v2071_v40, %v4220_v0  ;;  %v1962_v1 = vpop.permute.xlu0 %1961  ;;  %2237 = vmatprep.subr.bf16.mxu0 %v2196_v44  ;;  %v2198_v47 = vpack.c.bf16 %v2072_v41, %v4224_v46 }
 0x68f   :  { %2238 = vmatpush1.bf16.msra.mxu0 %v2195_v3  ;;  %v1969_v58 = vsel %vm146_vm5, %v1960_v42, %v1962_v1 }
 0x690   :  { %2278 = vmatprep.subr.bf16.mxu1 %v2198_v47  ;;  %v1964_v48 = vpop.permute.xlu1 %1963  ;;  %v1994_v60 = vmul.f32 %v1980_v53, %v1969_v58 }
 0x691   :  { %2279 = vmatpush1.bf16.msra.mxu1 %v2197_v2  ;;  %v1968_v24 = vsel %vm146_vm5, %v1962_v1, %v1964_v48  ;;  %v1895_v2 = vld [vmem:[%s4717_s8] ss:$8 sm:$0xf]  ;;  %v3182_v1 = vld [vmem:[%s4717_s8 + $0x1] ss:$8 sm:$0xf] }
 0x692   :  { %v1966_v52 = vpop.permute.xlu0 %1965  ;;  %v1995_v39 = vmul.f32 %v1984_v19, %v1968_v24  ;;  %v1942_v51 = vrot.slane %v3182_v1, %v3435_v10 }
 0x693   :  { %v1967_v20 = vsel %vm146_vm5, %v1964_v48, %v1966_v52  ;;  %v1970_v21 = vsel %vm146_vm5, %v1966_v52, %v1960_v42  ;;  %v1904_v48 = vrot.slane %v1895_v2, %v3435_v10 }
 0x694   :  { %v1998_v55 = vpop.permute.xlu1 %1997  ;;  %v1993_v32 = vmul.f32 %v1976_v61, %v1970_v21  ;;  %v1996_v34 = vmul.f32 %v1988_v63, %v1967_v20 }
 0x696   :  { %v2000_v59 = vpop.permute.xlu0 %1999 }
 0x697   :  { %v2007_v5 = vsel %vm186_vm6, %v1998_v55, %v2000_v59 }
 0x698   :  { %v2032_v13 = vmul.f32 %v2018_v57, %v2007_v5  ;;  %v2002_v14 = vpop.permute.xlu1 %2001  ;;  %v1912_v57 = vrot.slane %v1895_v2, %v3439_v12 }
 0x699   :  { %v2006_v23 = vsel %vm186_vm6, %v2000_v59, %v2002_v14  ;;  %v1946_v59 = vrot.slane %v3182_v1, %v3437_v11 }
 0x69a   :  { %v2004_v25 = vpop.permute.xlu0 %2003  ;;  %v2192_v26 = vpack.c.bf16 %v2032_v13, %v1994_v60  ;;  %v2033_v29 = vmul.f32 %v2022_v7, %v2006_v23  ;;  %v1938_v7 = vrot.slane %v3182_v1, %v3433_v9  ;;  %v1950_v60 = vrot.slane %v3182_v1, %v3439_v12 }
 0x69b   :  { %v2005_v30 = vsel %vm186_vm6, %v2002_v14, %v2004_v25  ;;  %v2008_v28 = vsel %vm186_vm6, %v2004_v25, %v1998_v55  ;;  %v1900_v55 = vrot.slane %v1895_v2, %v3433_v9  ;;  %v1908_v13 = vrot.slane %v1895_v2, %v3437_v11 }
 0x69c   :  { %v2031_v35 = vmul.f32 %v2014_v16, %v2008_v28  ;;  %v2034_v36 = vmul.f32 %v2026_v17, %v2005_v30  ;;  %2239 = vmatprep.subr.bf16.mxu0 %v2192_v26  ;;  %v1884_v37 = vpop.permute.xlu1 %1883  ;;  %v2193_v44 = vpack.c.bf16 %v2033_v29, %v1995_v39 }
 0x69e   :  { %v2191_v40 = vpack.c.bf16 %v2031_v35, %v1993_v32  ;;  %v1886_v41 = vpop.permute.xlu0 %1885  ;;  %v2194_v42 = vpack.c.bf16 %v2034_v36, %v1996_v34 }
 0x69f   :  { %v1893_v52 = vsel %vm67_vm7, %v1884_v37, %v1886_v41 }
 0x6a0   :  { %2240 = vmatpush1.bf16.msra.mxu0 %v2191_v40  ;;  %2280 = vmatprep.subr.bf16.mxu1 %v2194_v42  ;;  %v1888_v3 = vpop.permute.xlu1 %1887  ;;  %v1918_v61 = vmul.f32 %v1904_v48, %v1893_v52 }
 0x6a1   :  { %2281 = vmatpush1.bf16.msra.mxu1 %v2193_v44  ;;  %v1892_v19 = vsel %vm67_vm7, %v1886_v41, %v1888_v3 }
 0x6a2   :  { %v1890_v47 = vpop.permute.xlu0 %1889  ;;  %v1919_v32 = vmul.f32 %v1908_v13, %v1892_v19 }
 0x6a3   :  { %v1891_v14 = vsel %vm67_vm7, %v1888_v3, %v1890_v47  ;;  %v1894_v16 = vsel %vm67_vm7, %v1890_v47, %v1884_v37  ;;  %v3180_v37 = vld [vmem:[%s4719_s2 + $0xc] sm:$0xf] }
 0x6a4   :  { %v1922_v49 = vpop.permute.xlu1 %1921  ;;  %v1917_v26 = vmul.f32 %v1900_v55, %v1894_v16  ;;  %v1920_v29 = vmul.f32 %v1912_v57, %v1891_v14 }
 0x6a6   :  { %v1924_v53 = vpop.permute.xlu0 %1923 }
 0x6a7   :  { %v1931_v58 = vsel %vm106_vm8, %v1922_v49, %v1924_v53 }
 0x6a8   :  { %v1956_v63 = vmul.f32 %v1942_v51, %v1931_v58  ;;  %v1926_v5 = vpop.permute.xlu1 %1925 }
 0x6a9   :  { %v1930_v17 = vsel %vm106_vm8, %v1924_v53, %v1926_v5 }
 0x6aa   :  { %v1928_v20 = vpop.permute.xlu0 %1927  ;;  %v2188_v21 = vpack.c.bf16 %v1956_v63, %v1918_v61  ;;  %v1957_v23 = vmul.f32 %v1946_v59, %v1930_v17  ;;  %v3196_v59 = vld [vmem:[%s4716_s3 + $0x28] sm:$0xff]  ;;  %v2798_v61 = vld [vmem:[%s4720_s5] sm:$0xff] }
 0x6ab   :  { %v1929_v24 = vsel %vm106_vm8, %v1926_v5, %v1928_v20  ;;  %v1932_v25 = vsel %vm106_vm8, %v1928_v20, %v1922_v49  ;;  %v2982_v63 = vld [vmem:[%s4721_s7] sm:$0xff]  ;;  %v2983_v5 = vld [vmem:[%s4721_s7 + $0x8] sm:$0xff] }
 0x6ac   :  { %v1955_v30 = vmul.f32 %v1938_v7, %v1932_v25  ;;  %v1958_v28 = vmul.f32 %v1950_v60, %v1929_v24  ;;  %2241 = vmatprep.subr.bf16.mxu0 %v2188_v21  ;;  %v2189_v36 = vpack.c.bf16 %v1957_v23, %v1919_v32  ;;  %v3203_v7 = vld [vmem:[%s4717_s8 + $0x20] ss:$8 sm:$0xf] }
 0x6ad   :  { %v2618_v13 = vrot.slane %v3203_v7, %v3433_v9  ;;  %v2622_v16 = vrot.slane %v3203_v7, %v3435_v10  ;;  %v2626_v21 = vrot.slane %v3203_v7, %v3437_v11  ;;  %v2630_v23 = vrot.slane %v3203_v7, %v3439_v12 }
 0x6ae   :  { %v2187_v34 = vpack.c.bf16 %v1955_v30, %v1917_v26  ;;  %v2190_v35 = vpack.c.bf16 %v1958_v28, %v1920_v29 }
 0x6b0   :  { %2242 = vmatpush1.bf16.msra.mxu0 %v2187_v34  ;;  %2282 = vmatprep.subr.bf16.mxu1 %v2190_v35 }
 0x6b1   :  { %2283 = vmatpush1.bf16.msra.mxu1 %v2189_v36 }
 0x6b3   :  { %3190 = vmatmul.mubr.msk.bf16.vlgmr.msra.gmra.mxu0 %vm403_vm9, %v3180_v37 }
 0x6b4   :  { %3192 = vmatmul.mubr.msk.bf16.vlgmr.msra.gmra.mxu1 %vm403_vm9, %v3180_v37  ;;  %2711 = vmatprep.mubr.bf16.mxu0 %v3288_v4 }
 0x6b5   :  { %2752 = vmatprep.mubr.bf16.mxu1 %v3288_v4  ;;  %v2210_v39 = vpop.permute.xlu1 %2209 }
 0x773   :  { %v2261_v40 = vpop.f32.mrf.mxu0 }
 0x774   :  { %v2262_v41 = vadd.f32 %v2261_v40, %v2210_v39  ;;  %v2302_v42 = vpop.f32.mrf.mxu1 }
 0x775   :  { %v2263_v44 = vpop.f32.mrf.mxu0  ;;  %v2303_v2 = vadd.f32 %v2302_v42, %v2210_v39 }
 0x776   :  { %v4424_v3 = vmax.f32 %v2262_v41, 0.0  ;;  %v2264_v1 = vadd.f32 %v2263_v44, %v2210_v39  ;;  %v2304_v47 = vpop.f32.mrf.mxu1 }
 0x777   :  { %v2265_v48 = vpop.f32.mrf.mxu0  ;;  %v2305_v51 = vadd.f32 %v2304_v47, %v2210_v39  ;;  %v4430_v55 = vmax.f32 %v2303_v2, 0.0  ;;  %v3201_v47 = vld [vmem:[%s4717_s8 + $0x6] ss:$8 sm:$0xf] }
 0x778   :  { %v4426_v49 = vmax.f32 %v2264_v1, 0.0  ;;  %v2306_v52 = vpop.f32.mrf.mxu1  ;;  %2601 = vrot.lane.b32.xlu0 %v4424_v3, %s3281_s13  ;;  %v3202_v1 = vld [vmem:[%s4717_s8 + $0x7] ss:$8 sm:$0xf] }
 0x779   :  { %v2266_v53 = vpop.f32.mrf.mxu0  ;;  %v4434_v58 = vmax.f32 %v2305_v51, 0.0  ;;  %v2580_v51 = vrot.slane %v3202_v1, %v3433_v9  ;;  %v2542_v52 = vrot.slane %v3201_v47, %v3433_v9 }
 0x77a   :  { %v2307_v57 = vpop.f32.mrf.mxu1  ;;  %2603 = vrot.lane.b32.xlu1 %v4426_v49, %s3281_s13  ;;  %v2546_v53 = vrot.slane %v3201_v47, %v3435_v10 }
 0x77c   :  { %2605 = vrot.lane.b32.xlu0 %v4430_v55, %s3281_s13 }
 0x77e   :  { %2607 = vrot.lane.b32.xlu1 %v4434_v58, %s3281_s13 }
 0x780   :  { %2525 = vrot.lane.b32.xlu0 %v4424_v3, %s3282_s18 }
 0x782   :  { %2527 = vrot.lane.b32.xlu1 %v4426_v49, %s3282_s18 }
 0x784   :  { %2529 = vrot.lane.b32.xlu0 %v4430_v55, %s3282_s18 }
 0x786   :  { %2531 = vrot.lane.b32.xlu1 %v4434_v58, %s3282_s18 }
 0x788   :  { %2563 = vrot.lane.b32.xlu0 %v4424_v3, %s3283_s19 }
 0x78a   :  { %2565 = vrot.lane.b32.xlu1 %v4426_v49, %s3283_s19 }
 0x78c   :  { %2567 = vrot.lane.b32.xlu0 %v4430_v55, %s3283_s19 }
 0x78e   :  { %2569 = vrot.lane.b32.xlu1 %v4434_v58, %s3283_s19 }
 0x790   :  { %2487 = vrot.lane.b32.xlu0 %v4424_v3, %s3284_s20 }
 0x792   :  { %2489 = vrot.lane.b32.xlu1 %v4426_v49, %s3284_s20 }
 0x794   :  { %2491 = vrot.lane.b32.xlu0 %v4430_v55, %s3284_s20 }
 0x796   :  { %2493 = vrot.lane.b32.xlu1 %v4434_v58, %s3284_s20 }
 0x798   :  { %2411 = vrot.lane.b32.xlu0 %v4424_v3, %s3285_s21 }
 0x79a   :  { %2413 = vrot.lane.b32.xlu1 %v4426_v49, %s3285_s21 }
 0x79c   :  { %2415 = vrot.lane.b32.xlu0 %v4430_v55, %s3285_s21 }
 0x79e   :  { %2417 = vrot.lane.b32.xlu1 %v4434_v58, %s3285_s21 }
 0x7a0   :  { %2449 = vrot.lane.b32.xlu0 %v4424_v3, %s3286_s22 }
 0x7a2   :  { %2451 = vrot.lane.b32.xlu1 %v4426_v49, %s3286_s22 }
 0x7a4   :  { %2453 = vrot.lane.b32.xlu0 %v4430_v55, %s3286_s22 }
 0x7a6   :  { %2455 = vrot.lane.b32.xlu1 %v4434_v58, %s3286_s22 }
 0x7a8   :  { %2335 = vrot.lane.b32.xlu0 %v4424_v3, %s3287_s23 }
 0x7aa   :  { %2337 = vrot.lane.b32.xlu1 %v4426_v49, %s3287_s23 }
 0x7ac   :  { %2339 = vrot.lane.b32.xlu0 %v4430_v55, %s3287_s23 }
 0x7ae   :  { %2341 = vrot.lane.b32.xlu1 %v4434_v58, %s3287_s23 }
 0x7b0   :  { %2373 = vrot.lane.b32.xlu0 %v4424_v3, %s3289_s24 }
 0x7b2   :  { %2375 = vrot.lane.b32.xlu1 %v4426_v49, %s3289_s24 }
 0x7b4   :  { %2377 = vrot.lane.b32.xlu0 %v4430_v55, %s3289_s24 }
 0x7b6   :  { %2379 = vrot.lane.b32.xlu1 %v4434_v58, %s3289_s24 }
 0x7b8   :  { %2661 = vperm.xlu0 %3274, %v3196_v59   ;;  %v2584_v59 = vrot.slane %v3202_v1, %v3435_v10 }
 0x7ba   :  { %2801 = vperm.xlu1 %3275, %v2798_v61  }
 0x7bc   :  { %2986 = vperm.xlu0 %3274, %v2982_v63   ;;  %v2550_v63 = vrot.slane %v3201_v47, %v3437_v11 }
 0x7be   :  { %2991 = vperm.xlu1 %3275, %v2983_v5   ;;  %v2554_v5 = vrot.slane %v3201_v47, %v3439_v12 }
 0x7ea   :  { %v2602_v60 = vpop.permute.xlu0 %2601 }
 0x7ec   :  { %v2604_v14 = vpop.permute.xlu1 %2603 }
 0x7ed   :  { %v2611_v17 = vsel %vm346_vm0, %v2602_v60, %v2604_v14 }
 0x7ee   :  { %v2635_v19 = vmul.f32 %v2618_v13, %v2611_v17  ;;  %v2606_v20 = vpop.permute.xlu0 %2605  ;;  %v2592_v17 = vrot.slane %v3202_v1, %v3439_v12 }
 0x7ef   :  { %v2610_v24 = vsel %vm346_vm0, %v2604_v14, %v2606_v20 }
 0x7f0   :  { %v2655_v25 = vpack.c.bf16 %v2635_v19, %v2635_v19  ;;  %v2636_v26 = vmul.f32 %v2622_v16, %v2610_v24  ;;  %v2608_v29 = vpop.permute.xlu1 %2607  ;;  %v2588_v16 = vrot.slane %v3202_v1, %v3437_v11 }
 0x7f1   :  { %v2609_v30 = vsel %vm346_vm0, %v2606_v20, %v2608_v29  ;;  %v2612_v28 = vsel %vm346_vm0, %v2608_v29, %v2602_v60 }
 0x7f2   :  { %v2656_v32 = vpack.c.bf16 %v2636_v26, %v2636_v26  ;;  %v2637_v34 = vmul.f32 %v2626_v21, %v2609_v30  ;;  %v2638_v35 = vmul.f32 %v2630_v23, %v2612_v28  ;;  %v2526_v36 = vpop.permute.xlu0 %2525  ;;  %v2668_v41 = vsel %vm407_vm1, %v2655_v25, 0  ;;  %v3200_v26 = vld [vmem:[%s4717_s8 + $0x5] ss:$8 sm:$0xf] }
 0x7f3   :  { %v2508_v1 = vrot.slane %v3200_v26, %v3435_v10 }
 0x7f4   :  { %v2657_v37 = vpack.c.bf16 %v2637_v34, %v2637_v34  ;;  %v2658_v39 = vpack.c.bf16 %v2638_v35, %v2638_v35  ;;  %v2528_v40 = vpop.permute.xlu1 %2527  ;;  %3204 = vmatprep.subr.msk.bf16.mxu0 %vm407_vm1, %v2656_v32 }
 0x7f5   :  { %2686 = vmatpush1.bf16.msra.mxu0 %v2668_v41  ;;  %v2535_v60 = vsel %vm266_vm3, %v2526_v36, %v2528_v40  ;;  %v2504_v41 = vrot.slane %v3200_v26, %v3433_v9 }
 0x7f6   :  { %3206 = vmatprep.subr.msk.bf16.mxu1 %vm407_vm1, %v2658_v39  ;;  %v2530_v42 = vpop.permute.xlu0 %2529  ;;  %v2674_v44 = vsel %vm407_vm1, %v2657_v37, 0  ;;  %v2559_v29 = vmul.f32 %v2542_v52, %v2535_v60  ;;  %v2516_v52 = vrot.slane %v3200_v26, %v3439_v12 }
 0x7f7   :  { %2727 = vmatpush1.bf16.msra.mxu1 %v2674_v44  ;;  %v2534_v61 = vsel %vm266_vm3, %v2528_v40, %v2530_v42 }
 0x7f8   :  { %v2532_v2 = vpop.permute.xlu1 %2531  ;;  %v2560_v23 = vmul.f32 %v2546_v53, %v2534_v61 }
 0x7f9   :  { %v2533_v13 = vsel %vm266_vm3, %v2530_v42, %v2532_v2  ;;  %v2536_v19 = vsel %vm266_vm3, %v2532_v2, %v2526_v36 }
 0x7fa   :  { %v2564_v48 = vpop.permute.xlu0 %2563  ;;  %v2561_v30 = vmul.f32 %v2550_v63, %v2533_v13  ;;  %v2562_v34 = vmul.f32 %v2554_v5, %v2536_v19 }
 0x7fc   :  { %v2566_v57 = vpop.permute.xlu1 %2565 }
 0x7fd   :  { %v2573_v7 = vsel %vm306_vm2, %v2564_v48, %v2566_v57 }
 0x7fe   :  { %v2568_v14 = vpop.permute.xlu0 %2567  ;;  %v2597_v20 = vmul.f32 %v2580_v51, %v2573_v7  ;;  %v2512_v51 = vrot.slane %v3200_v26, %v3437_v11 }
 0x7ff   :  { %v2572_v21 = vsel %vm306_vm2, %v2566_v57, %v2568_v14 }
 0x800   :  { %v2598_v24 = vmul.f32 %v2584_v59, %v2572_v21  ;;  %v2570_v25 = vpop.permute.xlu1 %2569  ;;  %v2651_v40 = vpack.c.bf16 %v2597_v20, %v2559_v29 }
 0x801   :  { %v2571_v28 = vsel %vm306_vm2, %v2568_v14, %v2570_v25  ;;  %v2574_v32 = vsel %vm306_vm2, %v2570_v25, %v2564_v48 }
 0x802   :  { %v2599_v35 = vmul.f32 %v2588_v16, %v2571_v28  ;;  %v2600_v36 = vmul.f32 %v2592_v17, %v2574_v32  ;;  %v2488_v37 = vpop.permute.xlu0 %2487  ;;  %v2652_v39 = vpack.c.bf16 %v2598_v24, %v2560_v23  ;;  %v3198_v23 = vld [vmem:[%s4717_s8 + $0x2] ss:$8 sm:$0xf]  ;;  %v3199_v24 = vld [vmem:[%s4717_s8 + $0x3] ss:$8 sm:$0xf] }
 0x803   :  { %v2432_v26 = vrot.slane %v3198_v23, %v3435_v10 }
 0x804   :  { %v2653_v42 = vpack.c.bf16 %v2599_v35, %v2561_v30  ;;  %v2490_v44 = vpop.permute.xlu1 %2489  ;;  %2687 = vmatprep.subr.bf16.mxu0 %v2652_v39  ;;  %v2654_v2 = vpack.c.bf16 %v2600_v36, %v2562_v34  ;;  %v2470_v30 = vrot.slane %v3199_v24, %v3435_v10  ;;  %v2428_v34 = vrot.slane %v3198_v23, %v3433_v9 }
 0x805   :  { %v2497_v47 = vsel %vm226_vm4, %v2488_v37, %v2490_v44  ;;  %2688 = vmatpush1.bf16.msra.mxu0 %v2651_v40  ;;  %v2440_v35 = vrot.slane %v3198_v23, %v3439_v12 }
 0x806   :  { %2728 = vmatprep.subr.bf16.mxu1 %v2654_v2  ;;  %v2492_v48 = vpop.permute.xlu0 %2491  ;;  %v2521_v53 = vmul.f32 %v2504_v41, %v2497_v47  ;;  %v2436_v2 = vrot.slane %v3198_v23, %v3437_v11  ;;  %v2347_v23 = vld [vmem:[%s4717_s8] ss:$8 sm:$0xf] }
 0x807   :  { %v2496_v57 = vsel %vm226_vm4, %v2490_v44, %v2492_v48  ;;  %2729 = vmatpush1.bf16.msra.mxu1 %v2653_v42  ;;  %v2466_v42 = vrot.slane %v3199_v24, %v3433_v9  ;;  %v2478_v44 = vrot.slane %v3199_v24, %v3439_v12 }
 0x808   :  { %v2522_v59 = vmul.f32 %v2508_v1, %v2496_v57  ;;  %v2494_v61 = vpop.permute.xlu1 %2493  ;;  %v2647_v16 = vpack.c.bf16 %v2521_v53, %v4424_v3 }
 0x809   :  { %v2495_v63 = vsel %vm226_vm4, %v2492_v48, %v2494_v61  ;;  %v2498_v5 = vsel %vm226_vm4, %v2494_v61, %v2488_v37  ;;  %v2474_v37 = vrot.slane %v3199_v24, %v3437_v11  ;;  %v3197_v24 = vld [vmem:[%s4717_s8 + $0x1] ss:$8 sm:$0xf] }
 0x80a   :  { %v2523_v7 = vmul.f32 %v2512_v51, %v2495_v63  ;;  %v2524_v60 = vmul.f32 %v2516_v52, %v2498_v5  ;;  %v2412_v13 = vpop.permute.xlu0 %2411  ;;  %v2648_v14 = vpack.c.bf16 %v2522_v59, %v4426_v49 }
 0x80c   :  { %v2649_v17 = vpack.c.bf16 %v2523_v7, %v4430_v55  ;;  %v2414_v19 = vpop.permute.xlu1 %2413  ;;  %2689 = vmatprep.subr.bf16.mxu0 %v2648_v14  ;;  %v2650_v20 = vpack.c.bf16 %v2524_v60, %v4434_v58 }
 0x80d   :  { %2690 = vmatpush1.bf16.msra.mxu0 %v2647_v16  ;;  %v2421_v28 = vsel %vm146_vm5, %v2412_v13, %v2414_v19 }
 0x80e   :  { %2730 = vmatprep.subr.bf16.mxu1 %v2650_v20  ;;  %v2416_v21 = vpop.permute.xlu0 %2415  ;;  %v2446_v39 = vmul.f32 %v2432_v26, %v2421_v28  ;;  %v2356_v26 = vrot.slane %v2347_v23, %v3435_v10 }
 0x80f   :  { %2731 = vmatpush1.bf16.msra.mxu1 %v2649_v17  ;;  %v2420_v51 = vsel %vm146_vm5, %v2414_v19, %v2416_v21 }
 0x810   :  { %v2418_v25 = vpop.permute.xlu1 %2417  ;;  %v2447_v14 = vmul.f32 %v2436_v2, %v2420_v51 }
 0x811   :  { %v2419_v1 = vsel %vm146_vm5, %v2416_v21, %v2418_v25  ;;  %v2422_v47 = vsel %vm146_vm5, %v2418_v25, %v2412_v13 }
 0x812   :  { %v2450_v29 = vpop.permute.xlu0 %2449  ;;  %v2445_v63 = vmul.f32 %v2428_v34, %v2422_v47  ;;  %v2448_v5 = vmul.f32 %v2440_v35, %v2419_v1  ;;  %v2352_v34 = vrot.slane %v2347_v23, %v3433_v9  ;;  %v2364_v35 = vrot.slane %v2347_v23, %v3439_v12 }
 0x814   :  { %v2452_v32 = vpop.permute.xlu1 %2451 }
 0x815   :  { %v2459_v36 = vsel %vm186_vm6, %v2450_v29, %v2452_v32 }
 0x816   :  { %v2484_v40 = vmul.f32 %v2470_v30, %v2459_v36  ;;  %v2454_v41 = vpop.permute.xlu0 %2453  ;;  %v2394_v30 = vrot.slane %v3197_v24, %v3435_v10  ;;  %v2402_v10 = vrot.slane %v3197_v24, %v3439_v12 }
 0x817   :  { %v2458_v48 = vsel %vm186_vm6, %v2452_v32, %v2454_v41 }
 0x818   :  { %v2456_v52 = vpop.permute.xlu1 %2455  ;;  %v2644_v53 = vpack.c.bf16 %v2484_v40, %v2446_v39  ;;  %v2485_v57 = vmul.f32 %v2474_v37, %v2458_v48  ;;  %v2398_v37 = vrot.slane %v3197_v24, %v3437_v11 }
 0x819   :  { %v2457_v59 = vsel %vm186_vm6, %v2454_v41, %v2456_v52  ;;  %v2460_v61 = vsel %vm186_vm6, %v2456_v52, %v2450_v29 }
 0x81a   :  { %v2483_v7 = vmul.f32 %v2466_v42, %v2460_v61  ;;  %v2486_v60 = vmul.f32 %v2478_v44, %v2457_v59  ;;  %2691 = vmatprep.subr.bf16.mxu0 %v2644_v53  ;;  %v2336_v13 = vpop.permute.xlu0 %2335  ;;  %v2645_v19 = vpack.c.bf16 %v2485_v57, %v2447_v14  ;;  %v2390_v42 = vrot.slane %v3197_v24, %v3433_v9 }
 0x81b   :  { %v2360_v44 = vrot.slane %v2347_v23, %v3437_v11 }
 0x81c   :  { %v2643_v16 = vpack.c.bf16 %v2483_v7, %v2445_v63  ;;  %v2338_v17 = vpop.permute.xlu1 %2337  ;;  %v2646_v20 = vpack.c.bf16 %v2486_v60, %v2448_v5 }
 0x81d   :  { %v2345_v28 = vsel %vm67_vm7, %v2336_v13, %v2338_v17 }
 0x81e   :  { %2692 = vmatpush1.bf16.msra.mxu0 %v2643_v16  ;;  %2732 = vmatprep.subr.bf16.mxu1 %v2646_v20  ;;  %v2340_v21 = vpop.permute.xlu0 %2339  ;;  %v2370_v39 = vmul.f32 %v2356_v26, %v2345_v28 }
 0x81f   :  { %2733 = vmatpush1.bf16.msra.mxu1 %v2645_v19  ;;  %v2344_v48 = vsel %vm67_vm7, %v2338_v17, %v2340_v21 }
 0x820   :  { %v2342_v25 = vpop.permute.xlu1 %2341  ;;  %v2371_v63 = vmul.f32 %v2360_v44, %v2344_v48  ;;  %v3260_v44 = vpack.c.bf16 %v4434_v58, %v4224_v46  ;;  %v3253_v46 = vpack.c.bf16 %v4004_v45, %v3794_v22  ;;  %v3279_v22 = vld [vmem:[%s4715_s0] sm:$0xff] }
 0x821   :  { %v2343_v2 = vsel %vm67_vm7, %v2340_v21, %v2342_v25  ;;  %v2346_v1 = vsel %vm67_vm7, %v2342_v25, %v2336_v13  ;;  %v3195_v13 = vld [vmem:[%s4719_s2 + $0x10] sm:$0xf]  ;;  %v3249_v45 = vpack.c.bf16 %v3584_v62, %v3279_v22 }
 0x822   :  { %v2374_v29 = vpop.permute.xlu0 %2373  ;;  %v2369_v12 = vmul.f32 %v2352_v34, %v2346_v1  ;;  %v2372_v57 = vmul.f32 %v2364_v35, %v2343_v2  ;;  %v3257_v2 = vpack.c.bf16 %v4424_v3, %v4214_v38  ;;  %v3254_v1 = vpack.c.bf16 %v4006_v50, %v3796_v27  ;;  %v3277_v38 = vld [vmem:[%s4715_s0 + $0x8] sm:$0xff] }
 0x823   :  { %v3250_v3 = vpack.c.bf16 %v3592_v15, %v3277_v38  ;;  %v3255_v27 = vpack.c.bf16 %v4010_v54, %v3800_v31  ;;  %v3280_v15 = vld [vmem:[%s4715_s0 + $0x10] sm:$0xff] }
 0x824   :  { %v2376_v32 = vpop.permute.xlu1 %2375  ;;  %v3251_v31 = vpack.c.bf16 %v3586_v6, %v3280_v15 }
 0x825   :  { %v2383_v36 = vsel %vm106_vm8, %v2374_v29, %v2376_v32 }
 0x826   :  { %v2408_v40 = vmul.f32 %v2394_v30, %v2383_v36  ;;  %v2378_v41 = vpop.permute.xlu0 %2377 }
 0x827   :  { %v2382_v47 = vsel %vm106_vm8, %v2376_v32, %v2378_v41 }
 0x828   :  { %v2380_v51 = vpop.permute.xlu1 %2379  ;;  %v2640_v52 = vpack.c.bf16 %v2408_v40, %v2370_v39  ;;  %v2409_v53 = vmul.f32 %v2398_v37, %v2382_v47 }
 0x829   :  { %v2381_v9 = vsel %vm106_vm8, %v2378_v41, %v2380_v51  ;;  %v2384_v11 = vsel %vm106_vm8, %v2380_v51, %v2374_v29 }
 0x82a   :  { %v2407_v59 = vmul.f32 %v2390_v42, %v2384_v11  ;;  %v2410_v61 = vmul.f32 %v2402_v10, %v2381_v9  ;;  %2693 = vmatprep.subr.bf16.mxu0 %v2640_v52  ;;  %v2641_v60 = vpack.c.bf16 %v2409_v53, %v2371_v63  ;;  %v3258_v42 = vpack.c.bf16 %v4426_v49, %v4216_v43 }
 0x82b   :  { %v3259_v43 = vpack.c.bf16 %v4430_v55, %v4220_v0  ;;  %v3256_v49 = vpack.c.bf16 %v4014_v56, %v3804_v33  ;;  %v3278_v33 = vld [vmem:[%s4715_s0 + $0x18] sm:$0xff] }
 0x82c   :  { %v2639_v5 = vpack.c.bf16 %v2407_v59, %v2369_v12  ;;  %v2642_v7 = vpack.c.bf16 %v2410_v61, %v2372_v57  ;;  %v3252_v50 = vpack.c.bf16 %v3598_v18, %v3278_v33  ;;  %v2783_v18 = vld [vmem:[%s4722_s4] sm:$0xf] }
 0x82e   :  { %2694 = vmatpush1.bf16.msra.mxu0 %v2639_v5  ;;  %2734 = vmatprep.subr.bf16.mxu1 %v2642_v7 }
 0x82f   :  { %2735 = vmatpush1.bf16.msra.mxu1 %v2641_v60  ;;  %v3276_v60 = vld [vmem:[%s4723_s6] sm:$0xff]  }
 0x831   :  { %3205 = vmatmul.mubr.msk.bf16.vlgmr.msra.gmra.mxu0 %vm403_vm9, %v3195_v13 }
 0x832   :  { %3207 = vmatmul.mubr.msk.bf16.vlgmr.msra.gmra.mxu1 %vm403_vm9, %v3195_v13  ;;  %2922 = vmatprep.mubr.bf16.mxu0 %v3288_v4 }
 0x833   :  { %2963 = vmatprep.mubr.bf16.mxu1 %v3288_v4  ;;  %v2662_v8 = vpop.permute.xlu0 %2661 }
 0x835   :  { %v2802_v62 = vpop.permute.xlu1 %2801 }
 0x8f1   :  { %v2713_v14 = vpop.f32.mrf.mxu0 }
 0x8f2   :  { %v2714_v16 = vadd.f32 %v2713_v14, %v2662_v8  ;;  %v2754_v17 = vpop.f32.mrf.mxu1 }
 0x8f3   :  { %v2755_v20 = vadd.f32 %v2754_v17, %v2662_v8  ;;  %v2715_v19 = vpop.f32.mrf.mxu0 }
 0x8f4   :  { %v2761_v21 = vmax.f32 %v2714_v16, 0.0  ;;  %v2716_v23 = vadd.f32 %v2715_v19, %v2662_v8  ;;  %v2756_v24 = vpop.f32.mrf.mxu1 }
 0x8f5   :  { %v2763_v25 = vmax.f32 %v2755_v20, 0.0  ;;  %v2757_v26 = vadd.f32 %v2756_v24, %v2662_v8  ;;  %v2717_v29 = vpop.f32.mrf.mxu0  ;;  %v2987_v8 = vpop.permute.xlu0 %2986 }
 0x8f6   :  { %v3261_v30 = vpack.c.bf16 %v2761_v21, %v2761_v21  ;;  %v2762_v28 = vmax.f32 %v2716_v23, 0.0  ;;  %v2758_v32 = vpop.f32.mrf.mxu1 }
 0x8f7   :  { %v3263_v34 = vpack.c.bf16 %v2763_v25, %v2763_v25  ;;  %v2764_v35 = vmax.f32 %v2757_v26, 0.0  ;;  %v2718_v36 = vpop.f32.mrf.mxu0  ;;  %v2992_v25 = vpop.permute.xlu1 %2991 }
 0x8f8   :  { %v3262_v37 = vpack.c.bf16 %v2762_v28, %v2762_v28  ;;  %v2759_v39 = vpop.f32.mrf.mxu1  ;;  %v2879_v41 = vsel %vm407_vm1, %v3261_v30, 0 }
 0x8f9   :  { %v3264_v40 = vpack.c.bf16 %v2764_v35, %v2764_v35  ;;  %v2885_v10 = vsel %vm407_vm1, %v3263_v34, 0 }
 0x8fa   :  { %3226 = vmatprep.subr.msk.bf16.mxu0 %vm407_vm1, %v3262_v37 }
 0x8fb   :  { %2899 = vmatpush1.bf16.msra.mxu0 %v2879_v41  ;;  %3228 = vmatprep.subr.msk.bf16.mxu1 %vm407_vm1, %v3264_v40 }
 0x8fc   :  { %2900 = vmatprep.subr.bf16.mxu0 %v3258_v42  ;;  %2940 = vmatpush1.bf16.msra.mxu1 %v2885_v10 }
 0x8fd   :  { %2941 = vmatprep.subr.bf16.mxu1 %v3260_v44 }
 0x8ff   :  { %2901 = vmatpush1.bf16.msra.mxu0 %v3257_v2 }
 0x900   :  { %2902 = vmatprep.subr.bf16.mxu0 %v3254_v1  ;;  %2942 = vmatpush1.bf16.msra.mxu1 %v3259_v43 }
 0x901   :  { %2943 = vmatprep.subr.bf16.mxu1 %v3256_v49 }
 0x903   :  { %2903 = vmatpush1.bf16.msra.mxu0 %v3253_v46 }
 0x904   :  { %2904 = vmatprep.subr.bf16.mxu0 %v3250_v3  ;;  %2944 = vmatpush1.bf16.msra.mxu1 %v3255_v27 }
 0x905   :  { %2945 = vmatprep.subr.bf16.mxu1 %v3252_v50 }
 0x907   :  { %2905 = vmatpush1.bf16.msra.mxu0 %v3249_v45 }
 0x908   :  { %2946 = vmatpush1.bf16.msra.mxu1 %v3251_v31 }
 0x90a   :  { %3227 = vmatmul.mubr.msk.bf16.vlgmr.msra.gmra.mxu0 %vm2874_vm10, %v2783_v18 }
 0x90b   :  { %3229 = vmatmul.mubr.msk.bf16.vlgmr.msra.gmra.mxu1 %vm2874_vm10, %v2783_v18  ;;  %3047 = vmatprep.mubr.bf16.mxu0 %v3288_v4 }
 0x90c   :  { %3090 = vmatprep.mubr.bf16.mxu1 %v3288_v4 }
 0x9ca   :  { %v2924_v54 = vpop.f32.mrf.mxu0 }
 0x9cb   :  { %v2925_v56 = vadd.f32 %v2924_v54, %v2802_v62  ;;  %v2965_v0 = vpop.f32.mrf.mxu1 }
 0x9cc   :  { %v2966_v55 = vadd.f32 %v2965_v0, %v2802_v62  ;;  %v2926_v58 = vpop.f32.mrf.mxu0 }
 0x9cd   :  { %v2972_v6 = vmax.f32 %v2925_v56, 0.0  ;;  %v2927_v47 = vadd.f32 %v2926_v58, %v2802_v62  ;;  %v2967_v48 = vpop.f32.mrf.mxu1 }
 0x9ce   :  { %v2974_v51 = vmax.f32 %v2966_v55, 0.0  ;;  %v2968_v52 = vadd.f32 %v2967_v48, %v2802_v62  ;;  %v2928_v53 = vpop.f32.mrf.mxu0 }
 0x9cf   :  { %v2978_v9 = vpack.c.bf16 %v2972_v6, %v2972_v6  ;;  %v2973_v11 = vmax.f32 %v2927_v47, 0.0  ;;  %v2969_v12 = vpop.f32.mrf.mxu1 }
 0x9d0   :  { %v2980_v57 = vpack.c.bf16 %v2974_v51, %v2974_v51  ;;  %v2975_v59 = vmax.f32 %v2968_v52, 0.0  ;;  %v2929_v61 = vpop.f32.mrf.mxu0 }
 0x9d1   :  { %v2979_v63 = vpack.c.bf16 %v2973_v11, %v2973_v11  ;;  %v2970_v4 = vpop.f32.mrf.mxu1  ;;  %v3004_v7 = vsel %vm407_vm1, %v2978_v9, 0 }
 0x9d2   :  { %v2981_v5 = vpack.c.bf16 %v2975_v59, %v2975_v59  ;;  %v3010_v13 = vsel %vm407_vm1, %v2980_v57, 0 }
 0x9d3   :  { %3231 = vmatprep.subr.msk.bf16.mxu0 %vm407_vm1, %v2979_v63 }
 0x9d4   :  { %3030 = vmatpush1.bf16.msra.mxu0 %v3004_v7  ;;  %3233 = vmatprep.subr.msk.bf16.mxu1 %vm407_vm1, %v2981_v5 }
 0x9d5   :  { %3073 = vmatpush1.bf16.msra.mxu1 %v3010_v13 }
 0x9d7   :  { %3232 = vmatmul.mubr.msk.bf16.vlgmr.msra.gmra.mxu0 %vm2999_vm11, %v3276_v60 }
 0x9d8   :  { %3234 = vmatmul.mubr.msk.bf16.vlgmr.msra.gmra.mxu1 %vm2999_vm11, %v3276_v60 }
 0xa97   :  { %v3049_v14 = vpop.f32.mrf.mxu0 }
 0xa98   :  { %v3050_v16 = vadd.f32 %v3049_v14, %v2987_v8  ;;  %v3092_v17 = vpop.f32.mrf.mxu1 }
 0xa99   :  { %v3093_v20 = vadd.f32 %v3092_v17, %v2987_v8  ;;  %v3051_v19 = vpop.f32.mrf.mxu0 }
 0xa9a   :  { %v3101_v21 = vmax.f32 %v3050_v16, 0.0  ;;  %v3052_v23 = vadd.f32 %v3051_v19, %v2987_v8  ;;  %v3094_v24 = vpop.f32.mrf.mxu1 }
 0xa9b   :  { %v3103_v26 = vmax.f32 %v3093_v20, 0.0  ;;  %v3095_v29 = vadd.f32 %v3094_v24, %v2987_v8  ;;  %v3053_v30 = vpop.f32.mrf.mxu0 }
 0xa9c   :  { %3109 = vst [vmem:[%s4724_s9] sm:$0xff] %v3101_v21  ;;  %v3102_v28 = vmax.f32 %v3052_v23, 0.0  ;;  %v3054_v32 = vadd.f32 %v3053_v30, %v2992_v25  ;;  %v3096_v34 = vpop.f32.mrf.mxu1 }
 0xa9d   :  { %3111 = vst [vmem:[%s4724_s9 + $0x10] sm:$0xff] %v3103_v26  ;;  %v3104_v35 = vmax.f32 %v3095_v29, 0.0  ;;  %v3097_v36 = vadd.f32 %v3096_v34, %v2992_v25  ;;  %v3055_v37 = vpop.f32.mrf.mxu0 }
 0xa9e   :  { %3110 = vst [vmem:[%s4724_s9 + $0x8] sm:$0xff] %v3102_v28  ;;  %v3105_v39 = vmax.f32 %v3054_v32, 0.0  ;;  %v3056_v40 = vadd.f32 %v3055_v37, %v2992_v25  ;;  %v3098_v41 = vpop.f32.mrf.mxu1 }
 0xa9f   :  { %3112 = vst [vmem:[%s4724_s9 + $0x18] sm:$0xff] %v3104_v35  ;;  %v3107_v42 = vmax.f32 %v3097_v36, 0.0  ;;  %v3099_v10 = vadd.f32 %v3098_v41, %v2992_v25 }
 0xaa0   :  { %3113 = vst [vmem:[%s4724_s9 + $0x20] sm:$0xff] %v3105_v39  ;;  %v3106_v44 = vmax.f32 %v3056_v40, 0.0 }
 0xaa1   :  { %3115 = vst [vmem:[%s4724_s9 + $0x30] sm:$0xff] %v3107_v42  ;;  %v3108_v2 = vmax.f32 %v3099_v10, 0.0 }
 0xaa2   :  { %3114 = vst [vmem:[%s4724_s9 + $0x28] sm:$0xff] %v3106_v44 }
 0xaa3   :  { %3116 = vst [vmem:[%s4724_s9 + $0x38] sm:$0xff] %v3108_v2 }

</bundles_post_ra>
